<compile_context>
chip_gen: v7x
topology: tpu7x:2x2x1
jax: 0.10.0
libtpu: 0.0.40
codegen_flags: <defaults>
</compile_context>

<pallas_src>
import functools
import math

import jax
import jax.numpy as jnp
from jax.experimental import pallas as pl
from jax.experimental.pallas import tpu as pltpu


# ----------------------------------------------------------------------------
# helpers
# ----------------------------------------------------------------------------
def _round_up(x, m):
    return ((x + m - 1) // m) * m


def _pick_tile(dim, pref, align):
    """Largest tile <= pref that is a multiple of `align`, preferring one that
    divides `dim` (to avoid padding)."""
    t = min(pref, _round_up(dim, align))
    while t > align and dim % t != 0:
        t -= align
    return t


def _vmem_limit(block_bytes):
    """Per-call VMEM budget: double-buffered blocks + headroom, clamped to
    v7x's 64 MiB/TensorCore physical capacity."""
    return int(min(64 << 20, max(16 << 20, 2 * block_bytes + (8 << 20))))


# ----------------------------------------------------------------------------
# Tiled matmul:  y = x @ w + b   (optional fused ReLU epilogue)
# x: (M, K) bf16, w: (K, N) bf16, b: (N,) f32 -> (M, N) out_dtype (bf16 default)
# ----------------------------------------------------------------------------
def _matmul_kernel_single(x_ref, w_ref, b_ref, o_ref, *, relu):
    # Single K step: no scratch accumulator round-trip.
    y = jnp.dot(x_ref[...], w_ref[...], preferred_element_type=jnp.float32)
    y = y + b_ref[...]
    if relu:
        y = jnp.maximum(y, 0.0)
    o_ref[...] = y.astype(o_ref.dtype)


def _matmul_kernel_multi(x_ref, w_ref, b_ref, o_ref, acc_ref, *, relu):
    @pl.when(pl.program_id(2) == 0)
    def _():
        acc_ref[...] = jnp.zeros_like(acc_ref)

    acc_ref[...] += jnp.dot(x_ref[...], w_ref[...],
                            preferred_element_type=jnp.float32)

    @pl.when(pl.program_id(2) == pl.num_programs(2) - 1)
    def _():
        y = acc_ref[...] + b_ref[...]
        if relu:
            y = jnp.maximum(y, 0.0)
        o_ref[...] = y.astype(o_ref.dtype)


def linear(x, w, b, relu=False, out_dtype=jnp.bfloat16, tm=256, tn=512, tk=1024):
    M, K = x.shape
    K2, N = w.shape
    assert K == K2
    tm = _pick_tile(M, tm, 8)
    tn = _pick_tile(N, tn, 128)
    tk = _pick_tile(K, tk, 128)
    Mp, Kp, Np = _round_up(M, tm), _round_up(K, tk), _round_up(N, tn)

    # Prefer >=2 parallel blocks (keeps both v7x TensorCores busy).
    if (Mp // tm) * (Np // tn) < 2:
        t = tn
        while t > 128 and (Np % t != 0 or Np // t < 2):
            t -= 128
        if Np % t == 0 and Np // t >= 2:
            tn = t

    if (Mp, Kp) != (M, K):
        x = jnp.pad(x, ((0, Mp - M), (0, Kp - K)))
    if (Kp, Np) != (K, N):
        w = jnp.pad(w, ((0, Kp - K), (0, Np - N)))
    if Np != N:
        b = jnp.pad(b, (0, Np - N))
    b2 = b.reshape(1, Np)

    out_bytes = jnp.dtype(out_dtype).itemsize
    block_bytes = (tm * tk + tk * tn) * 2 + tn * 4 + tm * tn * out_bytes
    k_steps = Kp // tk

    if k_steps == 1:
        out = pl.pallas_call(
            functools.partial(_matmul_kernel_single, relu=relu),
            out_shape=jax.ShapeDtypeStruct((Mp, Np), out_dtype),
            grid=(Mp // tm, Np // tn),
            in_specs=[
                pl.BlockSpec((tm, Kp), lambda i, j: (i, 0)),
                pl.BlockSpec((Kp, tn), lambda i, j: (0, j)),
                pl.BlockSpec((1, tn), lambda i, j: (0, j)),
            ],
            out_specs=pl.BlockSpec((tm, tn), lambda i, j: (i, j)),
            compiler_params=pltpu.CompilerParams(
                dimension_semantics=("parallel", "parallel"),
                vmem_limit_bytes=_vmem_limit(block_bytes),
            ),
        )(x, w, b2)
    else:
        block_bytes += tm * tn * 4  # f32 accumulator scratch
        out = pl.pallas_call(
            functools.partial(_matmul_kernel_multi, relu=relu),
            out_shape=jax.ShapeDtypeStruct((Mp, Np), out_dtype),
            grid=(Mp // tm, Np // tn, k_steps),
            in_specs=[
                pl.BlockSpec((tm, tk), lambda i, j, k: (i, k)),
                pl.BlockSpec((tk, tn), lambda i, j, k: (k, j)),
                pl.BlockSpec((1, tn), lambda i, j, k: (0, j)),
            ],
            out_specs=pl.BlockSpec((tm, tn), lambda i, j, k: (i, j)),
            scratch_shapes=[pltpu.VMEM((tm, tn), jnp.float32)],
            compiler_params=pltpu.CompilerParams(
                dimension_semantics=("parallel", "parallel", "arbitrary"),
                vmem_limit_bytes=_vmem_limit(block_bytes),
            ),
        )(x, w, b2)

    if (Mp, Np) != (M, N):
        out = out[:M, :N]
    return out


# ----------------------------------------------------------------------------
# Fused:  LayerNorm(res + (x @ w + b))   (eps=1e-5), output bf16
# tn == D (full model dim) so the LayerNorm reduction stays in-block.
# ----------------------------------------------------------------------------
def _ln_epilogue(y, g, beta, o_ref):
    mean = jnp.mean(y, axis=-1, keepdims=True)
    var = jnp.mean((y - mean) ** 2, axis=-1, keepdims=True)
    inv = jax.lax.rsqrt(var + 1e-5)
    o_ref[...] = ((y - mean) * inv * g + beta).astype(o_ref.dtype)


def _linear_ln_kernel_single(x_ref, w_ref, b_ref, r_ref, g_ref, bt_ref, o_ref):
    y = jnp.dot(x_ref[...], w_ref[...], preferred_element_type=jnp.float32)
    y = y + b_ref[...] + r_ref[...].astype(jnp.float32)
    _ln_epilogue(y, g_ref[...], bt_ref[...], o_ref)


def _linear_ln_kernel_multi(x_ref, w_ref, b_ref, r_ref, g_ref, bt_ref, o_ref,
                            acc_ref):
    @pl.when(pl.program_id(1) == 0)
    def _():
        acc_ref[...] = jnp.zeros_like(acc_ref)

    acc_ref[...] += jnp.dot(x_ref[...], w_ref[...],
                            preferred_element_type=jnp.float32)

    @pl.when(pl.program_id(1) == pl.num_programs(1) - 1)
    def _():
        y = acc_ref[...] + b_ref[...] + r_ref[...].astype(jnp.float32)
        _ln_epilogue(y, g_ref[...], bt_ref[...], o_ref)


def linear_residual_layernorm(x, w, b, res, gamma, beta,
                              out_dtype=jnp.bfloat16, tm=256, tk=1024):
    M, K = x.shape
    K2, D = w.shape
    assert K == K2 and res.shape == (M, D) and D % 128 == 0
    tm = _pick_tile(M, tm, 8)
    tk = _pick_tile(K, tk, 128)
    Mp, Kp = _round_up(M, tm), _round_up(K, tk)
    # >=2 row blocks if possible (feeds both v7x TensorCores).
    if Mp // tm < 2 and tm >= 32 and (tm // 2) % 16 == 0 and Mp % (tm // 2) == 0:
        tm //= 2

    if Mp != M or Kp != K:
        x = jnp.pad(x, ((0, Mp - M), (0, Kp - K)))
    if Kp != K:
        w = jnp.pad(w, ((0, Kp - K), (0, 0)))
    if Mp != M:
        res = jnp.pad(res, ((0, Mp - M), (0, 0)))

    b2 = b.reshape(1, D)
    g2 = gamma.reshape(1, D)
    bt2 = beta.reshape(1, D)
    out_bytes = jnp.dtype(out_dtype).itemsize
    block_bytes = tm * tk * 2 + tk * D * 2 + tm * D * (2 + out_bytes) + 3 * D * 4
    k_steps = Kp // tk

    if k_steps == 1:
        out = pl.pallas_call(
            _linear_ln_kernel_single,
            out_shape=jax.ShapeDtypeStruct((Mp, D), out_dtype),
            grid=(Mp // tm,),
            in_specs=[
                pl.BlockSpec((tm, Kp), lambda i: (i, 0)),
                pl.BlockSpec((Kp, D), lambda i: (0, 0)),
                pl.BlockSpec((1, D), lambda i: (0, 0)),
                pl.BlockSpec((tm, D), lambda i: (i, 0)),
                pl.BlockSpec((1, D), lambda i: (0, 0)),
                pl.BlockSpec((1, D), lambda i: (0, 0)),
            ],
            out_specs=pl.BlockSpec((tm, D), lambda i: (i, 0)),
            compiler_params=pltpu.CompilerParams(
                dimension_semantics=("parallel",),
                vmem_limit_bytes=_vmem_limit(block_bytes),
            ),
        )(x, w, b2, res, g2, bt2)
    else:
        block_bytes += tm * D * 4
        out = pl.pallas_call(
            _linear_ln_kernel_multi,
            out_shape=jax.ShapeDtypeStruct((Mp, D), out_dtype),
            grid=(Mp // tm, k_steps),
            in_specs=[
                pl.BlockSpec((tm, tk), lambda i, k: (i, k)),
                pl.BlockSpec((tk, D), lambda i, k: (k, 0)),
                pl.BlockSpec((1, D), lambda i, k: (0, 0)),
                pl.BlockSpec((tm, D), lambda i, k: (i, 0)),
                pl.BlockSpec((1, D), lambda i, k: (0, 0)),
                pl.BlockSpec((1, D), lambda i, k: (0, 0)),
            ],
            out_specs=pl.BlockSpec((tm, D), lambda i, k: (i, 0)),
            scratch_shapes=[pltpu.VMEM((tm, D), jnp.float32)],
            compiler_params=pltpu.CompilerParams(
                dimension_semantics=("parallel", "arbitrary"),
                vmem_limit_bytes=_vmem_limit(block_bytes),
            ),
        )(x, w, b2, res, g2, bt2)

    return out[:M] if Mp != M else out


# ----------------------------------------------------------------------------
# Multi-head attention core.  Grid = (batch, head-group); heads within a group
# are a static in-kernel loop; per-head results are stored directly (no concat).
# ----------------------------------------------------------------------------
def _attention_kernel(q_ref, k_ref, v_ref, o_ref, *, n_heads, head_dim, scale):
    q = q_ref[...] * scale               # one lane-dense bf16 multiply per block
    k = k_ref[...]
    v = v_ref[...]
    for h in range(n_heads):
        lo, hi = h * head_dim, (h + 1) * head_dim
        # q @ k^T without an explicit transpose (contract last dims)
        s = jax.lax.dot_general(
            q[:, lo:hi], k[:, lo:hi], (((1,), (1,)), ((), ())),
            preferred_element_type=jnp.float32)             # (S, Sk) f32
        m = jnp.max(s, axis=-1, keepdims=True)
        p = jnp.exp(s - m)
        p = p * pl.reciprocal(jnp.sum(p, axis=-1, keepdims=True), approx=True)
        o = jnp.dot(p.astype(jnp.bfloat16), v[:, lo:hi],
                    preferred_element_type=jnp.float32)      # (S, hd)
        o_ref[:, lo:hi] = o.astype(o_ref.dtype)              # per-head store


def attention(q_src, k_src, v_src, q_col, k_col, v_col,
              n_batch, S, Sk, d_model, n_heads):
    """q_src/k_src/v_src are batch-major (n_batch*L, W) bf16 slabs; the (S, dg)
    block for batch n / head-group g is picked via block indices — this is how
    the fused QKV / KV projection outputs are consumed without any HBM split."""
    assert S % 8 == 0 and Sk % 8 == 0 and d_model % 128 == 0
    hd = d_model // n_heads
    # Head-group parallel axis: pick the smallest group count that (a) keeps
    # blocks lane-dense (>=128 wide) and (b) yields >=4 parallel blocks.
    feasible = [g for g in range(1, n_heads + 1)
                if n_heads % g == 0 and (d_model // g) % 128 == 0]
    target = max(1, -(-4 // n_batch))
    cands = [g for g in feasible if g >= target]
    n_groups = min(cands) if cands else max(feasible)
    dg = d_model // n_groups
    heads_per_group = n_heads // n_groups
    scale = 1.0 / math.sqrt(hd)

    block_bytes = (2 * (S + 2 * Sk) * dg) * 2 + S * dg * 2 + S * Sk * 4
    return pl.pallas_call(
        functools.partial(_attention_kernel, n_heads=heads_per_group,
                          head_dim=hd, scale=scale),
        out_shape=jax.ShapeDtypeStruct((n_batch * S, d_model), jnp.bfloat16),
        grid=(n_batch, n_groups),
        in_specs=[
            pl.BlockSpec((S, dg), lambda n, g, c=q_col, ng=n_groups: (n, c * ng + g)),
            pl.BlockSpec((Sk, dg), lambda n, g, c=k_col, ng=n_groups: (n, c * ng + g)),
            pl.BlockSpec((Sk, dg), lambda n, g, c=v_col, ng=n_groups: (n, c * ng + g)),
        ],
        out_specs=pl.BlockSpec((S, dg), lambda n, g: (n, g)),
        compiler_params=pltpu.CompilerParams(
            dimension_semantics=("parallel", "parallel"),
            vmem_limit_bytes=_vmem_limit(block_bytes),
        ),
    )(q_src, k_src, v_src)


# ----------------------------------------------------------------------------
# Model glue (plain JAX only for embedding gather / final slice+transpose)
# ----------------------------------------------------------------------------
def self_attention_block(x, p, n_batch, S, d_model, n_heads):
    qkv = linear(x, p["w_qkv"], p["b_qkv"])                       # (N*S, 3D) bf16
    return attention(qkv, qkv, qkv, 0, 1, 2, n_batch, S, S, d_model, n_heads)


def cross_attention_block(x, memory, p, n_batch, S, Sk, d_model, n_heads):
    q = linear(x, p["wq"], p["bq"])                               # (N*S, D)
    kv = linear(memory, p["w_kv"], p["b_kv"])                     # (N*Sk, 2D)
    return attention(q, kv, kv, 0, 0, 1, n_batch, S, Sk, d_model, n_heads)


def decoder_layer(x, memory, p, n_batch, S, d_model, n_heads):
    """Post-norm nn.TransformerDecoderLayer (dropout == identity; the reference
    forward passes no tgt_mask, so self-attention is unmasked)."""
    sa = self_attention_block(x, p["self_attn"], n_batch, S, d_model, n_heads)
    x = linear_residual_layernorm(sa, p["self_attn"]["wo"], p["self_attn"]["bo"],
                                  x, p["ln1_g"], p["ln1_b"])
    ca = cross_attention_block(x, memory, p["cross_attn"],
                               n_batch, S, S, d_model, n_heads)
    x = linear_residual_layernorm(ca, p["cross_attn"]["wo"], p["cross_attn"]["bo"],
                                  x, p["ln2_g"], p["ln2_b"])
    h = linear(x, p["w1"], p["b1"], relu=True)                    # (N*S, ff)
    x = linear_residual_layernorm(h, p["w2"], p["b2"],
                                  x, p["ln3_g"], p["ln3_b"])
    return x


def language_model_forward(tokens, params, n_heads):
    """tokens: (S, N) int32 -> logits (S, N, vocab) f32."""
    S, N = tokens.shape
    vocab, d_model = params["embedding"].shape

    # gather directly into batch-major layout (N, S, D) -> flatten (N*S, D)
    emb = jnp.take(params["embedding"], tokens.T, axis=0)         # bf16
    x = emb.reshape(N * S, d_model)
    memory = x                     # transformer(x, x): memory = embedded input

    for lp in params["layers"]:
        x = decoder_layer(x, memory, lp, N, S, d_model, n_heads)

    # w_out/b_out are pre-padded to a 128-multiple at init (no per-call pad)
    logits = linear(x, params["w_out"], params["b_out"],
                    out_dtype=jnp.float32)                        # (N*S, Vp)
    logits = logits[:, :vocab]
    return logits.reshape(N, S, vocab).transpose(1, 0, 2)         # (S, N, V)


# ----------------------------------------------------------------------------
# Deterministic parameter construction (matmul weights + embedding in bf16,
# biases / LN params f32, output head pre-padded to a lane multiple).
# ----------------------------------------------------------------------------
def init_params(key, vocab_size, d_model, n_layers, dim_ff):
    scale = 0.02
    keys = iter(jax.random.split(key, 14 * n_layers + 8))

    def nrm(shape, dtype=jnp.float32):
        v = scale * jax.random.normal(next(keys), shape, dtype=jnp.float32)
        return v.astype(dtype)

    def layer_params():
        return {
            "self_attn": {
                "w_qkv": nrm((d_model, 3 * d_model), jnp.bfloat16),
                "b_qkv": nrm((3 * d_model,)),
                "wo": nrm((d_model, d_model), jnp.bfloat16),
                "bo": nrm((d_model,)),
            },
            "cross_attn": {
                "wq": nrm((d_model, d_model), jnp.bfloat16),
                "bq": nrm((d_model,)),
                "w_kv": nrm((d_model, 2 * d_model), jnp.bfloat16),
                "b_kv": nrm((2 * d_model,)),
                "wo": nrm((d_model, d_model), jnp.bfloat16),
                "bo": nrm((d_model,)),
            },
            "w1": nrm((d_model, dim_ff), jnp.bfloat16),
            "b1": nrm((dim_ff,)),
            "w2": nrm((dim_ff, d_model), jnp.bfloat16),
            "b2": nrm((d_model,)),
            "ln1_g": jnp.ones((d_model,), jnp.float32),
            "ln1_b": jnp.zeros((d_model,), jnp.float32),
            "ln2_g": jnp.ones((d_model,), jnp.float32),
            "ln2_b": jnp.zeros((d_model,), jnp.float32),
            "ln3_g": jnp.ones((d_model,), jnp.float32),
            "ln3_b": jnp.zeros((d_model,), jnp.float32),
        }

    layers = [layer_params() for _ in range(n_layers)]

    # Pre-pad the vocab head once (e.g. 96 -> 128) so linear() never pads it.
    vp = _round_up(vocab_size, 128)
    w_out = jnp.pad(nrm((d_model, vocab_size)), ((0, 0), (0, vp - vocab_size)))
    b_out = jnp.pad(nrm((vocab_size,)), (0, vp - vocab_size))

    return {
        "embedding": nrm((vocab_size, d_model), jnp.bfloat16),
        "layers": layers,
        "w_out": w_out.astype(jnp.bfloat16),
        "b_out": b_out,
    }


# ----------------------------------------------------------------------------
if __name__ == "__main__":
    # Small shapes consistent with the module interface.
    VOCAB = 96
    D_MODEL = 128       # constructor default 512; shrunk (but lane-aligned) for demo
    N_LAYERS = 2
    N_HEADS = 4         # head_dim = 32
    DIM_FF = 1024       # hard-coded in the PyTorch __init__
    SEQ = 16
    BATCH = 2

    key = jax.random.PRNGKey(0)
    pkey, tkey = jax.random.split(key)
    params = init_params(pkey, VOCAB, D_MODEL, N_LAYERS, DIM_FF)
    tokens = jax.random.randint(tkey, (SEQ, BATCH), 0, VOCAB, dtype=jnp.int32)

    fwd = jax.jit(functools.partial(language_model_forward, n_heads=N_HEADS))
    logits = jax.block_until_ready(fwd(tokens, params))

    assert logits.shape == (SEQ, BATCH, VOCAB), logits.shape
    assert logits.dtype == jnp.float32
    assert bool(jnp.all(jnp.isfinite(logits)))
    print("KERNEL_OK")
</pallas_src>

<mosaic_0001>
module attributes {stable_mosaic.version = 11 : i64} {
  func.func @_linear_ln_kernel_single(%arg0: i32, %arg1: memref<16x128xbf16, #tpu.memory_space<vmem>>, %arg2: memref<128x128xbf16, #tpu.memory_space<vmem>>, %arg3: memref<1x128xf32, #tpu.memory_space<vmem>>, %arg4: memref<16x128xbf16, #tpu.memory_space<vmem>>, %arg5: memref<1x128xf32, #tpu.memory_space<vmem>>, %arg6: memref<1x128xf32, #tpu.memory_space<vmem>>, %arg7: memref<16x128xbf16, #tpu.memory_space<vmem>>) attributes {dimension_semantics = [#tpu.dimension_semantics<parallel>], iteration_bounds = array<i64: 2>, scalar_prefetch = 0 : i64, scratch_operands = 0 : i64, tpu.core_type = #tpu.core_type<tc>, window_params = [{transform_indices = @transform_0, window_bounds = array<i64: 16, 128>}, {pipeline_mode = #tpu.pipeline_mode<synchronous>, transform_indices = @transform_1, window_bounds = array<i64: 128, 128>}, {pipeline_mode = #tpu.pipeline_mode<synchronous>, transform_indices = @transform_2, window_bounds = array<i64: 1, 128>}, {transform_indices = @transform_3, window_bounds = array<i64: 16, 128>}, {pipeline_mode = #tpu.pipeline_mode<synchronous>, transform_indices = @transform_4, window_bounds = array<i64: 1, 128>}, {pipeline_mode = #tpu.pipeline_mode<synchronous>, transform_indices = @transform_5, window_bounds = array<i64: 1, 128>}, {transform_indices = @transform_6, window_bounds = array<i64: 16, 128>}]} {
    %c0 = arith.constant 0 : index
    %c0_0 = arith.constant 0 : index
    %0 = vector.load %arg1[%c0, %c0_0] : memref<16x128xbf16, #tpu.memory_space<vmem>>, vector<16x128xbf16>
    %c0_1 = arith.constant 0 : index
    %c0_2 = arith.constant 0 : index
    %1 = vector.load %arg2[%c0_1, %c0_2] : memref<128x128xbf16, #tpu.memory_space<vmem>>, vector<128x128xbf16>
    %cst = arith.constant dense<0.000000e+00> : vector<16x128xf32>
    %2 = tpu.matmul %0, %1, %cst {dimension_numbers = #tpu.dot_dimension_numbers<[1], [0], [0], [1], [0, 0, 1, 1], [], []>} : vector<16x128xbf16>, vector<128x128xbf16>, vector<16x128xf32> -> vector<16x128xf32>
    %c0_3 = arith.constant 0 : index
    %c0_4 = arith.constant 0 : index
    %3 = vector.load %arg3[%c0_3, %c0_4] : memref<1x128xf32, #tpu.memory_space<vmem>>, vector<1x128xf32>
    %4 = vector.broadcast %3 : vector<1x128xf32> to vector<16x128xf32>
    %5 = arith.addf %2, %4 : vector<16x128xf32>
    %c0_5 = arith.constant 0 : index
    %c0_6 = arith.constant 0 : index
    %6 = vector.load %arg4[%c0_5, %c0_6] : memref<16x128xbf16, #tpu.memory_space<vmem>>, vector<16x128xbf16>
    %7 = arith.extf %6 : vector<16x128xbf16> to vector<16x128xf32>
    %8 = arith.addf %5, %7 : vector<16x128xf32>
    %c0_7 = arith.constant 0 : index
    %c0_8 = arith.constant 0 : index
    %9 = vector.load %arg5[%c0_7, %c0_8] : memref<1x128xf32, #tpu.memory_space<vmem>>, vector<1x128xf32>
    %c0_9 = arith.constant 0 : index
    %c0_10 = arith.constant 0 : index
    %10 = vector.load %arg6[%c0_9, %c0_10] : memref<1x128xf32, #tpu.memory_space<vmem>>, vector<1x128xf32>
    %cst_11 = arith.constant dense<0.000000e+00> : vector<16xf32>
    %11 = vector.multi_reduction <add>, %8, %cst_11 [1] : vector<16x128xf32> to vector<16xf32>
    %12 = vector.shape_cast %11 : vector<16xf32> to vector<16x1xf32>
    %cst_12 = arith.constant 1.280000e+02 : f32
    %13 = vector.broadcast %cst_12 : f32 to vector<16x1xf32>
    %14 = arith.divf %12, %13 : vector<16x1xf32>
    %15 = vector.broadcast %14 : vector<16x1xf32> to vector<16x128xf32>
    %16 = arith.subf %8, %15 : vector<16x128xf32>
    %17 = arith.mulf %16, %16 : vector<16x128xf32>
    %cst_13 = arith.constant dense<0.000000e+00> : vector<16xf32>
    %18 = vector.multi_reduction <add>, %17, %cst_13 [1] : vector<16x128xf32> to vector<16xf32>
    %19 = vector.shape_cast %18 : vector<16xf32> to vector<16x1xf32>
    %cst_14 = arith.constant 1.280000e+02 : f32
    %20 = vector.broadcast %cst_14 : f32 to vector<16x1xf32>
    %21 = arith.divf %19, %20 : vector<16x1xf32>
    %cst_15 = arith.constant 9.99999974E-6 : f32
    %22 = vector.broadcast %cst_15 : f32 to vector<16x1xf32>
    %23 = arith.addf %21, %22 : vector<16x1xf32>
    %24 = math.rsqrt %23 : vector<16x1xf32>
    %25 = vector.broadcast %14 : vector<16x1xf32> to vector<16x128xf32>
    %26 = arith.subf %8, %25 : vector<16x128xf32>
    %27 = vector.broadcast %24 : vector<16x1xf32> to vector<16x128xf32>
    %28 = arith.mulf %26, %27 : vector<16x128xf32>
    %29 = vector.broadcast %9 : vector<1x128xf32> to vector<16x128xf32>
    %30 = arith.mulf %28, %29 : vector<16x128xf32>
    %31 = vector.broadcast %10 : vector<1x128xf32> to vector<16x128xf32>
    %32 = arith.addf %30, %31 : vector<16x128xf32>
    %33 = arith.truncf %32 : vector<16x128xf32> to vector<16x128xbf16>
    %c0_16 = arith.constant 0 : index
    %c0_17 = arith.constant 0 : index
    %34 = vector.load %arg7[%c0_16, %c0_17] : memref<16x128xbf16, #tpu.memory_space<vmem>>, vector<16x128xbf16>
    tpu.vector_store %arg7[%c0_16, %c0_17], %33 {strides = array<i32>} : memref<16x128xbf16, #tpu.memory_space<vmem>>, vector<16x128xbf16>,
    return
  }
  func.func @transform_0(%arg0: i32) -> (i32, i32) {
    %c0_i32 = arith.constant 0 : i32
    %c0_i32_0 = arith.constant 0 : i32
    return %arg0, %c0_i32 : i32, i32
  }
  func.func @transform_1(%arg0: i32) -> (i32, i32) {
    %c0_i32 = arith.constant 0 : i32
    %c0_i32_0 = arith.constant 0 : i32
    %c0_i32_1 = arith.constant 0 : i32
    return %c0_i32, %c0_i32_0 : i32, i32
  }
  func.func @transform_2(%arg0: i32) -> (i32, i32) {
    %c0_i32 = arith.constant 0 : i32
    %c0_i32_0 = arith.constant 0 : i32
    %c0_i32_1 = arith.constant 0 : i32
    return %c0_i32, %c0_i32_0 : i32, i32
  }
  func.func @transform_3(%arg0: i32) -> (i32, i32) {
    %c0_i32 = arith.constant 0 : i32
    %c0_i32_0 = arith.constant 0 : i32
    return %arg0, %c0_i32 : i32, i32
  }
  func.func @transform_4(%arg0: i32) -> (i32, i32) {
    %c0_i32 = arith.constant 0 : i32
    %c0_i32_0 = arith.constant 0 : i32
    %c0_i32_1 = arith.constant 0 : i32
    return %c0_i32, %c0_i32_0 : i32, i32
  }
  func.func @transform_5(%arg0: i32) -> (i32, i32) {
    %c0_i32 = arith.constant 0 : i32
    %c0_i32_0 = arith.constant 0 : i32
    %c0_i32_1 = arith.constant 0 : i32
    return %c0_i32, %c0_i32_0 : i32, i32
  }
  func.func @transform_6(%arg0: i32) -> (i32, i32) {
    %c0_i32 = arith.constant 0 : i32
    %c0_i32_0 = arith.constant 0 : i32
    return %arg0, %c0_i32 : i32, i32
  }
}

module attributes {stable_mosaic.version = 11 : i64} {
  func.func @_matmul_kernel_single(%arg0: i32, %arg1: i32, %arg2: memref<32x128xbf16, #tpu.memory_space<vmem>>, %arg3: memref<128x128xbf16, #tpu.memory_space<vmem>>, %arg4: memref<1x128xf32, #tpu.memory_space<vmem>>, %arg5: memref<32x128xbf16, #tpu.memory_space<vmem>>) attributes {dimension_semantics = [#tpu.dimension_semantics<parallel>, #tpu.dimension_semantics<parallel>], iteration_bounds = array<i64: 1, 1>, scalar_prefetch = 0 : i64, scratch_operands = 0 : i64, tpu.core_type = #tpu.core_type<tc>, window_params = [{transform_indices = @transform_0, window_bounds = array<i64: 32, 128>}, {transform_indices = @transform_1, window_bounds = array<i64: 128, 128>}, {transform_indices = @transform_2, window_bounds = array<i64: 1, 128>}, {transform_indices = @transform_3, window_bounds = array<i64: 32, 128>}]} {
    %c0 = arith.constant 0 : index
    %c0_0 = arith.constant 0 : index
    %0 = vector.load %arg2[%c0, %c0_0] : memref<32x128xbf16, #tpu.memory_space<vmem>>, vector<32x128xbf16>
    %c0_1 = arith.constant 0 : index
    %c0_2 = arith.constant 0 : index
    %1 = vector.load %arg3[%c0_1, %c0_2] : memref<128x128xbf16, #tpu.memory_space<vmem>>, vector<128x128xbf16>
    %cst = arith.constant dense<0.000000e+00> : vector<32x128xf32>
    %2 = tpu.matmul %0, %1, %cst {dimension_numbers = #tpu.dot_dimension_numbers<[1], [0], [0], [1], [0, 0, 1, 1], [], []>} : vector<32x128xbf16>, vector<128x128xbf16>, vector<32x128xf32> -> vector<32x128xf32>
    %c0_3 = arith.constant 0 : index
    %c0_4 = arith.constant 0 : index
    %3 = vector.load %arg4[%c0_3, %c0_4] : memref<1x128xf32, #tpu.memory_space<vmem>>, vector<1x128xf32>
    %4 = vector.broadcast %3 : vector<1x128xf32> to vector<32x128xf32>
    %5 = arith.addf %2, %4 : vector<32x128xf32>
    %6 = arith.truncf %5 : vector<32x128xf32> to vector<32x128xbf16>
    %c0_5 = arith.constant 0 : index
    %c0_6 = arith.constant 0 : index
    %7 = vector.load %arg5[%c0_5, %c0_6] : memref<32x128xbf16, #tpu.memory_space<vmem>>, vector<32x128xbf16>
    tpu.vector_store %arg5[%c0_5, %c0_6], %6 {strides = array<i32>} : memref<32x128xbf16, #tpu.memory_space<vmem>>, vector<32x128xbf16>,
    return
  }
  func.func @transform_0(%arg0: i32, %arg1: i32) -> (i32, i32) {
    %c0_i32 = arith.constant 0 : i32
    %c0_i32_0 = arith.constant 0 : i32
    return %arg0, %c0_i32 : i32, i32
  }
  func.func @transform_1(%arg0: i32, %arg1: i32) -> (i32, i32) {
    %c0_i32 = arith.constant 0 : i32
    %c0_i32_0 = arith.constant 0 : i32
    return %c0_i32, %arg1 : i32, i32
  }
  func.func @transform_2(%arg0: i32, %arg1: i32) -> (i32, i32) {
    %c0_i32 = arith.constant 0 : i32
    %c0_i32_0 = arith.constant 0 : i32
    return %c0_i32, %arg1 : i32, i32
  }
  func.func @transform_3(%arg0: i32, %arg1: i32) -> (i32, i32) {
    %c0_i32 = arith.constant 0 : i32
    return %arg0, %arg1 : i32, i32
  }
}

module attributes {stable_mosaic.version = 11 : i64} {
  func.func @_attention_kernel(%arg0: i32, %arg1: i32, %arg2: memref<16x128xbf16, #tpu.memory_space<vmem>>, %arg3: memref<16x128xbf16, #tpu.memory_space<vmem>>, %arg4: memref<16x128xbf16, #tpu.memory_space<vmem>>, %arg5: memref<16x128xbf16, #tpu.memory_space<vmem>>) attributes {dimension_semantics = [#tpu.dimension_semantics<parallel>, #tpu.dimension_semantics<parallel>], iteration_bounds = array<i64: 2, 1>, scalar_prefetch = 0 : i64, scratch_operands = 0 : i64, tpu.core_type = #tpu.core_type<tc>, window_params = [{transform_indices = @transform_0, window_bounds = array<i64: 16, 128>}, {transform_indices = @transform_1, window_bounds = array<i64: 16, 128>}, {transform_indices = @transform_2, window_bounds = array<i64: 16, 128>}, {transform_indices = @transform_3, window_bounds = array<i64: 16, 128>}]} {
    %c0 = arith.constant 0 : index
    %c0_0 = arith.constant 0 : index
    %0 = vector.load %arg2[%c0, %c0_0] : memref<16x128xbf16, #tpu.memory_space<vmem>>, vector<16x128xbf16>
    %cst = arith.constant 1.767580e-01 : bf16
    %1 = vector.broadcast %cst : bf16 to vector<16x128xbf16>
    %2 = arith.mulf %0, %1 : vector<16x128xbf16>
    %c0_1 = arith.constant 0 : index
    %c0_2 = arith.constant 0 : index
    %3 = vector.load %arg3[%c0_1, %c0_2] : memref<16x128xbf16, #tpu.memory_space<vmem>>, vector<16x128xbf16>
    %c0_3 = arith.constant 0 : index
    %c0_4 = arith.constant 0 : index
    %4 = vector.load %arg4[%c0_3, %c0_4] : memref<16x128xbf16, #tpu.memory_space<vmem>>, vector<16x128xbf16>
    %5 = vector.extract_strided_slice %2 {offsets = [0, 0], sizes = [16, 32], strides = [1, 1]} : vector<16x128xbf16> to vector<16x32xbf16>
    %6 = vector.extract_strided_slice %3 {offsets = [0, 0], sizes = [16, 32], strides = [1, 1]} : vector<16x128xbf16> to vector<16x32xbf16>
    %cst_5 = arith.constant dense<0.000000e+00> : vector<16x16xf32>
    %7 = tpu.matmul %5, %6, %cst_5 {dimension_numbers = #tpu.dot_dimension_numbers<[1], [1], [0], [0], [0, 0, 1, 0], [], []>} : vector<16x32xbf16>, vector<16x32xbf16>, vector<16x16xf32> -> vector<16x16xf32>
    %cst_6 = arith.constant dense<0xFF800000> : vector<16xf32>
    %8 = vector.multi_reduction <maximumf>, %7, %cst_6 [1] : vector<16x16xf32> to vector<16xf32>
    %9 = vector.shape_cast %8 : vector<16xf32> to vector<16x1xf32>
    %10 = vector.broadcast %9 : vector<16x1xf32> to vector<16x16xf32>
    %11 = arith.subf %7, %10 : vector<16x16xf32>
    %12 = math.exp %11 : vector<16x16xf32>
    %cst_7 = arith.constant dense<0.000000e+00> : vector<16xf32>
    %13 = vector.multi_reduction <add>, %12, %cst_7 [1] : vector<16x16xf32> to vector<16xf32>
    %14 = vector.shape_cast %13 : vector<16xf32> to vector<16x1xf32>
    %15 = tpu.reciprocal %14 {approx = true} : vector<16x1xf32> -> vector<16x1xf32>
    %16 = vector.broadcast %15 : vector<16x1xf32> to vector<16x16xf32>
    %17 = arith.mulf %12, %16 : vector<16x16xf32>
    %18 = arith.truncf %17 : vector<16x16xf32> to vector<16x16xbf16>
    %19 = vector.extract_strided_slice %4 {offsets = [0, 0], sizes = [16, 32], strides = [1, 1]} : vector<16x128xbf16> to vector<16x32xbf16>
    %cst_8 = arith.constant dense<0.000000e+00> : vector<16x32xf32>
    %20 = tpu.matmul %18, %19, %cst_8 {dimension_numbers = #tpu.dot_dimension_numbers<[1], [0], [0], [1], [0, 0, 1, 1], [], []>} : vector<16x16xbf16>, vector<16x32xbf16>, vector<16x32xf32> -> vector<16x32xf32>
    %21 = arith.truncf %20 : vector<16x32xf32> to vector<16x32xbf16>
    %c0_9 = arith.constant 0 : index
    %c0_10 = arith.constant 0 : index
    %22 = vector.load %arg5[%c0_9, %c0_10] : memref<16x128xbf16, #tpu.memory_space<vmem>>, vector<16x32xbf16>
    tpu.vector_store %arg5[%c0_9, %c0_10], %21 {strides = array<i32>} : memref<16x128xbf16, #tpu.memory_space<vmem>>, vector<16x32xbf16>,
    %23 = vector.extract_strided_slice %2 {offsets = [0, 32], sizes = [16, 32], strides = [1, 1]} : vector<16x128xbf16> to vector<16x32xbf16>
    %24 = vector.extract_strided_slice %3 {offsets = [0, 32], sizes = [16, 32], strides = [1, 1]} : vector<16x128xbf16> to vector<16x32xbf16>
    %cst_11 = arith.constant dense<0.000000e+00> : vector<16x16xf32>
    %25 = tpu.matmul %23, %24, %cst_11 {dimension_numbers = #tpu.dot_dimension_numbers<[1], [1], [0], [0], [0, 0, 1, 0], [], []>} : vector<16x32xbf16>, vector<16x32xbf16>, vector<16x16xf32> -> vector<16x16xf32>
    %cst_12 = arith.constant dense<0xFF800000> : vector<16xf32>
    %26 = vector.multi_reduction <maximumf>, %25, %cst_12 [1] : vector<16x16xf32> to vector<16xf32>
    %27 = vector.shape_cast %26 : vector<16xf32> to vector<16x1xf32>
    %28 = vector.broadcast %27 : vector<16x1xf32> to vector<16x16xf32>
    %29 = arith.subf %25, %28 : vector<16x16xf32>
    %30 = math.exp %29 : vector<16x16xf32>
    %cst_13 = arith.constant dense<0.000000e+00> : vector<16xf32>
    %31 = vector.multi_reduction <add>, %30, %cst_13 [1] : vector<16x16xf32> to vector<16xf32>
    %32 = vector.shape_cast %31 : vector<16xf32> to vector<16x1xf32>
    %33 = tpu.reciprocal %32 {approx = true} : vector<16x1xf32> -> vector<16x1xf32>
    %34 = vector.broadcast %33 : vector<16x1xf32> to vector<16x16xf32>
    %35 = arith.mulf %30, %34 : vector<16x16xf32>
    %36 = arith.truncf %35 : vector<16x16xf32> to vector<16x16xbf16>
    %37 = vector.extract_strided_slice %4 {offsets = [0, 32], sizes = [16, 32], strides = [1, 1]} : vector<16x128xbf16> to vector<16x32xbf16>
    %cst_14 = arith.constant dense<0.000000e+00> : vector<16x32xf32>
    %38 = tpu.matmul %36, %37, %cst_14 {dimension_numbers = #tpu.dot_dimension_numbers<[1], [0], [0], [1], [0, 0, 1, 1], [], []>} : vector<16x16xbf16>, vector<16x32xbf16>, vector<16x32xf32> -> vector<16x32xf32>
    %39 = arith.truncf %38 : vector<16x32xf32> to vector<16x32xbf16>
    %c0_15 = arith.constant 0 : index
    %c32 = arith.constant 32 : index
    %40 = vector.load %arg5[%c0_15, %c32] : memref<16x128xbf16, #tpu.memory_space<vmem>>, vector<16x32xbf16>
    tpu.vector_store %arg5[%c0_15, %c32], %39 {strides = array<i32>} : memref<16x128xbf16, #tpu.memory_space<vmem>>, vector<16x32xbf16>,
    %41 = vector.extract_strided_slice %2 {offsets = [0, 64], sizes = [16, 32], strides = [1, 1]} : vector<16x128xbf16> to vector<16x32xbf16>
    %42 = vector.extract_strided_slice %3 {offsets = [0, 64], sizes = [16, 32], strides = [1, 1]} : vector<16x128xbf16> to vector<16x32xbf16>
    %cst_16 = arith.constant dense<0.000000e+00> : vector<16x16xf32>
    %43 = tpu.matmul %41, %42, %cst_16 {dimension_numbers = #tpu.dot_dimension_numbers<[1], [1], [0], [0], [0, 0, 1, 0], [], []>} : vector<16x32xbf16>, vector<16x32xbf16>, vector<16x16xf32> -> vector<16x16xf32>
    %cst_17 = arith.constant dense<0xFF800000> : vector<16xf32>
    %44 = vector.multi_reduction <maximumf>, %43, %cst_17 [1] : vector<16x16xf32> to vector<16xf32>
    %45 = vector.shape_cast %44 : vector<16xf32> to vector<16x1xf32>
    %46 = vector.broadcast %45 : vector<16x1xf32> to vector<16x16xf32>
    %47 = arith.subf %43, %46 : vector<16x16xf32>
    %48 = math.exp %47 : vector<16x16xf32>
    %cst_18 = arith.constant dense<0.000000e+00> : vector<16xf32>
    %49 = vector.multi_reduction <add>, %48, %cst_18 [1] : vector<16x16xf32> to vector<16xf32>
    %50 = vector.shape_cast %49 : vector<16xf32> to vector<16x1xf32>
    %51 = tpu.reciprocal %50 {approx = true} : vector<16x1xf32> -> vector<16x1xf32>
    %52 = vector.broadcast %51 : vector<16x1xf32> to vector<16x16xf32>
    %53 = arith.mulf %48, %52 : vector<16x16xf32>
    %54 = arith.truncf %53 : vector<16x16xf32> to vector<16x16xbf16>
    %55 = vector.extract_strided_slice %4 {offsets = [0, 64], sizes = [16, 32], strides = [1, 1]} : vector<16x128xbf16> to vector<16x32xbf16>
    %cst_19 = arith.constant dense<0.000000e+00> : vector<16x32xf32>
    %56 = tpu.matmul %54, %55, %cst_19 {dimension_numbers = #tpu.dot_dimension_numbers<[1], [0], [0], [1], [0, 0, 1, 1], [], []>} : vector<16x16xbf16>, vector<16x32xbf16>, vector<16x32xf32> -> vector<16x32xf32>
    %57 = arith.truncf %56 : vector<16x32xf32> to vector<16x32xbf16>
    %c0_20 = arith.constant 0 : index
    %c64 = arith.constant 64 : index
    %58 = vector.load %arg5[%c0_20, %c64] : memref<16x128xbf16, #tpu.memory_space<vmem>>, vector<16x32xbf16>
    tpu.vector_store %arg5[%c0_20, %c64], %57 {strides = array<i32>} : memref<16x128xbf16, #tpu.memory_space<vmem>>, vector<16x32xbf16>,
    %59 = vector.extract_strided_slice %2 {offsets = [0, 96], sizes = [16, 32], strides = [1, 1]} : vector<16x128xbf16> to vector<16x32xbf16>
    %60 = vector.extract_strided_slice %3 {offsets = [0, 96], sizes = [16, 32], strides = [1, 1]} : vector<16x128xbf16> to vector<16x32xbf16>
    %cst_21 = arith.constant dense<0.000000e+00> : vector<16x16xf32>
    %61 = tpu.matmul %59, %60, %cst_21 {dimension_numbers = #tpu.dot_dimension_numbers<[1], [1], [0], [0], [0, 0, 1, 0], [], []>} : vector<16x32xbf16>, vector<16x32xbf16>, vector<16x16xf32> -> vector<16x16xf32>
    %cst_22 = arith.constant dense<0xFF800000> : vector<16xf32>
    %62 = vector.multi_reduction <maximumf>, %61, %cst_22 [1] : vector<16x16xf32> to vector<16xf32>
    %63 = vector.shape_cast %62 : vector<16xf32> to vector<16x1xf32>
    %64 = vector.broadcast %63 : vector<16x1xf32> to vector<16x16xf32>
    %65 = arith.subf %61, %64 : vector<16x16xf32>
    %66 = math.exp %65 : vector<16x16xf32>
    %cst_23 = arith.constant dense<0.000000e+00> : vector<16xf32>
    %67 = vector.multi_reduction <add>, %66, %cst_23 [1] : vector<16x16xf32> to vector<16xf32>
    %68 = vector.shape_cast %67 : vector<16xf32> to vector<16x1xf32>
    %69 = tpu.reciprocal %68 {approx = true} : vector<16x1xf32> -> vector<16x1xf32>
    %70 = vector.broadcast %69 : vector<16x1xf32> to vector<16x16xf32>
    %71 = arith.mulf %66, %70 : vector<16x16xf32>
    %72 = arith.truncf %71 : vector<16x16xf32> to vector<16x16xbf16>
    %73 = vector.extract_strided_slice %4 {offsets = [0, 96], sizes = [16, 32], strides = [1, 1]} : vector<16x128xbf16> to vector<16x32xbf16>
    %cst_24 = arith.constant dense<0.000000e+00> : vector<16x32xf32>
    %74 = tpu.matmul %72, %73, %cst_24 {dimension_numbers = #tpu.dot_dimension_numbers<[1], [0], [0], [1], [0, 0, 1, 1], [], []>} : vector<16x16xbf16>, vector<16x32xbf16>, vector<16x32xf32> -> vector<16x32xf32>
    %75 = arith.truncf %74 : vector<16x32xf32> to vector<16x32xbf16>
    %c0_25 = arith.constant 0 : index
    %c96 = arith.constant 96 : index
    %76 = vector.load %arg5[%c0_25, %c96] : memref<16x128xbf16, #tpu.memory_space<vmem>>, vector<16x32xbf16>
    tpu.vector_store %arg5[%c0_25, %c96], %75 {strides = array<i32>} : memref<16x128xbf16, #tpu.memory_space<vmem>>, vector<16x32xbf16>,
    return
  }
  func.func @transform_0(%arg0: i32, %arg1: i32) -> (i32, i32) {
    %c0_i32 = arith.constant 0 : i32
    %0 = arith.addi %c0_i32, %arg1 : i32
    %c0_i32_0 = arith.constant 0 : i32
    return %arg0, %0 : i32, i32
  }
  func.func @transform_1(%arg0: i32, %arg1: i32) -> (i32, i32) {
    %c1_i32 = arith.constant 1 : i32
    %0 = arith.addi %c1_i32, %arg1 : i32
    %c0_i32 = arith.constant 0 : i32
    return %arg0, %0 : i32, i32
  }
  func.func @transform_2(%arg0: i32, %arg1: i32) -> (i32, i32) {
    %c2_i32 = arith.constant 2 : i32
    %0 = arith.addi %c2_i32, %arg1 : i32
    %c0_i32 = arith.constant 0 : i32
    return %arg0, %0 : i32, i32
  }
  func.func @transform_3(%arg0: i32, %arg1: i32) -> (i32, i32) {
    %c0_i32 = arith.constant 0 : i32
    return %arg0, %arg1 : i32, i32
  }
}

module attributes {stable_mosaic.version = 11 : i64} {
  func.func @_matmul_kernel_single(%arg0: i32, %arg1: i32, %arg2: memref<32x128xbf16, #tpu.memory_space<vmem>>, %arg3: memref<128x128xbf16, #tpu.memory_space<vmem>>, %arg4: memref<1x128xf32, #tpu.memory_space<vmem>>, %arg5: memref<32x128xbf16, #tpu.memory_space<vmem>>) attributes {dimension_semantics = [#tpu.dimension_semantics<parallel>, #tpu.dimension_semantics<parallel>], iteration_bounds = array<i64: 1, 3>, scalar_prefetch = 0 : i64, scratch_operands = 0 : i64, tpu.core_type = #tpu.core_type<tc>, window_params = [{transform_indices = @transform_0, window_bounds = array<i64: 32, 128>}, {transform_indices = @transform_1, window_bounds = array<i64: 128, 128>}, {transform_indices = @transform_2, window_bounds = array<i64: 1, 128>}, {transform_indices = @transform_3, window_bounds = array<i64: 32, 128>}]} {
    %c0 = arith.constant 0 : index
    %c0_0 = arith.constant 0 : index
    %0 = vector.load %arg2[%c0, %c0_0] : memref<32x128xbf16, #tpu.memory_space<vmem>>, vector<32x128xbf16>
    %c0_1 = arith.constant 0 : index
    %c0_2 = arith.constant 0 : index
    %1 = vector.load %arg3[%c0_1, %c0_2] : memref<128x128xbf16, #tpu.memory_space<vmem>>, vector<128x128xbf16>
    %cst = arith.constant dense<0.000000e+00> : vector<32x128xf32>
    %2 = tpu.matmul %0, %1, %cst {dimension_numbers = #tpu.dot_dimension_numbers<[1], [0], [0], [1], [0, 0, 1, 1], [], []>} : vector<32x128xbf16>, vector<128x128xbf16>, vector<32x128xf32> -> vector<32x128xf32>
    %c0_3 = arith.constant 0 : index
    %c0_4 = arith.constant 0 : index
    %3 = vector.load %arg4[%c0_3, %c0_4] : memref<1x128xf32, #tpu.memory_space<vmem>>, vector<1x128xf32>
    %4 = vector.broadcast %3 : vector<1x128xf32> to vector<32x128xf32>
    %5 = arith.addf %2, %4 : vector<32x128xf32>
    %6 = arith.truncf %5 : vector<32x128xf32> to vector<32x128xbf16>
    %c0_5 = arith.constant 0 : index
    %c0_6 = arith.constant 0 : index
    %7 = vector.load %arg5[%c0_5, %c0_6] : memref<32x128xbf16, #tpu.memory_space<vmem>>, vector<32x128xbf16>
    tpu.vector_store %arg5[%c0_5, %c0_6], %6 {strides = array<i32>} : memref<32x128xbf16, #tpu.memory_space<vmem>>, vector<32x128xbf16>,
    return
  }
  func.func @transform_0(%arg0: i32, %arg1: i32) -> (i32, i32) {
    %c0_i32 = arith.constant 0 : i32
    %c0_i32_0 = arith.constant 0 : i32
    return %arg0, %c0_i32 : i32, i32
  }
  func.func @transform_1(%arg0: i32, %arg1: i32) -> (i32, i32) {
    %c0_i32 = arith.constant 0 : i32
    %c0_i32_0 = arith.constant 0 : i32
    return %c0_i32, %arg1 : i32, i32
  }
  func.func @transform_2(%arg0: i32, %arg1: i32) -> (i32, i32) {
    %c0_i32 = arith.constant 0 : i32
    %c0_i32_0 = arith.constant 0 : i32
    return %c0_i32, %arg1 : i32, i32
  }
  func.func @transform_3(%arg0: i32, %arg1: i32) -> (i32, i32) {
    %c0_i32 = arith.constant 0 : i32
    return %arg0, %arg1 : i32, i32
  }
}

module attributes {stable_mosaic.version = 11 : i64} {
  func.func @_matmul_kernel_single(%arg0: i32, %arg1: i32, %arg2: memref<32x128xbf16, #tpu.memory_space<vmem>>, %arg3: memref<128x128xbf16, #tpu.memory_space<vmem>>, %arg4: memref<1x128xf32, #tpu.memory_space<vmem>>, %arg5: memref<32x128xbf16, #tpu.memory_space<vmem>>) attributes {dimension_semantics = [#tpu.dimension_semantics<parallel>, #tpu.dimension_semantics<parallel>], iteration_bounds = array<i64: 1, 2>, scalar_prefetch = 0 : i64, scratch_operands = 0 : i64, tpu.core_type = #tpu.core_type<tc>, window_params = [{transform_indices = @transform_0, window_bounds = array<i64: 32, 128>}, {transform_indices = @transform_1, window_bounds = array<i64: 128, 128>}, {transform_indices = @transform_2, window_bounds = array<i64: 1, 128>}, {transform_indices = @transform_3, window_bounds = array<i64: 32, 128>}]} {
    %c0 = arith.constant 0 : index
    %c0_0 = arith.constant 0 : index
    %0 = vector.load %arg2[%c0, %c0_0] : memref<32x128xbf16, #tpu.memory_space<vmem>>, vector<32x128xbf16>
    %c0_1 = arith.constant 0 : index
    %c0_2 = arith.constant 0 : index
    %1 = vector.load %arg3[%c0_1, %c0_2] : memref<128x128xbf16, #tpu.memory_space<vmem>>, vector<128x128xbf16>
    %cst = arith.constant dense<0.000000e+00> : vector<32x128xf32>
    %2 = tpu.matmul %0, %1, %cst {dimension_numbers = #tpu.dot_dimension_numbers<[1], [0], [0], [1], [0, 0, 1, 1], [], []>} : vector<32x128xbf16>, vector<128x128xbf16>, vector<32x128xf32> -> vector<32x128xf32>
    %c0_3 = arith.constant 0 : index
    %c0_4 = arith.constant 0 : index
    %3 = vector.load %arg4[%c0_3, %c0_4] : memref<1x128xf32, #tpu.memory_space<vmem>>, vector<1x128xf32>
    %4 = vector.broadcast %3 : vector<1x128xf32> to vector<32x128xf32>
    %5 = arith.addf %2, %4 : vector<32x128xf32>
    %6 = arith.truncf %5 : vector<32x128xf32> to vector<32x128xbf16>
    %c0_5 = arith.constant 0 : index
    %c0_6 = arith.constant 0 : index
    %7 = vector.load %arg5[%c0_5, %c0_6] : memref<32x128xbf16, #tpu.memory_space<vmem>>, vector<32x128xbf16>
    tpu.vector_store %arg5[%c0_5, %c0_6], %6 {strides = array<i32>} : memref<32x128xbf16, #tpu.memory_space<vmem>>, vector<32x128xbf16>,
    return
  }
  func.func @transform_0(%arg0: i32, %arg1: i32) -> (i32, i32) {
    %c0_i32 = arith.constant 0 : i32
    %c0_i32_0 = arith.constant 0 : i32
    return %arg0, %c0_i32 : i32, i32
  }
  func.func @transform_1(%arg0: i32, %arg1: i32) -> (i32, i32) {
    %c0_i32 = arith.constant 0 : i32
    %c0_i32_0 = arith.constant 0 : i32
    return %c0_i32, %arg1 : i32, i32
  }
  func.func @transform_2(%arg0: i32, %arg1: i32) -> (i32, i32) {
    %c0_i32 = arith.constant 0 : i32
    %c0_i32_0 = arith.constant 0 : i32
    return %c0_i32, %arg1 : i32, i32
  }
  func.func @transform_3(%arg0: i32, %arg1: i32) -> (i32, i32) {
    %c0_i32 = arith.constant 0 : i32
    return %arg0, %arg1 : i32, i32
  }
}

module attributes {stable_mosaic.version = 11 : i64} {
  func.func @_attention_kernel(%arg0: i32, %arg1: i32, %arg2: memref<16x128xbf16, #tpu.memory_space<vmem>>, %arg3: memref<16x128xbf16, #tpu.memory_space<vmem>>, %arg4: memref<16x128xbf16, #tpu.memory_space<vmem>>, %arg5: memref<16x128xbf16, #tpu.memory_space<vmem>>) attributes {dimension_semantics = [#tpu.dimension_semantics<parallel>, #tpu.dimension_semantics<parallel>], iteration_bounds = array<i64: 2, 1>, scalar_prefetch = 0 : i64, scratch_operands = 0 : i64, tpu.core_type = #tpu.core_type<tc>, window_params = [{transform_indices = @transform_0, window_bounds = array<i64: 16, 128>}, {transform_indices = @transform_1, window_bounds = array<i64: 16, 128>}, {transform_indices = @transform_2, window_bounds = array<i64: 16, 128>}, {transform_indices = @transform_3, window_bounds = array<i64: 16, 128>}]} {
    %c0 = arith.constant 0 : index
    %c0_0 = arith.constant 0 : index
    %0 = vector.load %arg2[%c0, %c0_0] : memref<16x128xbf16, #tpu.memory_space<vmem>>, vector<16x128xbf16>
    %cst = arith.constant 1.767580e-01 : bf16
    %1 = vector.broadcast %cst : bf16 to vector<16x128xbf16>
    %2 = arith.mulf %0, %1 : vector<16x128xbf16>
    %c0_1 = arith.constant 0 : index
    %c0_2 = arith.constant 0 : index
    %3 = vector.load %arg3[%c0_1, %c0_2] : memref<16x128xbf16, #tpu.memory_space<vmem>>, vector<16x128xbf16>
    %c0_3 = arith.constant 0 : index
    %c0_4 = arith.constant 0 : index
    %4 = vector.load %arg4[%c0_3, %c0_4] : memref<16x128xbf16, #tpu.memory_space<vmem>>, vector<16x128xbf16>
    %5 = vector.extract_strided_slice %2 {offsets = [0, 0], sizes = [16, 32], strides = [1, 1]} : vector<16x128xbf16> to vector<16x32xbf16>
    %6 = vector.extract_strided_slice %3 {offsets = [0, 0], sizes = [16, 32], strides = [1, 1]} : vector<16x128xbf16> to vector<16x32xbf16>
    %cst_5 = arith.constant dense<0.000000e+00> : vector<16x16xf32>
    %7 = tpu.matmul %5, %6, %cst_5 {dimension_numbers = #tpu.dot_dimension_numbers<[1], [1], [0], [0], [0, 0, 1, 0], [], []>} : vector<16x32xbf16>, vector<16x32xbf16>, vector<16x16xf32> -> vector<16x16xf32>
    %cst_6 = arith.constant dense<0xFF800000> : vector<16xf32>
    %8 = vector.multi_reduction <maximumf>, %7, %cst_6 [1] : vector<16x16xf32> to vector<16xf32>
    %9 = vector.shape_cast %8 : vector<16xf32> to vector<16x1xf32>
    %10 = vector.broadcast %9 : vector<16x1xf32> to vector<16x16xf32>
    %11 = arith.subf %7, %10 : vector<16x16xf32>
    %12 = math.exp %11 : vector<16x16xf32>
    %cst_7 = arith.constant dense<0.000000e+00> : vector<16xf32>
    %13 = vector.multi_reduction <add>, %12, %cst_7 [1] : vector<16x16xf32> to vector<16xf32>
    %14 = vector.shape_cast %13 : vector<16xf32> to vector<16x1xf32>
    %15 = tpu.reciprocal %14 {approx = true} : vector<16x1xf32> -> vector<16x1xf32>
    %16 = vector.broadcast %15 : vector<16x1xf32> to vector<16x16xf32>
    %17 = arith.mulf %12, %16 : vector<16x16xf32>
    %18 = arith.truncf %17 : vector<16x16xf32> to vector<16x16xbf16>
    %19 = vector.extract_strided_slice %4 {offsets = [0, 0], sizes = [16, 32], strides = [1, 1]} : vector<16x128xbf16> to vector<16x32xbf16>
    %cst_8 = arith.constant dense<0.000000e+00> : vector<16x32xf32>
    %20 = tpu.matmul %18, %19, %cst_8 {dimension_numbers = #tpu.dot_dimension_numbers<[1], [0], [0], [1], [0, 0, 1, 1], [], []>} : vector<16x16xbf16>, vector<16x32xbf16>, vector<16x32xf32> -> vector<16x32xf32>
    %21 = arith.truncf %20 : vector<16x32xf32> to vector<16x32xbf16>
    %c0_9 = arith.constant 0 : index
    %c0_10 = arith.constant 0 : index
    %22 = vector.load %arg5[%c0_9, %c0_10] : memref<16x128xbf16, #tpu.memory_space<vmem>>, vector<16x32xbf16>
    tpu.vector_store %arg5[%c0_9, %c0_10], %21 {strides = array<i32>} : memref<16x128xbf16, #tpu.memory_space<vmem>>, vector<16x32xbf16>,
    %23 = vector.extract_strided_slice %2 {offsets = [0, 32], sizes = [16, 32], strides = [1, 1]} : vector<16x128xbf16> to vector<16x32xbf16>
    %24 = vector.extract_strided_slice %3 {offsets = [0, 32], sizes = [16, 32], strides = [1, 1]} : vector<16x128xbf16> to vector<16x32xbf16>
    %cst_11 = arith.constant dense<0.000000e+00> : vector<16x16xf32>
    %25 = tpu.matmul %23, %24, %cst_11 {dimension_numbers = #tpu.dot_dimension_numbers<[1], [1], [0], [0], [0, 0, 1, 0], [], []>} : vector<16x32xbf16>, vector<16x32xbf16>, vector<16x16xf32> -> vector<16x16xf32>
    %cst_12 = arith.constant dense<0xFF800000> : vector<16xf32>
    %26 = vector.multi_reduction <maximumf>, %25, %cst_12 [1] : vector<16x16xf32> to vector<16xf32>
    %27 = vector.shape_cast %26 : vector<16xf32> to vector<16x1xf32>
    %28 = vector.broadcast %27 : vector<16x1xf32> to vector<16x16xf32>
    %29 = arith.subf %25, %28 : vector<16x16xf32>
    %30 = math.exp %29 : vector<16x16xf32>
    %cst_13 = arith.constant dense<0.000000e+00> : vector<16xf32>
    %31 = vector.multi_reduction <add>, %30, %cst_13 [1] : vector<16x16xf32> to vector<16xf32>
    %32 = vector.shape_cast %31 : vector<16xf32> to vector<16x1xf32>
    %33 = tpu.reciprocal %32 {approx = true} : vector<16x1xf32> -> vector<16x1xf32>
    %34 = vector.broadcast %33 : vector<16x1xf32> to vector<16x16xf32>
    %35 = arith.mulf %30, %34 : vector<16x16xf32>
    %36 = arith.truncf %35 : vector<16x16xf32> to vector<16x16xbf16>
    %37 = vector.extract_strided_slice %4 {offsets = [0, 32], sizes = [16, 32], strides = [1, 1]} : vector<16x128xbf16> to vector<16x32xbf16>
    %cst_14 = arith.constant dense<0.000000e+00> : vector<16x32xf32>
    %38 = tpu.matmul %36, %37, %cst_14 {dimension_numbers = #tpu.dot_dimension_numbers<[1], [0], [0], [1], [0, 0, 1, 1], [], []>} : vector<16x16xbf16>, vector<16x32xbf16>, vector<16x32xf32> -> vector<16x32xf32>
    %39 = arith.truncf %38 : vector<16x32xf32> to vector<16x32xbf16>
    %c0_15 = arith.constant 0 : index
    %c32 = arith.constant 32 : index
    %40 = vector.load %arg5[%c0_15, %c32] : memref<16x128xbf16, #tpu.memory_space<vmem>>, vector<16x32xbf16>
    tpu.vector_store %arg5[%c0_15, %c32], %39 {strides = array<i32>} : memref<16x128xbf16, #tpu.memory_space<vmem>>, vector<16x32xbf16>,
    %41 = vector.extract_strided_slice %2 {offsets = [0, 64], sizes = [16, 32], strides = [1, 1]} : vector<16x128xbf16> to vector<16x32xbf16>
    %42 = vector.extract_strided_slice %3 {offsets = [0, 64], sizes = [16, 32], strides = [1, 1]} : vector<16x128xbf16> to vector<16x32xbf16>
    %cst_16 = arith.constant dense<0.000000e+00> : vector<16x16xf32>
    %43 = tpu.matmul %41, %42, %cst_16 {dimension_numbers = #tpu.dot_dimension_numbers<[1], [1], [0], [0], [0, 0, 1, 0], [], []>} : vector<16x32xbf16>, vector<16x32xbf16>, vector<16x16xf32> -> vector<16x16xf32>
    %cst_17 = arith.constant dense<0xFF800000> : vector<16xf32>
    %44 = vector.multi_reduction <maximumf>, %43, %cst_17 [1] : vector<16x16xf32> to vector<16xf32>
    %45 = vector.shape_cast %44 : vector<16xf32> to vector<16x1xf32>
    %46 = vector.broadcast %45 : vector<16x1xf32> to vector<16x16xf32>
    %47 = arith.subf %43, %46 : vector<16x16xf32>
    %48 = math.exp %47 : vector<16x16xf32>
    %cst_18 = arith.constant dense<0.000000e+00> : vector<16xf32>
    %49 = vector.multi_reduction <add>, %48, %cst_18 [1] : vector<16x16xf32> to vector<16xf32>
    %50 = vector.shape_cast %49 : vector<16xf32> to vector<16x1xf32>
    %51 = tpu.reciprocal %50 {approx = true} : vector<16x1xf32> -> vector<16x1xf32>
    %52 = vector.broadcast %51 : vector<16x1xf32> to vector<16x16xf32>
    %53 = arith.mulf %48, %52 : vector<16x16xf32>
    %54 = arith.truncf %53 : vector<16x16xf32> to vector<16x16xbf16>
    %55 = vector.extract_strided_slice %4 {offsets = [0, 64], sizes = [16, 32], strides = [1, 1]} : vector<16x128xbf16> to vector<16x32xbf16>
    %cst_19 = arith.constant dense<0.000000e+00> : vector<16x32xf32>
    %56 = tpu.matmul %54, %55, %cst_19 {dimension_numbers = #tpu.dot_dimension_numbers<[1], [0], [0], [1], [0, 0, 1, 1], [], []>} : vector<16x16xbf16>, vector<16x32xbf16>, vector<16x32xf32> -> vector<16x32xf32>
    %57 = arith.truncf %56 : vector<16x32xf32> to vector<16x32xbf16>
    %c0_20 = arith.constant 0 : index
    %c64 = arith.constant 64 : index
    %58 = vector.load %arg5[%c0_20, %c64] : memref<16x128xbf16, #tpu.memory_space<vmem>>, vector<16x32xbf16>
    tpu.vector_store %arg5[%c0_20, %c64], %57 {strides = array<i32>} : memref<16x128xbf16, #tpu.memory_space<vmem>>, vector<16x32xbf16>,
    %59 = vector.extract_strided_slice %2 {offsets = [0, 96], sizes = [16, 32], strides = [1, 1]} : vector<16x128xbf16> to vector<16x32xbf16>
    %60 = vector.extract_strided_slice %3 {offsets = [0, 96], sizes = [16, 32], strides = [1, 1]} : vector<16x128xbf16> to vector<16x32xbf16>
    %cst_21 = arith.constant dense<0.000000e+00> : vector<16x16xf32>
    %61 = tpu.matmul %59, %60, %cst_21 {dimension_numbers = #tpu.dot_dimension_numbers<[1], [1], [0], [0], [0, 0, 1, 0], [], []>} : vector<16x32xbf16>, vector<16x32xbf16>, vector<16x16xf32> -> vector<16x16xf32>
    %cst_22 = arith.constant dense<0xFF800000> : vector<16xf32>
    %62 = vector.multi_reduction <maximumf>, %61, %cst_22 [1] : vector<16x16xf32> to vector<16xf32>
    %63 = vector.shape_cast %62 : vector<16xf32> to vector<16x1xf32>
    %64 = vector.broadcast %63 : vector<16x1xf32> to vector<16x16xf32>
    %65 = arith.subf %61, %64 : vector<16x16xf32>
    %66 = math.exp %65 : vector<16x16xf32>
    %cst_23 = arith.constant dense<0.000000e+00> : vector<16xf32>
    %67 = vector.multi_reduction <add>, %66, %cst_23 [1] : vector<16x16xf32> to vector<16xf32>
    %68 = vector.shape_cast %67 : vector<16xf32> to vector<16x1xf32>
    %69 = tpu.reciprocal %68 {approx = true} : vector<16x1xf32> -> vector<16x1xf32>
    %70 = vector.broadcast %69 : vector<16x1xf32> to vector<16x16xf32>
    %71 = arith.mulf %66, %70 : vector<16x16xf32>
    %72 = arith.truncf %71 : vector<16x16xf32> to vector<16x16xbf16>
    %73 = vector.extract_strided_slice %4 {offsets = [0, 96], sizes = [16, 32], strides = [1, 1]} : vector<16x128xbf16> to vector<16x32xbf16>
    %cst_24 = arith.constant dense<0.000000e+00> : vector<16x32xf32>
    %74 = tpu.matmul %72, %73, %cst_24 {dimension_numbers = #tpu.dot_dimension_numbers<[1], [0], [0], [1], [0, 0, 1, 1], [], []>} : vector<16x16xbf16>, vector<16x32xbf16>, vector<16x32xf32> -> vector<16x32xf32>
    %75 = arith.truncf %74 : vector<16x32xf32> to vector<16x32xbf16>
    %c0_25 = arith.constant 0 : index
    %c96 = arith.constant 96 : index
    %76 = vector.load %arg5[%c0_25, %c96] : memref<16x128xbf16, #tpu.memory_space<vmem>>, vector<16x32xbf16>
    tpu.vector_store %arg5[%c0_25, %c96], %75 {strides = array<i32>} : memref<16x128xbf16, #tpu.memory_space<vmem>>, vector<16x32xbf16>,
    return
  }
  func.func @transform_0(%arg0: i32, %arg1: i32) -> (i32, i32) {
    %c0_i32 = arith.constant 0 : i32
    %0 = arith.addi %c0_i32, %arg1 : i32
    %c0_i32_0 = arith.constant 0 : i32
    return %arg0, %0 : i32, i32
  }
  func.func @transform_1(%arg0: i32, %arg1: i32) -> (i32, i32) {
    %c0_i32 = arith.constant 0 : i32
    %0 = arith.addi %c0_i32, %arg1 : i32
    %c0_i32_0 = arith.constant 0 : i32
    return %arg0, %0 : i32, i32
  }
  func.func @transform_2(%arg0: i32, %arg1: i32) -> (i32, i32) {
    %c1_i32 = arith.constant 1 : i32
    %0 = arith.addi %c1_i32, %arg1 : i32
    %c0_i32 = arith.constant 0 : i32
    return %arg0, %0 : i32, i32
  }
  func.func @transform_3(%arg0: i32, %arg1: i32) -> (i32, i32) {
    %c0_i32 = arith.constant 0 : i32
    return %arg0, %arg1 : i32, i32
  }
}

module attributes {stable_mosaic.version = 11 : i64} {
  func.func @_matmul_kernel_single(%arg0: i32, %arg1: i32, %arg2: memref<32x128xbf16, #tpu.memory_space<vmem>>, %arg3: memref<128x512xbf16, #tpu.memory_space<vmem>>, %arg4: memref<1x512xf32, #tpu.memory_space<vmem>>, %arg5: memref<32x512xbf16, #tpu.memory_space<vmem>>) attributes {dimension_semantics = [#tpu.dimension_semantics<parallel>, #tpu.dimension_semantics<parallel>], iteration_bounds = array<i64: 1, 2>, scalar_prefetch = 0 : i64, scratch_operands = 0 : i64, tpu.core_type = #tpu.core_type<tc>, window_params = [{transform_indices = @transform_0, window_bounds = array<i64: 32, 128>}, {transform_indices = @transform_1, window_bounds = array<i64: 128, 512>}, {transform_indices = @transform_2, window_bounds = array<i64: 1, 512>}, {transform_indices = @transform_3, window_bounds = array<i64: 32, 512>}]} {
    %c0 = arith.constant 0 : index
    %c0_0 = arith.constant 0 : index
    %0 = vector.load %arg2[%c0, %c0_0] : memref<32x128xbf16, #tpu.memory_space<vmem>>, vector<32x128xbf16>
    %c0_1 = arith.constant 0 : index
    %c0_2 = arith.constant 0 : index
    %1 = vector.load %arg3[%c0_1, %c0_2] : memref<128x512xbf16, #tpu.memory_space<vmem>>, vector<128x512xbf16>
    %cst = arith.constant dense<0.000000e+00> : vector<32x512xf32>
    %2 = tpu.matmul %0, %1, %cst {dimension_numbers = #tpu.dot_dimension_numbers<[1], [0], [0], [1], [0, 0, 1, 1], [], []>} : vector<32x128xbf16>, vector<128x512xbf16>, vector<32x512xf32> -> vector<32x512xf32>
    %c0_3 = arith.constant 0 : index
    %c0_4 = arith.constant 0 : index
    %3 = vector.load %arg4[%c0_3, %c0_4] : memref<1x512xf32, #tpu.memory_space<vmem>>, vector<1x512xf32>
    %4 = vector.broadcast %3 : vector<1x512xf32> to vector<32x512xf32>
    %5 = arith.addf %2, %4 : vector<32x512xf32>
    %cst_5 = arith.constant 0.000000e+00 : f32
    %6 = vector.broadcast %cst_5 : f32 to vector<32x512xf32>
    %7 = arith.maximumf %5, %6 : vector<32x512xf32>
    %8 = arith.truncf %7 : vector<32x512xf32> to vector<32x512xbf16>
    %c0_6 = arith.constant 0 : index
    %c0_7 = arith.constant 0 : index
    %9 = vector.load %arg5[%c0_6, %c0_7] : memref<32x512xbf16, #tpu.memory_space<vmem>>, vector<32x512xbf16>
    tpu.vector_store %arg5[%c0_6, %c0_7], %8 {strides = array<i32>} : memref<32x512xbf16, #tpu.memory_space<vmem>>, vector<32x512xbf16>,
    return
  }
  func.func @transform_0(%arg0: i32, %arg1: i32) -> (i32, i32) {
    %c0_i32 = arith.constant 0 : i32
    %c0_i32_0 = arith.constant 0 : i32
    return %arg0, %c0_i32 : i32, i32
  }
  func.func @transform_1(%arg0: i32, %arg1: i32) -> (i32, i32) {
    %c0_i32 = arith.constant 0 : i32
    %c0_i32_0 = arith.constant 0 : i32
    return %c0_i32, %arg1 : i32, i32
  }
  func.func @transform_2(%arg0: i32, %arg1: i32) -> (i32, i32) {
    %c0_i32 = arith.constant 0 : i32
    %c0_i32_0 = arith.constant 0 : i32
    return %c0_i32, %arg1 : i32, i32
  }
  func.func @transform_3(%arg0: i32, %arg1: i32) -> (i32, i32) {
    %c0_i32 = arith.constant 0 : i32
    return %arg0, %arg1 : i32, i32
  }
}

module attributes {stable_mosaic.version = 11 : i64} {
  func.func @_linear_ln_kernel_single(%arg0: i32, %arg1: memref<16x1024xbf16, #tpu.memory_space<vmem>>, %arg2: memref<1024x128xbf16, #tpu.memory_space<vmem>>, %arg3: memref<1x128xf32, #tpu.memory_space<vmem>>, %arg4: memref<16x128xbf16, #tpu.memory_space<vmem>>, %arg5: memref<1x128xf32, #tpu.memory_space<vmem>>, %arg6: memref<1x128xf32, #tpu.memory_space<vmem>>, %arg7: memref<16x128xbf16, #tpu.memory_space<vmem>>) attributes {dimension_semantics = [#tpu.dimension_semantics<parallel>], iteration_bounds = array<i64: 2>, scalar_prefetch = 0 : i64, scratch_operands = 0 : i64, tpu.core_type = #tpu.core_type<tc>, window_params = [{transform_indices = @transform_0, window_bounds = array<i64: 16, 1024>}, {pipeline_mode = #tpu.pipeline_mode<synchronous>, transform_indices = @transform_1, window_bounds = array<i64: 1024, 128>}, {pipeline_mode = #tpu.pipeline_mode<synchronous>, transform_indices = @transform_2, window_bounds = array<i64: 1, 128>}, {transform_indices = @transform_3, window_bounds = array<i64: 16, 128>}, {pipeline_mode = #tpu.pipeline_mode<synchronous>, transform_indices = @transform_4, window_bounds = array<i64: 1, 128>}, {pipeline_mode = #tpu.pipeline_mode<synchronous>, transform_indices = @transform_5, window_bounds = array<i64: 1, 128>}, {transform_indices = @transform_6, window_bounds = array<i64: 16, 128>}]} {
    %c0 = arith.constant 0 : index
    %c0_0 = arith.constant 0 : index
    %0 = vector.load %arg1[%c0, %c0_0] : memref<16x1024xbf16, #tpu.memory_space<vmem>>, vector<16x1024xbf16>
    %c0_1 = arith.constant 0 : index
    %c0_2 = arith.constant 0 : index
    %1 = vector.load %arg2[%c0_1, %c0_2] : memref<1024x128xbf16, #tpu.memory_space<vmem>>, vector<1024x128xbf16>
    %cst = arith.constant dense<0.000000e+00> : vector<16x128xf32>
    %2 = tpu.matmul %0, %1, %cst {dimension_numbers = #tpu.dot_dimension_numbers<[1], [0], [0], [1], [0, 0, 1, 1], [], []>} : vector<16x1024xbf16>, vector<1024x128xbf16>, vector<16x128xf32> -> vector<16x128xf32>
    %c0_3 = arith.constant 0 : index
    %c0_4 = arith.constant 0 : index
    %3 = vector.load %arg3[%c0_3, %c0_4] : memref<1x128xf32, #tpu.memory_space<vmem>>, vector<1x128xf32>
    %4 = vector.broadcast %3 : vector<1x128xf32> to vector<16x128xf32>
    %5 = arith.addf %2, %4 : vector<16x128xf32>
    %c0_5 = arith.constant 0 : index
    %c0_6 = arith.constant 0 : index
    %6 = vector.load %arg4[%c0_5, %c0_6] : memref<16x128xbf16, #tpu.memory_space<vmem>>, vector<16x128xbf16>
    %7 = arith.extf %6 : vector<16x128xbf16> to vector<16x128xf32>
    %8 = arith.addf %5, %7 : vector<16x128xf32>
    %c0_7 = arith.constant 0 : index
    %c0_8 = arith.constant 0 : index
    %9 = vector.load %arg5[%c0_7, %c0_8] : memref<1x128xf32, #tpu.memory_space<vmem>>, vector<1x128xf32>
    %c0_9 = arith.constant 0 : index
    %c0_10 = arith.constant 0 : index
    %10 = vector.load %arg6[%c0_9, %c0_10] : memref<1x128xf32, #tpu.memory_space<vmem>>, vector<1x128xf32>
    %cst_11 = arith.constant dense<0.000000e+00> : vector<16xf32>
    %11 = vector.multi_reduction <add>, %8, %cst_11 [1] : vector<16x128xf32> to vector<16xf32>
    %12 = vector.shape_cast %11 : vector<16xf32> to vector<16x1xf32>
    %cst_12 = arith.constant 1.280000e+02 : f32
    %13 = vector.broadcast %cst_12 : f32 to vector<16x1xf32>
    %14 = arith.divf %12, %13 : vector<16x1xf32>
    %15 = vector.broadcast %14 : vector<16x1xf32> to vector<16x128xf32>
    %16 = arith.subf %8, %15 : vector<16x128xf32>
    %17 = arith.mulf %16, %16 : vector<16x128xf32>
    %cst_13 = arith.constant dense<0.000000e+00> : vector<16xf32>
    %18 = vector.multi_reduction <add>, %17, %cst_13 [1] : vector<16x128xf32> to vector<16xf32>
    %19 = vector.shape_cast %18 : vector<16xf32> to vector<16x1xf32>
    %cst_14 = arith.constant 1.280000e+02 : f32
    %20 = vector.broadcast %cst_14 : f32 to vector<16x1xf32>
    %21 = arith.divf %19, %20 : vector<16x1xf32>
    %cst_15 = arith.constant 9.99999974E-6 : f32
    %22 = vector.broadcast %cst_15 : f32 to vector<16x1xf32>
    %23 = arith.addf %21, %22 : vector<16x1xf32>
    %24 = math.rsqrt %23 : vector<16x1xf32>
    %25 = vector.broadcast %14 : vector<16x1xf32> to vector<16x128xf32>
    %26 = arith.subf %8, %25 : vector<16x128xf32>
    %27 = vector.broadcast %24 : vector<16x1xf32> to vector<16x128xf32>
    %28 = arith.mulf %26, %27 : vector<16x128xf32>
    %29 = vector.broadcast %9 : vector<1x128xf32> to vector<16x128xf32>
    %30 = arith.mulf %28, %29 : vector<16x128xf32>
    %31 = vector.broadcast %10 : vector<1x128xf32> to vector<16x128xf32>
    %32 = arith.addf %30, %31 : vector<16x128xf32>
    %33 = arith.truncf %32 : vector<16x128xf32> to vector<16x128xbf16>
    %c0_16 = arith.constant 0 : index
    %c0_17 = arith.constant 0 : index
    %34 = vector.load %arg7[%c0_16, %c0_17] : memref<16x128xbf16, #tpu.memory_space<vmem>>, vector<16x128xbf16>
    tpu.vector_store %arg7[%c0_16, %c0_17], %33 {strides = array<i32>} : memref<16x128xbf16, #tpu.memory_space<vmem>>, vector<16x128xbf16>,
    return
  }
  func.func @transform_0(%arg0: i32) -> (i32, i32) {
    %c0_i32 = arith.constant 0 : i32
    %c0_i32_0 = arith.constant 0 : i32
    return %arg0, %c0_i32 : i32, i32
  }
  func.func @transform_1(%arg0: i32) -> (i32, i32) {
    %c0_i32 = arith.constant 0 : i32
    %c0_i32_0 = arith.constant 0 : i32
    %c0_i32_1 = arith.constant 0 : i32
    return %c0_i32, %c0_i32_0 : i32, i32
  }
  func.func @transform_2(%arg0: i32) -> (i32, i32) {
    %c0_i32 = arith.constant 0 : i32
    %c0_i32_0 = arith.constant 0 : i32
    %c0_i32_1 = arith.constant 0 : i32
    return %c0_i32, %c0_i32_0 : i32, i32
  }
  func.func @transform_3(%arg0: i32) -> (i32, i32) {
    %c0_i32 = arith.constant 0 : i32
    %c0_i32_0 = arith.constant 0 : i32
    return %arg0, %c0_i32 : i32, i32
  }
  func.func @transform_4(%arg0: i32) -> (i32, i32) {
    %c0_i32 = arith.constant 0 : i32
    %c0_i32_0 = arith.constant 0 : i32
    %c0_i32_1 = arith.constant 0 : i32
    return %c0_i32, %c0_i32_0 : i32, i32
  }
  func.func @transform_5(%arg0: i32) -> (i32, i32) {
    %c0_i32 = arith.constant 0 : i32
    %c0_i32_0 = arith.constant 0 : i32
    %c0_i32_1 = arith.constant 0 : i32
    return %c0_i32, %c0_i32_0 : i32, i32
  }
  func.func @transform_6(%arg0: i32) -> (i32, i32) {
    %c0_i32 = arith.constant 0 : i32
    %c0_i32_0 = arith.constant 0 : i32
    return %arg0, %c0_i32 : i32, i32
  }
}

module attributes {stable_mosaic.version = 11 : i64} {
  func.func @_matmul_kernel_single(%arg0: i32, %arg1: i32, %arg2: memref<32x128xbf16, #tpu.memory_space<vmem>>, %arg3: memref<128x128xbf16, #tpu.memory_space<vmem>>, %arg4: memref<1x128xf32, #tpu.memory_space<vmem>>, %arg5: memref<32x128xf32, #tpu.memory_space<vmem>>) attributes {dimension_semantics = [#tpu.dimension_semantics<parallel>, #tpu.dimension_semantics<parallel>], iteration_bounds = array<i64: 1, 1>, scalar_prefetch = 0 : i64, scratch_operands = 0 : i64, tpu.core_type = #tpu.core_type<tc>, window_params = [{transform_indices = @transform_0, window_bounds = array<i64: 32, 128>}, {transform_indices = @transform_1, window_bounds = array<i64: 128, 128>}, {transform_indices = @transform_2, window_bounds = array<i64: 1, 128>}, {transform_indices = @transform_3, window_bounds = array<i64: 32, 128>}]} {
    %c0 = arith.constant 0 : index
    %c0_0 = arith.constant 0 : index
    %0 = vector.load %arg2[%c0, %c0_0] : memref<32x128xbf16, #tpu.memory_space<vmem>>, vector<32x128xbf16>
    %c0_1 = arith.constant 0 : index
    %c0_2 = arith.constant 0 : index
    %1 = vector.load %arg3[%c0_1, %c0_2] : memref<128x128xbf16, #tpu.memory_space<vmem>>, vector<128x128xbf16>
    %cst = arith.constant dense<0.000000e+00> : vector<32x128xf32>
    %2 = tpu.matmul %0, %1, %cst {dimension_numbers = #tpu.dot_dimension_numbers<[1], [0], [0], [1], [0, 0, 1, 1], [], []>} : vector<32x128xbf16>, vector<128x128xbf16>, vector<32x128xf32> -> vector<32x128xf32>
    %c0_3 = arith.constant 0 : index
    %c0_4 = arith.constant 0 : index
    %3 = vector.load %arg4[%c0_3, %c0_4] : memref<1x128xf32, #tpu.memory_space<vmem>>, vector<1x128xf32>
    %4 = vector.broadcast %3 : vector<1x128xf32> to vector<32x128xf32>
    %5 = arith.addf %2, %4 : vector<32x128xf32>
    %c0_5 = arith.constant 0 : index
    %c0_6 = arith.constant 0 : index
    %6 = vector.load %arg5[%c0_5, %c0_6] : memref<32x128xf32, #tpu.memory_space<vmem>>, vector<32x128xf32>
    tpu.vector_store %arg5[%c0_5, %c0_6], %5 {strides = array<i32>} : memref<32x128xf32, #tpu.memory_space<vmem>>, vector<32x128xf32>,
    return
  }
  func.func @transform_0(%arg0: i32, %arg1: i32) -> (i32, i32) {
    %c0_i32 = arith.constant 0 : i32
    %c0_i32_0 = arith.constant 0 : i32
    return %arg0, %c0_i32 : i32, i32
  }
  func.func @transform_1(%arg0: i32, %arg1: i32) -> (i32, i32) {
    %c0_i32 = arith.constant 0 : i32
    %c0_i32_0 = arith.constant 0 : i32
    return %c0_i32, %arg1 : i32, i32
  }
  func.func @transform_2(%arg0: i32, %arg1: i32) -> (i32, i32) {
    %c0_i32 = arith.constant 0 : i32
    %c0_i32_0 = arith.constant 0 : i32
    return %c0_i32, %arg1 : i32, i32
  }
  func.func @transform_3(%arg0: i32, %arg1: i32) -> (i32, i32) {
    %c0_i32 = arith.constant 0 : i32
    return %arg0, %arg1 : i32, i32
  }
}

</mosaic_0001>

<bundles_post_ra>
// kernel: language_model_forward.22
= control target key start
LH: loop header
LB: loop body
LE: loop exit
PB: predicated region body
PF: predicated region fallthrough
CT: control target
= control target key end

     0   :  { %s304_s1 = inlined_call_operand.vmem [shape: bf16[128,128], index: 1, kind: input, shape index: {}]   ;;  %s305_s0 = inlined_call_operand.vmem [shape: bf16[32,128], index: 0, kind: input, shape index: {}]   ;;  %s306_s2 = inlined_call_operand.vmem [shape: f32[1,128], index: 2, kind: input, shape index: {}]   ;;  %s307_s3 = inlined_call_operand.vmem [shape: bf16[32,128], index: 3, kind: output, shape index: {}]  }
   0x1   :  { %v235_v0 = vld [vmem:[%s304_s1] sm:$0xff]   ;;  %v236_v1 = vld [vmem:[%s304_s1 + $0x8] sm:$0xff]   ;;  %v237_v2 = vld [vmem:[%s304_s1 + $0x10] sm:$0xff]  }
   0x2   :  { %215 = vmatprep.subr.bf16.mxu0 %v235_v0  ;;  %v238_v3 = vld [vmem:[%s304_s1 + $0x18] sm:$0xff]   ;;  %v243_v4 = vld [vmem:[%s305_s0] sm:$0xff]   ;;  %v240_v6 = vld [vmem:[%s304_s1 + $0x28] sm:$0xff]  }
   0x3   :  { %216 = vmatpush3.bf16.msra.mxu0 %v235_v0  ;;  %231 = vmatprep.mubr.bf16.mxu0 %v243_v4  ;;  %v239_v5 = vld [vmem:[%s304_s1 + $0x20] sm:$0xff]   ;;  %v241_v7 = vld [vmem:[%s304_s1 + $0x30] sm:$0xff]   ;;  %v242_v8 = vld [vmem:[%s304_s1 + $0x38] sm:$0xff]  }
   0x4   :  { %217 = vmatprep.subr.bf16.mxu0 %v236_v1  ;;  %v244_v9 = vld [vmem:[%s305_s0 + $0x8] sm:$0xff]   ;;  %v175_v11 = vld [vmem:[%s306_s2] ss:$0 sm:$0xff] }
   0x7   :  { %218 = vmatpush3.bf16.msra.mxu0 %v236_v1 }
   0x8   :  { %219 = vmatprep.subr.bf16.mxu0 %v237_v2 }
   0xb   :  { %220 = vmatpush3.bf16.msra.mxu0 %v237_v2 }
   0xc   :  { %221 = vmatprep.subr.bf16.mxu0 %v238_v3 }
   0xf   :  { %222 = vmatpush3.bf16.msra.mxu0 %v238_v3 }
  0x10   :  { %223 = vmatprep.subr.bf16.mxu0 %v239_v5 }
  0x13   :  { %224 = vmatpush3.bf16.msra.mxu0 %v239_v5 }
  0x14   :  { %225 = vmatprep.subr.bf16.mxu0 %v240_v6 }
  0x17   :  { %226 = vmatpush3.bf16.msra.mxu0 %v240_v6 }
  0x18   :  { %227 = vmatprep.subr.bf16.mxu0 %v241_v7 }
  0x1b   :  { %228 = vmatpush3.bf16.msra.mxu0 %v241_v7 }
  0x1c   :  { %229 = vmatprep.subr.bf16.mxu0 %v242_v8 }
  0x1f   :  { %230 = vmatpush3.bf16.msra.mxu0 %v242_v8 }
  0x22   :  { %232 = vmatmul.mubr.bf16.vlgmr.msra.gmra.mrb[0].mxu0 %v244_v9 }
  0xf5   :  { %v233_v10 = vpop.f32.mrb[0].mxu0 }
  0xf6   :  { %v136_v12 = vpop.f32.mrb[1].mxu0  ;;  %v145_v14 = vadd.f32 %v233_v10, %v175_v11 }
  0xf7   :  { %v234_v13 = vpop.f32.mrb[2].mxu0  ;;  %v137_v17 = vadd.f32 %v175_v11, %v136_v12 }
  0xf8   :  { %v148_v15 = vadd.f32 %v234_v13, %v175_v11  ;;  %v139_v16 = vpop.f32.mrb[3].mxu0 }
  0xf9   :  { %v140_v18 = vadd.f32 %v175_v11, %v139_v16 }
  0xfa   :  { %v202_v19 = vpack.c.bf16 %v148_v15, %v145_v14 }
  0xfb   :  { %v197_v20 = vpack.c.bf16 %v140_v18, %v137_v17 }
  0xfc   :  { %204 = vst [vmem:[%s307_s3 + $0x8] sm:$0xff] %v202_v19  }
  0xfd   :  { %198 = vst [vmem:[%s307_s3] sm:$0xff] %v197_v20  }

// kernel: language_model_forward.19
= control target key start
LH: loop header
LB: loop body
LE: loop exit
PB: predicated region body
PF: predicated region fallthrough
CT: control target
= control target key end

     0   :  { %s812_s12 = smov 0   ;;  %s814_s13 = smov 0   ;;  %s917_s0 = inlined_call_operand.vmem [shape: bf16[32,128], index: 0, kind: input, shape index: {}]   ;;  %s918_s1 = inlined_call_operand.vmem [shape: bf16[128,384], index: 1, kind: input, shape index: {}]   ;;  %s919_s2 = inlined_call_operand.vmem [shape: f32[1,384], index: 2, kind: input, shape index: {}]   ;;  %s920_s3 = inlined_call_operand.vmem [shape: bf16[32,384], index: 3, kind: output, shape index: {}]  }
   0x1   :  { %s816_s14 = smov 0   ;;  %s818_s15 = smov 0  }
   0x2   :  { %s820_s16 = smov 0  }
   0x3 LB: > { %s22_s17 = sadd.s32 1, %s786_s15  ;;  %s628_s18 = sadd.s32 4294967295, %s790_s16   ;;  %s790_s16 = sphi %s820_s16, %s13_s16   ;;  %s786_s15 = sphi %s818_s15, %s925_s15   ;;  %s782_s14 = sphi %s816_s14, %s924_s14   ;;  %s778_s13 = sphi %s814_s13, %s923_s13   ;;  %s774_s12 = sphi %s812_s12, %s922_s12  }
   0x4   : > { %p23_p0 = scmp.ge.s32.totalorder %s22_s17, 3  ;;  %p65_p1 = scmp.ne.s32.totalorder %s778_s13, %s774_s12 }
   0x5   : > { %p66_p2 = scmp.eq.s32.totalorder %s790_s16, 0  ;;  %p123_p4 = scmp.eq.s32.totalorder %s628_s18, 2 }
   0x6   : > { %s927_s17 = smov (%p23_p0, %s22_s17), 0  ;;  %s58_s20 = sadd.s32 1, %s778_s13 }
   0x7   : > { %p67_p3 = por %p66_p2, %p65_p1  ;;  %s55_s19 = ssub.s32 %s786_s15, %s927_s17 }
   0x8   : > { %p56_p5 = scmp.eq.s32.totalorder %s55_s19, 0  ;;  %p847_p6 = por %p123_p4, %p65_p1 }
   0x9   : > { %p632_p7 = scmp.ge.s32.totalorder %s790_s16, 3 }
   0xa   : > { %s852_s22 = scalar_select %p56_p5, %s778_s13, %s58_s20  }
   0xb   : > { %154 = sbr.rel (%p632_p7) target bundleno = 32 (0x20), region = 20 }
  0x12   : > { %157 = sbr.rel (!%p67_p3) target bundleno = 32 (0x20), region = 24  ;;  %s159_s23 = sand.u32 (%p67_p3), 1, %s778_s13  }
  0x13   : > { %s634_s24 = sshll.u32 (%p67_p3), %s786_s15, 2  ;;  %s633_s25 = sshll.u32 (%p67_p3), %s159_s23, 6 }
  0x14   : > { %s860_s28 = scalar_lea.vmem (%p67_p3), %s918_s1, %s634_s24  ;;  %s161_s29 = scalar_lea.vmem (%p67_p3), [#allocation2], %s633_s25 }
  0x15   : > { %v179_v0 = vld [vmem:[%s860_s28] sm:$0xf] (%p67_p3)  ;;  %v181_v1 = vld [vmem:[%s860_s28 + $0xc] sm:$0xf] (%p67_p3)  ;;  %v183_v2 = vld [vmem:[%s860_s28 + $0x18] sm:$0xf] (%p67_p3) }
  0x16   : > { %180 = vst [vmem:[%s161_s29] sm:$0xf] (%p67_p3), %v179_v0  ;;  %182 = vst [vmem:[%s161_s29 + $0x4] sm:$0xf] (%p67_p3), %v181_v1  ;;  %v185_v3 = vld [vmem:[%s860_s28 + $0x24] sm:$0xf] (%p67_p3) }
  0x17   : > { %v187_v4 = vld [vmem:[%s860_s28 + $0x30] sm:$0xf] (%p67_p3)  ;;  %184 = vst [vmem:[%s161_s29 + $0x8] sm:$0xf] (%p67_p3), %v183_v2  ;;  %186 = vst [vmem:[%s161_s29 + $0xc] sm:$0xf] (%p67_p3), %v185_v3 }
  0x18   : > { %188 = vst [vmem:[%s161_s29 + $0x10] sm:$0xf] (%p67_p3), %v187_v4  ;;  %v189_v5 = vld [vmem:[%s860_s28 + $0x3c] sm:$0xf] (%p67_p3)  ;;  %v191_v6 = vld [vmem:[%s860_s28 + $0x48] sm:$0xf] (%p67_p3) }
  0x19   : > { %v193_v7 = vld [vmem:[%s860_s28 + $0x54] sm:$0xf]  ;;  %190 = vst [vmem:[%s161_s29 + $0x14] sm:$0xf] %v189_v5  ;;  %192 = vst [vmem:[%s161_s29 + $0x18] sm:$0xf] %v191_v6 }
  0x1a   : > { %194 = vst [vmem:[%s161_s29 + $0x1c] sm:$0xf] %v193_v7  ;;  %v195_v8 = vld [vmem:[%s860_s28 + $0x60] sm:$0xf]  ;;  %v197_v9 = vld [vmem:[%s860_s28 + $0x6c] sm:$0xf] }
  0x1b   : > { %v199_v10 = vld [vmem:[%s860_s28 + $0x78] sm:$0xf]  ;;  %196 = vst [vmem:[%s161_s29 + $0x20] sm:$0xf] %v195_v8  ;;  %198 = vst [vmem:[%s161_s29 + $0x24] sm:$0xf] %v197_v9 }
  0x1c   : > { %200 = vst [vmem:[%s161_s29 + $0x28] sm:$0xf] %v199_v10  ;;  %v201_v11 = vld [vmem:[%s860_s28 + $0x84] sm:$0xf]  ;;  %v203_v12 = vld [vmem:[%s860_s28 + $0x90] sm:$0xf] }
  0x1d   : > { %v205_v13 = vld [vmem:[%s860_s28 + $0x9c] sm:$0xf]  ;;  %202 = vst [vmem:[%s161_s29 + $0x2c] sm:$0xf] %v201_v11  ;;  %204 = vst [vmem:[%s161_s29 + $0x30] sm:$0xf] %v203_v12 }
  0x1e   : > { %206 = vst [vmem:[%s161_s29 + $0x34] sm:$0xf] %v205_v13  ;;  %v207_v14 = vld [vmem:[%s860_s28 + $0xa8] sm:$0xf]  ;;  %v209_v15 = vld [vmem:[%s860_s28 + $0xb4] sm:$0xf] }
  0x1f   : > { %208 = vst [vmem:[%s161_s29 + $0x38] sm:$0xf] %v207_v14  ;;  %210 = vst [vmem:[%s161_s29 + $0x3c] sm:$0xf] %v209_v15 }
  0x20 PF: > { %p635_p8 = scmp.ge.s32.totalorder %s790_s16, 1  ;;  %p270_p9 = scmp.lt.s32.totalorder %s790_s16, 4 }
  0x22   : > { %p271_p10 = pnand %p635_p8, %p270_p9 }
  0x23   : > { %s277_s30 = sand.u32 (!%p271_p10), 1, %s774_s12   ;;  %v750_v16 = vld [vmem:[%s917_s0] sm:$0xff] (!%p271_p10)   ;;  %v751_v25 = vld [vmem:[%s917_s0 + $0x8] sm:$0xff] (!%p271_p10)   ;;  %p313_p11 = scmp.lt.s32.totalorder (!%p271_p10), %s782_s14, 2 }
  0x24   : > { %274 = sbr.rel (%p271_p10) target bundleno = 300 (0x12c), region = 69  ;;  %s636_s6 = sshll.u32 (!%p271_p10), %s277_s30, 6  ;;  %698 = vmatprep.mubr.bf16.mxu0 (!%p271_p10), %v750_v16 }
  0x25   : > { %s279_s7 = scalar_lea.vmem (!%p271_p10), [#allocation2], %s636_s6  ;;  %s637_s20 = sshll.u32 (!%p271_p10), %s277_s30, 4 }
  0x26   : > { %v742_v17 = vld [vmem:[%s279_s7] sm:$0xff] (!%p271_p10)   ;;  %v743_v18 = vld [vmem:[%s279_s7 + $0x8] sm:$0xff] (!%p271_p10)   ;;  %v744_v19 = vld [vmem:[%s279_s7 + $0x10] sm:$0xff] (!%p271_p10)   ;;  %s306_s23 = scalar_lea.vmem (!%p271_p10), [#allocation3], %s637_s20 }
  0x27   : > { %682 = vmatprep.subr.bf16.mxu0 (!%p271_p10), %v742_v17  ;;  %v745_v20 = vld [vmem:[%s279_s7 + $0x18] sm:$0xff] (!%p271_p10)   ;;  %v746_v21 = vld [vmem:[%s279_s7 + $0x20] sm:$0xff] (!%p271_p10)   ;;  %v747_v22 = vld [vmem:[%s279_s7 + $0x28] sm:$0xff] (!%p271_p10)  }
  0x28   : > { %683 = vmatpush3.bf16.msra.mxu0 (!%p271_p10), %v742_v17  ;;  %v748_v23 = vld [vmem:[%s279_s7 + $0x30] sm:$0xff] (!%p271_p10)   ;;  %v749_v24 = vld [vmem:[%s279_s7 + $0x38] sm:$0xff] (!%p271_p10)  }
  0x29   : > { %684 = vmatprep.subr.bf16.mxu0 (!%p271_p10), %v743_v18 }
  0x2b   : > { %s314_s10 = scalar_select %p313_p11, %s782_s14, 2 }
  0x2c   : > { %685 = vmatpush3.bf16.msra.mxu0 %v743_v18  ;;  %s654_s24 = sshll.u32 (%p847_p6), %s782_s14, 2 }
  0x2d   : > { %686 = vmatprep.subr.bf16.mxu0 %v744_v19  ;;  %s315_s19 = scalar_lea.vmem %s919_s2, %s314_s10  ;;  %s485_s26 = scalar_lea.vmem (%p847_p6), %s920_s3, %s654_s24 }
  0x2e   : > { %v638_v27 = vld [vmem:[%s315_s19] ss:$0 sm:$0xff] }
  0x30   : > { %687 = vmatpush3.bf16.msra.mxu0 %v744_v19 }
  0x31   : > { %688 = vmatprep.subr.bf16.mxu0 %v745_v20 }
  0x34   : > { %689 = vmatpush3.bf16.msra.mxu0 %v745_v20 }
  0x35   : > { %690 = vmatprep.subr.bf16.mxu0 %v746_v21 }
  0x38   : > { %691 = vmatpush3.bf16.msra.mxu0 %v746_v21 }
  0x39   : > { %692 = vmatprep.subr.bf16.mxu0 %v747_v22 }
  0x3c   : > { %693 = vmatpush3.bf16.msra.mxu0 %v747_v22 }
  0x3d   : > { %694 = vmatprep.subr.bf16.mxu0 %v748_v23 }
  0x40   : > { %695 = vmatpush3.bf16.msra.mxu0 %v748_v23 }
  0x41   : > { %696 = vmatprep.subr.bf16.mxu0 %v749_v24 }
  0x44   : > { %697 = vmatpush3.bf16.msra.mxu0 %v749_v24 }
  0x47   : > { %699 = vmatmul.mubr.bf16.vlgmr.msra.gmra.mrb[0].mxu0 %v751_v25 }
 0x11a   : > { %v700_v26 = vpop.f32.mrb[0].mxu0 }
 0x11b   : > { %v439_v28 = vpop.f32.mrb[1].mxu0  ;;  %v448_v30 = vadd.f32 %v700_v26, %v638_v27 }
 0x11c   : > { %v701_v29 = vpop.f32.mrb[2].mxu0  ;;  %v440_v33 = vadd.f32 %v638_v27, %v439_v28  ;;  %480 = sbr.rel (!%p847_p6) target bundleno = 300 (0x12c), region = 77 }
 0x11d   : > { %v451_v31 = vadd.f32 %v701_v29, %v638_v27  ;;  %v442_v32 = vpop.f32.mrb[3].mxu0 }
 0x11e   : > { %v443_v34 = vadd.f32 %v638_v27, %v442_v32 }
 0x11f   : > { %v669_v35 = vpack.c.bf16 %v451_v31, %v448_v30 }
 0x120   : > { %v664_v36 = vpack.c.bf16 %v443_v34, %v440_v33 }
 0x121   : > { %671 = vst [vmem:[%s306_s23 + $0x8] sm:$0xff] %v669_v35  }
 0x122   : > { %665 = vst [vmem:[%s306_s23] sm:$0xff] %v664_v36  }
 0x128   : > { %v505_v39 = vld [vmem:[%s306_s23 + $0x8] sm:$0xf]  ;;  %v507_v40 = vld [vmem:[%s306_s23 + $0xc] sm:$0xf] }
 0x129   : > { %v501_v37 = vld [vmem:[%s306_s23] sm:$0xf]  ;;  %v503_v38 = vld [vmem:[%s306_s23 + $0x4] sm:$0xf]  ;;  %506 = vst [vmem:[%s485_s26 + $0x18] sm:$0xf] %v505_v39 }
 0x12a   : > { %502 = vst [vmem:[%s485_s26] sm:$0xf] %v501_v37  ;;  %504 = vst [vmem:[%s485_s26 + $0xc] sm:$0xf] %v503_v38 }
 0x12b   : > { %508 = vst [vmem:[%s485_s26 + $0x24] sm:$0xf] %v507_v40 }
 0x12c PF: > { %s13_s16 = sadd.s32 1, %s790_s16   ;;  %s922_s12 = smov %s778_s13 }
 0x12d   : > { %p10_p12 = scmp.ge.s32.totalorder %s13_s16, 5   ;;  %s923_s13 = smov %s852_s22 }
 0x12e   : > { %s924_s14 = smov %s786_s15  ;;  %s925_s15 = smov %s927_s17 }
 0x12f   :  { %12 = sbr.rel (!%p10_p12) target bundleno = 3 (0x3), region = 155 }

// kernel: language_model_forward.21
= control target key start
LH: loop header
LB: loop body
LE: loop exit
PB: predicated region body
PF: predicated region fallthrough
CT: control target
= control target key end

     0   :  { %s658_s21 = smov 0   ;;  %s716_s0 = inlined_call_operand.vmem [shape: bf16[32,128], index: 0, kind: input, shape index: {}]   ;;  %s717_s1 = inlined_call_operand.vmem [shape: bf16[128,128], index: 1, kind: input, shape index: {}]   ;;  %s718_s2 = inlined_call_operand.vmem [shape: f32[1,128], index: 2, kind: input, shape index: {}]   ;;  %s719_s3 = inlined_call_operand.vmem [shape: bf16[32,128], index: 3, kind: input, shape index: {}]   ;;  %s720_s4 = inlined_call_operand.vmem [shape: f32[1,128], index: 4, kind: input, shape index: {}]   ;;  %s721_s5 = inlined_call_operand.vmem [shape: f32[1,128], index: 5, kind: input, shape index: {}]   ;;  %s722_s6 = inlined_call_operand.vmem [shape: bf16[32,128], index: 6, kind: output, shape index: {}]  }
   0x1 LB: > { %s523_s22 = sadd.s32 4294967295, %s619_s21   ;;  %p527_p0 = scmp.ge.s32.totalorder %s619_s21, 1  ;;  %s619_s21 = sphi %s658_s21, %s16_s21  }
   0x2   : > { %p224_p1 = scmp.lt.s32.totalorder %s619_s21, 3 }
   0x4   : > { %p225_p2 = pnand %p527_p0, %p224_p1 }
   0x5   : > { %v600_v0 = vld [vmem:[%s717_s1] sm:$0xff] (!%p225_p2)   ;;  %v621_v1 = vmov (!%p225_p2), 0.0   ;;  %v601_v2 = vld [vmem:[%s717_s1 + $0x8] sm:$0xff] (!%p225_p2)   ;;  %vm622_vm0 = vmmov (!%p225_p2), 0   ;;  %s528_s27 = sshll.u32 (!%p225_p2), %s523_s22, 1  ;;  %v602_v3 = vld [vmem:[%s717_s1 + $0x10] sm:$0xff] (!%p225_p2)  }
   0x6   : > { %228 = sbr.rel (%p225_p2) target bundleno = 572 (0x23c), region = 44  ;;  %570 = vmatprep.subr.bf16.mxu0 (!%p225_p2), %v621_v1  ;;  %586 = vmatprep.mubr.msk.bf16.mxu0 (!%p225_p2), %vm622_vm0, %v621_v1  ;;  %p260_p3 = scmp.lt.s32.totalorder (!%p225_p2), %s528_s27, 3  ;;  %v603_v4 = vld [vmem:[%s717_s1 + $0x18] sm:$0xff] (!%p225_p2)   ;;  %v604_v5 = vld [vmem:[%s717_s1 + $0x20] sm:$0xff] (!%p225_p2)   ;;  %v605_v6 = vld [vmem:[%s717_s1 + $0x28] sm:$0xff] (!%p225_p2)  }
   0x7   : > { %571 = vmatpush3.bf16.msra.mxu0 (!%p225_p2), %v600_v0  ;;  %v606_v7 = vld [vmem:[%s717_s1 + $0x30] sm:$0xff] (!%p225_p2)   ;;  %v607_v8 = vld [vmem:[%s717_s1 + $0x38] sm:$0xff] (!%p225_p2)   ;;  %v534_v11 = vld [vmem:[%s718_s2] ss:$0 sm:$0xff] (!%p225_p2) }
   0x8   : > { %572 = vmatprep.subr.bf16.mxu0 (!%p225_p2), %v621_v1  ;;  %v544_v38 = vld [vmem:[%s720_s4] ss:$0 sm:$0xff] (!%p225_p2) }
   0x9   : > { %v545_v42 = vld [vmem:[%s721_s5] ss:$0 sm:$0xff] (!%p225_p2) }
   0xb   : > { %573 = vmatpush3.bf16.msra.mxu0 (!%p225_p2), %v601_v2 }
   0xc   : > { %574 = vmatprep.subr.bf16.mxu0 (!%p225_p2), %v621_v1 }
   0xd   : > { %s724_s27 = smov (!%p260_p3, %s528_s27), 3 }
   0xe   : > { %s675_s30 = sshll.u32 %s724_s27, 2 }
   0xf   : > { %s263_s9 = scalar_lea.vmem %s716_s0, %s675_s30  ;;  %575 = vmatpush3.bf16.msra.mxu0 %v602_v3  ;;  %s269_s23 = scalar_lea.vmem %s719_s3, %s675_s30 }
  0x10   : > { %576 = vmatprep.subr.bf16.mxu0 %v621_v1  ;;  %v608_v9 = vld [vmem:[%s263_s9] sm:$0xff]   ;;  %s275_s9 = scalar_lea.vmem %s722_s6, %s675_s30 }
  0x11   : > { %v553_v10 = vld [vmem:[%s269_s23] sm:$0xff]  }
  0x12   : > { %v554_v12 = vunpack.c.l.bf16 %v553_v10  ;;  %v555_v20 = vunpack.c.h.bf16 %v553_v10 }
  0x13   : > { %577 = vmatpush3.bf16.msra.mxu0 %v603_v4 }
  0x14   : > { %578 = vmatprep.subr.bf16.mxu0 %v621_v1 }
  0x17   : > { %579 = vmatpush3.bf16.msra.mxu0 %v604_v5 }
  0x18   : > { %580 = vmatprep.subr.bf16.mxu0 %v621_v1 }
  0x1b   : > { %581 = vmatpush3.bf16.msra.mxu0 %v605_v6 }
  0x1c   : > { %582 = vmatprep.subr.bf16.mxu0 %v621_v1 }
  0x1f   : > { %583 = vmatpush3.bf16.msra.mxu0 %v606_v7 }
  0x20   : > { %584 = vmatprep.subr.bf16.mxu0 %v621_v1 }
  0x23   : > { %585 = vmatpush3.bf16.msra.mxu0 %v607_v8 }
  0x26   : > { %587 = vmatmul.mubr.bf16.vlgmr.msra.gmra.mrb[0].mxu0 %v608_v9 }
  0xf9   : > { %v391_v13 = vpop.f32.mrb[0].mxu0 }
  0xfa   : > { %v392_v14 = vadd.f32 %v534_v11, %v391_v13  ;;  %v588_v15 = vpop.f32.mrb[1].mxu0 }
  0xfb   : > { %v394_v16 = vpop.f32.mrb[2].mxu0 }
  0xfc   : > { %v395_v17 = vadd.f32 %v534_v11, %v394_v16  ;;  %v589_v18 = vpop.f32.mrb[3].mxu0  ;;  %v402_v19 = vadd.f32 %v554_v12, %v392_v14 }
  0xfe   : > { %406 = vadd.xlane.f32.xlu0 %v402_v19  ;;  %v403_v21 = vadd.f32 %v555_v20, %v395_v17 }
 0x102   : > { %408 = vadd.xlane.f32.xlu0 %v403_v21 }
 0x18b   : > { %v407_v22 = vpop.xlane.xlu0 %406 }
 0x18c   : > { %v411_v23 = vmul.f32 0.0078125, %v407_v22 }
 0x18e   : > { %v413_v24 = vsub.f32 %v402_v19, %v411_v23 }
 0x18f   : > { %v409_v25 = vpop.xlane.xlu0 %408 }
 0x190   : > { %v412_v26 = vmul.f32 0.0078125, %v409_v25  ;;  %v415_v27 = vmul.f32 %v413_v24, %v413_v24 }
 0x192   : > { %v414_v28 = vsub.f32 %v403_v21, %v412_v26  ;;  %417 = vadd.xlane.f32.xlu1 %v415_v27 }
 0x194   : > { %v416_v29 = vmul.f32 %v414_v28, %v414_v28 }
 0x196   : > { %419 = vadd.xlane.f32.xlu1 %v416_v29 }
 0x21f   : > { %v418_v30 = vpop.xlane.xlu1 %417 }
 0x220   : > { %v421_v31 = vmul.f32 0.0078125, %v418_v30 }
 0x222   : > { %v423_v32 = vadd.f32 1e-05, %v421_v31 }
 0x223   : > { %v420_v33 = vpop.xlane.xlu1 %419 }
 0x224   : > { %609 = vrsqrt.f32 %v423_v32  ;;  %v422_v34 = vmul.f32 0.0078125, %v420_v33 }
 0x226   : > { %v424_v35 = vadd.f32 1e-05, %v422_v34 }
 0x228   : > { %611 = vrsqrt.f32 %v424_v35 }
 0x22e   : > { %v610_v36 = vpop.eup %609 }
 0x22f   : > { %v427_v37 = vmul.f32 %v610_v36, %v413_v24 }
 0x231   : > { %v435_v40 = vmul.f32 %v544_v38, %v427_v37 }
 0x232   : > { %v612_v39 = vpop.eup %611 }
 0x233   : > { %v428_v41 = vmul.f32 %v612_v39, %v414_v28  ;;  %v443_v44 = vadd.f32 %v545_v42, %v435_v40 }
 0x235   : > { %v436_v43 = vmul.f32 %v544_v38, %v428_v41 }
 0x237   : > { %v444_v45 = vadd.f32 %v545_v42, %v436_v43 }
 0x239   : > { %v559_v46 = vpack.c.bf16 %v444_v45, %v443_v44 }
 0x23b   : > { %560 = vst [vmem:[%s275_s9] sm:$0xff] %v559_v46  }
 0x23c PF: > { %s16_s21 = sadd.s32 1, %s619_s21  }
 0x23d   : > { %p13_p4 = scmp.ge.s32.totalorder %s16_s21, 4  }
 0x23f   :  { %15 = sbr.rel (!%p13_p4) target bundleno = 1 (0x1), region = 77 }

// kernel: language_model_forward.20
= control target key start
LH: loop header
LB: loop body
LE: loop exit
PB: predicated region body
PF: predicated region fallthrough
CT: control target
= control target key end

     0   :  { %s1339_s12 = smov 0   ;;  %s1341_s13 = smov 0   ;;  %s1512_s0 = inlined_call_operand.vmem [shape: bf16[32,384], index: 0, kind: input, shape index: {}, may-alias: {0,1,2}]   ;;  %s1513_s1 = inlined_call_operand.vmem [shape: bf16[32,384], index: 1, kind: input, shape index: {}, may-alias: {0,1,2}]   ;;  %s1514_s2 = inlined_call_operand.vmem [shape: bf16[32,384], index: 2, kind: input, shape index: {}, may-alias: {0,1,2}]   ;;  %s1515_s3 = inlined_call_operand.vmem [shape: bf16[32,128], index: 3, kind: output, shape index: {}]  }
   0x1   :  { %s1343_s14 = smov 0   ;;  %s1345_s15 = smov 0  }
   0x2   :  { %s1347_s16 = smov 0  }
   0x3 LB: > { %s25_s17 = sadd.s32 1, %s1308_s15  ;;  %p41_p1 = scmp.ne.s32.totalorder %s1300_s13, %s1296_s12  ;;  %s1312_s16 = sphi %s1347_s16, %s13_s16   ;;  %s1308_s15 = sphi %s1345_s15, %s1520_s15   ;;  %s1304_s14 = sphi %s1343_s14, %s1519_s14   ;;  %s1300_s13 = sphi %s1341_s13, %s1518_s13   ;;  %s1296_s12 = sphi %s1339_s12, %s1517_s12  }
   0x4   : > { %p27_p0 = scmp.ge.s32.totalorder %s25_s17, 2  ;;  %p42_p2 = scmp.eq.s32.totalorder %s1312_s16, 0 }
   0x5   : > { %s34_s20 = sadd.s32 1, %s1300_s13  ;;  %p1082_p5 = scmp.ge.s32.totalorder %s1312_s16, 2 }
   0x6   : > { %s1522_s17 = smov (%p27_p0, %s25_s17), 0  ;;  %p1370_p3 = por %p42_p2, %p41_p1 }
   0x7   : > { %s29_s19 = ssub.s32 %s1308_s15, %s1522_s17  ;;  %155 = sbr.rel (%p1082_p5) target bundleno = 35 (0x23), region = 16 }
   0x8   : > { %p32_p4 = scmp.eq.s32.totalorder %s29_s19, 0 }
   0xa   : > { %s1378_s21 = scalar_select %p32_p4, %s1300_s13, %s34_s20  }
   0xe   : > { %158 = sbr.rel (!%p1370_p3) target bundleno = 21 (0x15), region = 20  ;;  %s160_s22 = sand.u32 (%p1370_p3), 1, %s1300_s13  }
   0xf   : > { %s1194_s23 = smul.u32 (%p1370_p3), 24, %s1308_s15  ;;  %s1083_s24 = sshll.u32 (%p1370_p3), %s160_s22, 3 }
  0x10   : > { %s162_s28 = scalar_lea.vmem (%p1370_p3), [#allocation2], %s1083_s24 }
  0x11   : > { %s167_s27 = scalar_lea.vmem (%p1370_p3), %s1512_s0, %s1194_s23 }
  0x12   : > { %v183_v0 = vld [vmem:[%s167_s27] sm:$0xf] (%p1370_p3)  ;;  %v185_v1 = vld [vmem:[%s167_s27 + $0xc] sm:$0xf] (%p1370_p3) }
  0x13   : > { %184 = vst [vmem:[%s162_s28] sm:$0xf] (%p1370_p3), %v183_v0  ;;  %186 = vst [vmem:[%s162_s28 + $0x4] sm:$0xf] (%p1370_p3), %v185_v1 }
  0x15 PF: > { %213 = sbr.rel (!%p1370_p3) target bundleno = 28 (0x1c), region = 61  ;;  %s215_s29 = sand.u32 (%p1370_p3), 1, %s1300_s13  }
  0x16   : > { %s1088_s30 = smul.u32 (%p1370_p3), 24, %s1308_s15  ;;  %s1087_s4 = sshll.u32 (%p1370_p3), %s215_s29, 3 }
  0x17   : > { %s217_s8 = scalar_lea.vmem (%p1370_p3), [#allocation3], %s1087_s4 }
  0x18   : > { %s993_s7 = scalar_lea.vmem (%p1370_p3), %s1513_s1, %s1088_s30 }
  0x19   : > { %v1089_v2 = vld [vmem:[%s993_s7 + $0x4] sm:$0xf] (%p1370_p3)  ;;  %v1090_v3 = vld [vmem:[%s993_s7 + $0x10] sm:$0xf] (%p1370_p3) }
  0x1a   : > { %240 = vst [vmem:[%s217_s8] sm:$0xf] (%p1370_p3), %v1089_v2  ;;  %242 = vst [vmem:[%s217_s8 + $0x4] sm:$0xf] (%p1370_p3), %v1090_v3 }
  0x1c PF: > { %269 = sbr.rel (!%p1370_p3) target bundleno = 35 (0x23), region = 102  ;;  %s271_s9 = sand.u32 (%p1370_p3), 1, %s1300_s13  }
  0x1d   : > { %s1092_s10 = smul.u32 (%p1370_p3), 24, %s1308_s15  ;;  %s1091_s11 = sshll.u32 (%p1370_p3), %s271_s9, 3 }
  0x1e   : > { %s273_s23 = scalar_lea.vmem (%p1370_p3), [#allocation4], %s1091_s11 }
  0x1f   : > { %s1000_s22 = scalar_lea.vmem (%p1370_p3), %s1514_s2, %s1092_s10 }
  0x20   : > { %v1093_v4 = vld [vmem:[%s1000_s22 + $0x8] sm:$0xf] (%p1370_p3)  ;;  %v1094_v5 = vld [vmem:[%s1000_s22 + $0x14] sm:$0xf] (%p1370_p3) }
  0x21   : > { %296 = vst [vmem:[%s273_s23] sm:$0xf] (%p1370_p3), %v1093_v4  ;;  %298 = vst [vmem:[%s273_s23 + $0x4] sm:$0xf] (%p1370_p3), %v1094_v5 }
  0x23 PF: > { %p1095_p6 = scmp.ge.s32.totalorder %s1312_s16, 1  ;;  %p324_p7 = scmp.lt.s32.totalorder %s1312_s16, 3 }
  0x25   : > { %p325_p8 = pnand %p1095_p6, %p324_p7 }
  0x26   : > { %s331_s18 = sand.u32 (!%p325_p8), 1, %s1296_s12   ;;  %v1314_v6 = vmov (!%p325_p8), 0.0   ;;  %vm1315_vm0 = vmmov (!%p325_p8), 0   ;;  %vm413_vm1 = vcmask (!%p325_p8), 261120   ;;  %vm461_vm2 = vcmask (!%p325_p8), 130048   ;;  %s1316_s26 = smov (!%p325_p8), 96  }
  0x27   : > { %328 = sbr.rel (%p325_p8) target bundleno = 1515 (0x5eb), region = 143  ;;  %1146 = vmatprep.subr.bf16.mxu0 (!%p325_p8), %v1314_v6  ;;  %s1406_s24 = sshll.u32 (!%p325_p8), %s331_s18, 3  ;;  %1148 = vmatprep.mubr.msk.bf16.mxu0 (!%p325_p8), %vm1315_vm0, %v1314_v6  ;;  %vm543_vm3 = vcmask (!%p325_p8), 257024   ;;  %vm679_vm4 = vcmask (!%p325_p8), 519424   ;;  %vm815_vm5 = vcmask (!%p325_p8), 781824   ;;  %vm951_vm6 = vcmask (!%p325_p8), 1044224  }
  0x28   : > { %1152 = vmatprep.subr.bf16.mxu1 (!%p325_p8), %v1314_v6  ;;  %1154 = vmatprep.mubr.msk.bf16.mxu1 (!%p325_p8), %vm1315_vm0, %v1314_v6  ;;  %s340_s25 = scalar_lea.vmem (!%p325_p8), [#allocation3], %s1406_s24  ;;  %s333_s12 = scalar_lea.vmem (!%p325_p8), [#allocation2], %s1406_s24 }
  0x29   : > { %v1240_v7 = vld [vmem:[%s340_s25] sm:$0xff] (!%p325_p8)   ;;  %v395_v8 = vld [vmem:[%s333_s12] sm:$0xf] (!%p325_p8)  ;;  %v396_v9 = vld [vmem:[%s333_s12 + $0x4] sm:$0xf] (!%p325_p8)  ;;  %s1317_s27 = smov (!%p325_p8), 32  }
  0x2a   : > { %v418_v10 = vsel (!%p325_p8), %vm413_vm1, %v1240_v7, 0  ;;  %v397_v11 = vmul.bf16 (!%p325_p8), 1043676725, %v395_v8  ;;  %v398_v12 = vmul.bf16 (!%p325_p8), 1043676725, %v396_v9  ;;  %s347_s28 = scalar_lea.vmem (!%p325_p8), [#allocation4], %s1406_s24 }
  0x2b   : > { %1147 = vmatpush3.bf16.xpose.msra.mxu0 (!%p325_p8), %v418_v10  ;;  %v1427_v30 = vld [vmem:[%s347_s28] sm:$0xff] (!%p325_p8)   ;;  %s1318_s29 = smov (!%p325_p8), 64   ;;  %s1099_s30 = sshll.u32 (!%p325_p8), %s1304_s14, 1 }
  0x2c   : > { %1164 = vmatprep.subr.bf16.mxu0 (!%p325_p8), %v1314_v6  ;;  %v1101_v13 = vcombine.low (!%p325_p8), %v397_v11, %v398_v12  ;;  %1153 = vmatpush3.bf16.msra.mxu1 (!%p325_p8), %v1427_v30  ;;  %p385_p9 = scmp.lt.s32.totalorder (!%p325_p8), %s1099_s30, 3 }
  0x2d   : > { %1158 = vmatprep.subr.bf16.mxu1 (!%p325_p8), %v1314_v6 }
  0x2e   : > { %s1524_s30 = smov (!%p385_p9, %s1099_s30), 3 }
  0x2f   : > { %s1100_s4 = sshll.u32 %s1524_s30, 2 }
  0x30   : > { %s1454_s7 = scalar_lea.vmem %s1515_s3, %s1100_s4 }
  0x32   : > { %1149 = vmatmul.mubr.msk.bf16.vlgmr.msra.gmra.mrb[0].mxu0 %vm413_vm1, %v1101_v13 }
  0x33   : > { %1166 = vmatprep.mubr.msk.bf16.mxu0 %vm1315_vm0, %v1314_v6 }
 0x105   : > { %v454_v14 = vpop.f32.mrb[0].mxu0 }
 0x106   : > { %v1150_v15 = vpop.f32.mrb[1].mxu0  ;;  %v462_v16 = vsel %vm461_vm2, %v454_v14, -inf }
 0x107   : > { %463 = vmax.xlane.f32.xlu0 %v462_v16  ;;  %v457_v17 = vpop.f32.mrb[2].mxu0 }
 0x108   : > { %v1151_v18 = vpop.f32.mrb[3].mxu0  ;;  %v465_v19 = vsel %vm461_vm2, %v457_v17, -inf }
 0x10b   : > { %466 = vmax.xlane.f32.xlu0 %v465_v19 }
 0x121   : > { %548 = vrot.lane.b32.xlu0 %v1240_v7, %s1316_s26 }
 0x125   : > { %820 = vrot.lane.b32.xlu0 %v1240_v7, %s1317_s27 }
 0x194   : > { %v464_v20 = vpop.xlane.xlu0 %463 }
 0x195   : > { %v468_v21 = vsub.f32 %v454_v14, %v464_v20 }
 0x197   : > { %v470_v22 = vmul.f32 1.442695, %v468_v21 }
 0x198   : > { %v467_v23 = vpop.xlane.xlu0 %466 }
 0x199   : > { %1242 = vpow2.f32 %v470_v22  ;;  %v469_v24 = vsub.f32 %v457_v17, %v467_v23 }
 0x19b   : > { %v472_v25 = vmul.f32 1.442695, %v469_v24 }
 0x19c   : > { %v549_v35 = vpop.permute.xlu0 %548 }
 0x19d   : > { %1244 = vpow2.f32 %v472_v25  ;;  %v554_v39 = vsel %vm413_vm1, %v549_v35, 0 }
 0x1a0   : > { %v821_v43 = vpop.permute.xlu0 %820 }
 0x1a1   : > { %v826_v45 = vsel %vm413_vm1, %v821_v43, 0 }
 0x1a3   : > { %v1243_v26 = vpop.eup %1242 }
 0x1a4   : > { %v474_v27 = vsel %vm461_vm2, %v1243_v26, 0.0 }
 0x1a5   : > { %475 = vadd.xlane.f32.xlu1 %v474_v27 }
 0x1a7   : > { %v1245_v28 = vpop.eup %1244 }
 0x1a8   : > { %v477_v29 = vsel %vm461_vm2, %v1245_v28, 0.0 }
 0x1a9   : > { %478 = vadd.xlane.f32.xlu1 %v477_v29 }
 0x1ba   : > { %546 = vrot.lane.b32.xlu1 %v1101_v13, %s1316_s26 }
 0x1be   : > { %684 = vrot.lane.b32.xlu1 %v1240_v7, %s1318_s29 }
 0x1c2   : > { %682 = vrot.lane.b32.xlu1 %v1101_v13, %s1318_s29 }
 0x1c6   : > { %818 = vrot.lane.b32.xlu1 %v1101_v13, %s1317_s27 }
 0x232   : > { %v476_v31 = vpop.xlane.xlu1 %475 }
 0x233   : > { %1246 = vrcp.f32 %v476_v31 }
 0x236   : > { %v479_v32 = vpop.xlane.xlu1 %478 }
 0x237   : > { %1248 = vrcp.f32 %v479_v32 }
 0x23a   : > { %v547_v38 = vpop.permute.xlu1 %546 }
 0x23d   : > { %v1247_v33 = vpop.eup %1246 }
 0x23e   : > { %v482_v36 = vmul.f32 %v1247_v33, %v1243_v26  ;;  %v685_v41 = vpop.permute.xlu1 %684 }
 0x23f   : > { %v690_v42 = vsel %vm413_vm1, %v685_v41, 0 }
 0x241   : > { %v1249_v34 = vpop.eup %1248 }
 0x242   : > { %v483_v37 = vmul.f32 %v1249_v34, %v1245_v28  ;;  %v683_v44 = vpop.permute.xlu1 %682 }
 0x244   : > { %v484_v40 = vpack.c.bf16 %v483_v37, %v482_v36 }
 0x246   : > { %1155 = vmatmul.mubr.msk.bf16.vlgmr.msra.gmra.mrb[0].mxu1 %vm461_vm2, %v484_v40  ;;  %v819_v46 = vpop.permute.xlu1 %818 }
 0x247   : > { %1159 = vmatpush3.bf16.xpose.msra.mxu1 %v554_v39  ;;  %1160 = vmatprep.mubr.msk.bf16.mxu1 %vm1315_vm0, %v1314_v6 }
 0x248   : > { %1170 = vmatprep.subr.bf16.mxu1 %v1314_v6 }
 0x24e   : > { %1161 = vmatmul.mubr.msk.bf16.vlgmr.msra.gmra.mrb[4].mxu1 %vm413_vm1, %v547_v38 }
 0x24f   : > { %1171 = vmatpush3.bf16.xpose.msra.mxu1 %v690_v42  ;;  %1172 = vmatprep.mubr.msk.bf16.mxu1 %vm1315_vm0, %v1314_v6 }
 0x250   : > { %1182 = vmatprep.subr.bf16.mxu1 %v1314_v6 }
 0x256   : > { %1173 = vmatmul.mubr.msk.bf16.vlgmr.msra.gmra.mrb[8].mxu1 %vm413_vm1, %v683_v44 }
 0x257   : > { %1183 = vmatpush3.bf16.xpose.msra.mxu1 %v826_v45  ;;  %1184 = vmatprep.mubr.msk.bf16.mxu1 %vm1315_vm0, %v1314_v6 }
 0x25e   : > { %1185 = vmatmul.mubr.msk.bf16.vlgmr.msra.gmra.mrb[12].mxu1 %vm413_vm1, %v819_v46 }
 0x319   : > { %v528_v47 = vpop.f32.mrb[0].mxu1 }
 0x31a   : > { %v1122_v48 = vpack.c.bf16 %v528_v47, %v528_v47  ;;  %v1156_v49 = vpop.f32.mrb[1].mxu1 }
 0x31b   : > { %v531_v50 = vpop.f32.mrb[2].mxu1 }
 0x31c   : > { %544 = vst.msk [vmem:[%s1454_s7] sm:$0xf] %vm543_vm3, %v1122_v48  ;;  %v1123_v51 = vpack.c.bf16 %v531_v50, %v531_v50  ;;  %v1157_v52 = vpop.f32.mrb[3].mxu1 }
 0x31e   : > { %545 = vst.msk [vmem:[%s1454_s7 + $0x4] sm:$0xf] %vm543_vm3, %v1123_v51 }
 0x321   : > { %v590_v53 = vpop.f32.mrb[4].mxu1 }
 0x322   : > { %v1162_v54 = vpop.f32.mrb[5].mxu1  ;;  %v597_v55 = vsel %vm461_vm2, %v590_v53, -inf }
 0x323   : > { %598 = vmax.xlane.f32.xlu0 %v597_v55  ;;  %v593_v56 = vpop.f32.mrb[6].mxu1 }
 0x324   : > { %v1163_v57 = vpop.f32.mrb[7].mxu1  ;;  %v600_v58 = vsel %vm461_vm2, %v593_v56, -inf }
 0x325   : > { %601 = vmax.xlane.f32.xlu1 %v600_v58 }
 0x329   : > { %v726_v59 = vpop.f32.mrb[8].mxu1 }
 0x32a   : > { %v1174_v60 = vpop.f32.mrb[9].mxu1  ;;  %v733_v61 = vsel %vm461_vm2, %v726_v59, -inf }
 0x32b   : > { %734 = vmax.xlane.f32.xlu0 %v733_v61  ;;  %v729_v62 = vpop.f32.mrb[10].mxu1 }
 0x32c   : > { %v1175_v63 = vpop.f32.mrb[11].mxu1  ;;  %v736_v0 = vsel %vm461_vm2, %v729_v62, -inf }
 0x32f   : > { %737 = vmax.xlane.f32.xlu0 %v736_v0 }
 0x331   : > { %v862_v1 = vpop.f32.mrb[12].mxu1 }
 0x332   : > { %v1186_v2 = vpop.f32.mrb[13].mxu1  ;;  %v869_v3 = vsel %vm461_vm2, %v862_v1, -inf }
 0x333   : > { %870 = vmax.xlane.f32.xlu0 %v869_v3  ;;  %v865_v4 = vpop.f32.mrb[14].mxu1 }
 0x334   : > { %v872_v5 = vsel %vm461_vm2, %v865_v4, -inf  ;;  %v1187_v7 = vpop.f32.mrb[15].mxu1 }
 0x335   : > { %873 = vmax.xlane.f32.xlu1 %v872_v5 }
 0x3b0   : > { %v599_v8 = vpop.xlane.xlu0 %598 }
 0x3b1   : > { %v603_v9 = vsub.f32 %v590_v53, %v599_v8 }
 0x3b2   : > { %v602_v10 = vpop.xlane.xlu1 %601 }
 0x3b3   : > { %v605_v11 = vmul.f32 1.442695, %v603_v9  ;;  %v604_v12 = vsub.f32 %v593_v56, %v602_v10 }
 0x3b5   : > { %1250 = vpow2.f32 %v605_v11  ;;  %v607_v13 = vmul.f32 1.442695, %v604_v12 }
 0x3b7   : > { %1252 = vpow2.f32 %v607_v13 }
 0x3b8   : > { %v735_v14 = vpop.xlane.xlu0 %734 }
 0x3b9   : > { %v739_v15 = vsub.f32 %v726_v59, %v735_v14 }
 0x3bb   : > { %v741_v16 = vmul.f32 1.442695, %v739_v15 }
 0x3bc   : > { %v738_v17 = vpop.xlane.xlu0 %737 }
 0x3bd   : > { %1254 = vpow2.f32 %v741_v16  ;;  %v740_v18 = vsub.f32 %v729_v62, %v738_v17 }
 0x3bf   : > { %v1251_v19 = vpop.eup %1250  ;;  %v743_v20 = vmul.f32 1.442695, %v740_v18 }
 0x3c0   : > { %v871_v21 = vpop.xlane.xlu0 %870  ;;  %v609_v22 = vsel %vm461_vm2, %v1251_v19, 0.0 }
 0x3c1   : > { %v1253_v23 = vpop.eup %1252  ;;  %1256 = vpow2.f32 %v743_v20  ;;  %v875_v24 = vsub.f32 %v862_v1, %v871_v21  ;;  %610 = vadd.xlane.f32.xlu0 %v609_v22 }
 0x3c2   : > { %v612_v25 = vsel %vm461_vm2, %v1253_v23, 0.0  ;;  %v874_v34 = vpop.xlane.xlu1 %873 }
 0x3c3   : > { %v877_v26 = vmul.f32 1.442695, %v875_v24  ;;  %613 = vadd.xlane.f32.xlu1 %v612_v25  ;;  %v876_v35 = vsub.f32 %v865_v4, %v874_v34 }
 0x3c5   : > { %1258 = vpow2.f32 %v877_v26  ;;  %v879_v36 = vmul.f32 1.442695, %v876_v35 }
 0x3c7   : > { %v1255_v27 = vpop.eup %1254  ;;  %1260 = vpow2.f32 %v879_v36 }
 0x3c8   : > { %v745_v28 = vsel %vm461_vm2, %v1255_v27, 0.0 }
 0x3c9   : > { %746 = vadd.xlane.f32.xlu0 %v745_v28 }
 0x3cb   : > { %v1257_v29 = vpop.eup %1256 }
 0x3cc   : > { %v748_v31 = vsel %vm461_vm2, %v1257_v29, 0.0 }
 0x3cd   : > { %749 = vadd.xlane.f32.xlu1 %v748_v31 }
 0x3cf   : > { %v1259_v32 = vpop.eup %1258 }
 0x3d0   : > { %v881_v33 = vsel %vm461_vm2, %v1259_v32, 0.0 }
 0x3d1   : > { %882 = vadd.xlane.f32.xlu0 %v881_v33  ;;  %v1261_v37 = vpop.eup %1260 }
 0x3d2   : > { %v884_v38 = vsel %vm461_vm2, %v1261_v37, 0.0 }
 0x3de   : > { %756 = vrot.lane.b32.xlu1 %v1427_v30, %s1318_s29 }
 0x3e7   : > { %620 = vrot.lane.b32.xlu0 %v1427_v30, %s1316_s26 }
 0x402   : > { %885 = vadd.xlane.f32.xlu1 %v884_v38 }
 0x413   : > { %892 = vrot.lane.b32.xlu1 %v1427_v30, %s1317_s27 }
 0x44e   : > { %v611_v40 = vpop.xlane.xlu0 %610 }
 0x450   : > { %v614_v39 = vpop.xlane.xlu1 %613 }
 0x451   : > { %1262 = vrcp.f32 %v614_v39 }
 0x452   : > { %1264 = vrcp.f32 %v611_v40 }
 0x456   : > { %v747_v41 = vpop.xlane.xlu0 %746 }
 0x45a   : > { %v750_v42 = vpop.xlane.xlu1 %749 }
 0x45b   : > { %1266 = vrcp.f32 %v750_v42  ;;  %v1263_v43 = vpop.eup %1262 }
 0x45c   : > { %1268 = vrcp.f32 %v747_v41  ;;  %v1265_v45 = vpop.eup %1264  ;;  %v618_v46 = vmul.f32 %v1263_v43, %v1253_v23 }
 0x45d   : > { %v617_v47 = vmul.f32 %v1265_v45, %v1251_v19 }
 0x45e   : > { %v883_v44 = vpop.xlane.xlu0 %882  ;;  %v757_v30 = vpop.permute.xlu1 %756 }
 0x45f   : > { %v619_v49 = vpack.c.bf16 %v618_v46, %v617_v47  ;;  %1270 = vrcp.f32 %v883_v44 }
 0x462   : > { %v621_v48 = vpop.permute.xlu0 %620 }
 0x463   : > { %1165 = vmatpush3.bf16.msra.mxu0 %v621_v48 }
 0x464   : > { %1176 = vmatprep.subr.bf16.mxu0 %v1314_v6 }
 0x465   : > { %v1267_v50 = vpop.eup %1266 }
 0x466   : > { %1167 = vmatmul.mubr.msk.bf16.vlgmr.msra.gmra.mrb[4].mxu0 %vm461_vm2, %v619_v49  ;;  %v1269_v51 = vpop.eup %1268  ;;  %v754_v52 = vmul.f32 %v1267_v50, %v1257_v29 }
 0x467   : > { %1177 = vmatpush3.bf16.msra.mxu0 %v757_v30  ;;  %1178 = vmatprep.mubr.msk.bf16.mxu0 %vm1315_vm0, %v1314_v6  ;;  %v753_v53 = vmul.f32 %v1269_v51, %v1255_v27 }
 0x468   : > { %1188 = vmatprep.subr.bf16.mxu0 %v1314_v6 }
 0x469   : > { %v755_v54 = vpack.c.bf16 %v754_v52, %v753_v53  ;;  %v1271_v57 = vpop.eup %1270 }
 0x46a   : > { %v889_v59 = vmul.f32 %v1271_v57, %v1259_v32 }
 0x46e   : > { %1179 = vmatmul.mubr.msk.bf16.vlgmr.msra.gmra.mrb[8].mxu0 %vm461_vm2, %v755_v54 }
 0x46f   : > { %1190 = vmatprep.mubr.msk.bf16.mxu0 %vm1315_vm0, %v1314_v6 }
 0x48f   : > { %v886_v55 = vpop.xlane.xlu1 %885 }
 0x490   : > { %1272 = vrcp.f32 %v886_v55 }
 0x493   : > { %v893_v56 = vpop.permute.xlu1 %892 }
 0x494   : > { %1189 = vmatpush3.bf16.msra.mxu0 %v893_v56 }
 0x49a   : > { %v1273_v58 = vpop.eup %1272 }
 0x49b   : > { %v890_v60 = vmul.f32 %v1273_v58, %v1261_v37 }
 0x49d   : > { %v891_v61 = vpack.c.bf16 %v890_v60, %v889_v59 }
 0x49f   : > { %1191 = vmatmul.mubr.msk.bf16.vlgmr.msra.gmra.mrb[12].mxu0 %vm461_vm2, %v891_v61 }
 0x539   : > { %v660_v62 = vpop.f32.mrb[4].mxu0 }
 0x53a   : > { %v1124_v63 = vpack.c.bf16 %v660_v62, %v660_v62  ;;  %v1168_v0 = vpop.f32.mrb[5].mxu0 }
 0x53b   : > { %v663_v1 = vpop.f32.mrb[6].mxu0 }
 0x53c   : > { %v1125_v2 = vpack.c.bf16 %v663_v1, %v663_v1  ;;  %673 = vrot.lane.b32.xlu1 %v1124_v63, %s1317_s27  ;;  %v1169_v6 = vpop.f32.mrb[7].mxu0 }
 0x53e   : > { %675 = vrot.lane.b32.xlu0 %v1125_v2, %s1317_s27 }
 0x541   : > { %v796_v3 = vpop.f32.mrb[8].mxu0 }
 0x542   : > { %v1126_v4 = vpack.c.bf16 %v796_v3, %v796_v3  ;;  %v1180_v5 = vpop.f32.mrb[9].mxu0 }
 0x543   : > { %v799_v7 = vpop.f32.mrb[10].mxu0 }
 0x544   : > { %v1127_v8 = vpack.c.bf16 %v799_v7, %v799_v7  ;;  %809 = vrot.lane.b32.xlu1 %v1126_v4, %s1318_s29  ;;  %v1181_v9 = vpop.f32.mrb[11].mxu0 }
 0x546   : > { %811 = vrot.lane.b32.xlu0 %v1127_v8, %s1318_s29 }
 0x572   : > { %v932_v10 = vpop.f32.mrb[12].mxu0 }
 0x573   : > { %v1128_v11 = vpack.c.bf16 %v932_v10, %v932_v10  ;;  %v1192_v12 = vpop.f32.mrb[13].mxu0 }
 0x574   : > { %v935_v13 = vpop.f32.mrb[14].mxu0 }
 0x575   : > { %v1129_v14 = vpack.c.bf16 %v935_v13, %v935_v13  ;;  %945 = vrot.lane.b32.xlu1 %v1128_v11, %s1316_s26  ;;  %v1193_v15 = vpop.f32.mrb[15].mxu0 }
 0x577   : > { %947 = vrot.lane.b32.xlu0 %v1129_v14, %s1316_s26 }
 0x5ae   : > { %v674_v16 = vpop.permute.xlu1 %673 }
 0x5af   : > { %680 = vst.msk [vmem:[%s1454_s7] sm:$0xf] %vm679_vm4, %v674_v16 }
 0x5b0   : > { %v676_v17 = vpop.permute.xlu0 %675 }
 0x5b1   : > { %681 = vst.msk [vmem:[%s1454_s7 + $0x4] sm:$0xf] %vm679_vm4, %v676_v17 }
 0x5b6   : > { %v810_v18 = vpop.permute.xlu1 %809 }
 0x5b7   : > { %816 = vst.msk [vmem:[%s1454_s7] sm:$0xf] %vm815_vm5, %v810_v18 }
 0x5b8   : > { %v812_v19 = vpop.permute.xlu0 %811 }
 0x5b9   : > { %817 = vst.msk [vmem:[%s1454_s7 + $0x4] sm:$0xf] %vm815_vm5, %v812_v19 }
 0x5e7   : > { %v946_v20 = vpop.permute.xlu1 %945 }
 0x5e8   : > { %952 = vst.msk [vmem:[%s1454_s7] sm:$0xf] %vm951_vm6, %v946_v20 }
 0x5e9   : > { %v948_v21 = vpop.permute.xlu0 %947 }
 0x5ea   : > { %953 = vst.msk [vmem:[%s1454_s7 + $0x4] sm:$0xf] %vm951_vm6, %v948_v21 }
 0x5eb PF: > { %s13_s16 = sadd.s32 1, %s1312_s16   ;;  %s1517_s12 = smov %s1300_s13 }
 0x5ec   : > { %p10_p10 = scmp.ge.s32.totalorder %s13_s16, 4   ;;  %s1518_s13 = smov %s1378_s21 }
 0x5ed   : > { %s1519_s14 = smov %s1308_s15  ;;  %s1520_s15 = smov %s1522_s17 }
 0x5ee   :  { %12 = sbr.rel (!%p10_p10) target bundleno = 3 (0x3), region = 206 }

// kernel: language_model_forward.23
= control target key start
LH: loop header
LB: loop body
LE: loop exit
PB: predicated region body
PF: predicated region fallthrough
CT: control target
= control target key end

     0   :  { %s812_s12 = smov 0   ;;  %s814_s13 = smov 0   ;;  %s917_s0 = inlined_call_operand.vmem [shape: bf16[32,128], index: 0, kind: input, shape index: {}]   ;;  %s918_s1 = inlined_call_operand.vmem [shape: bf16[128,256], index: 1, kind: input, shape index: {}]   ;;  %s919_s2 = inlined_call_operand.vmem [shape: f32[1,256], index: 2, kind: input, shape index: {}]   ;;  %s920_s3 = inlined_call_operand.vmem [shape: bf16[32,256], index: 3, kind: output, shape index: {}]  }
   0x1   :  { %s816_s14 = smov 0   ;;  %s818_s15 = smov 0  }
   0x2   :  { %s820_s16 = smov 0  }
   0x3 LB: > { %s22_s17 = sadd.s32 1, %s786_s15  ;;  %s628_s18 = sadd.s32 4294967295, %s790_s16   ;;  %s790_s16 = sphi %s820_s16, %s13_s16   ;;  %s786_s15 = sphi %s818_s15, %s925_s15   ;;  %s782_s14 = sphi %s816_s14, %s924_s14   ;;  %s778_s13 = sphi %s814_s13, %s923_s13   ;;  %s774_s12 = sphi %s812_s12, %s922_s12  }
   0x4   : > { %p23_p0 = scmp.ge.s32.totalorder %s22_s17, 2  ;;  %p65_p1 = scmp.ne.s32.totalorder %s778_s13, %s774_s12 }
   0x5   : > { %p66_p2 = scmp.eq.s32.totalorder %s790_s16, 0  ;;  %p123_p4 = scmp.eq.s32.totalorder %s628_s18, 1 }
   0x6   : > { %s927_s17 = smov (%p23_p0, %s22_s17), 0  ;;  %s58_s20 = sadd.s32 1, %s778_s13 }
   0x7   : > { %p67_p3 = por %p66_p2, %p65_p1  ;;  %s55_s19 = ssub.s32 %s786_s15, %s927_s17 }
   0x8   : > { %p56_p5 = scmp.eq.s32.totalorder %s55_s19, 0  ;;  %p847_p6 = por %p123_p4, %p65_p1 }
   0x9   : > { %p632_p7 = scmp.ge.s32.totalorder %s790_s16, 2 }
   0xa   : > { %s852_s22 = scalar_select %p56_p5, %s778_s13, %s58_s20  }
   0xb   : > { %154 = sbr.rel (%p632_p7) target bundleno = 32 (0x20), region = 20 }
  0x12   : > { %157 = sbr.rel (!%p67_p3) target bundleno = 32 (0x20), region = 24  ;;  %s159_s23 = sand.u32 (%p67_p3), 1, %s778_s13  }
  0x13   : > { %s634_s24 = sshll.u32 (%p67_p3), %s786_s15, 2  ;;  %s633_s25 = sshll.u32 (%p67_p3), %s159_s23, 6 }
  0x14   : > { %s860_s28 = scalar_lea.vmem (%p67_p3), %s918_s1, %s634_s24  ;;  %s161_s29 = scalar_lea.vmem (%p67_p3), [#allocation2], %s633_s25 }
  0x15   : > { %v179_v0 = vld [vmem:[%s860_s28] sm:$0xf] (%p67_p3)  ;;  %v181_v1 = vld [vmem:[%s860_s28 + $0x8] sm:$0xf] (%p67_p3)  ;;  %v183_v2 = vld [vmem:[%s860_s28 + $0x10] sm:$0xf] (%p67_p3) }
  0x16   : > { %180 = vst [vmem:[%s161_s29] sm:$0xf] (%p67_p3), %v179_v0  ;;  %182 = vst [vmem:[%s161_s29 + $0x4] sm:$0xf] (%p67_p3), %v181_v1  ;;  %v185_v3 = vld [vmem:[%s860_s28 + $0x18] sm:$0xf] (%p67_p3) }
  0x17   : > { %v187_v4 = vld [vmem:[%s860_s28 + $0x20] sm:$0xf] (%p67_p3)  ;;  %184 = vst [vmem:[%s161_s29 + $0x8] sm:$0xf] (%p67_p3), %v183_v2  ;;  %186 = vst [vmem:[%s161_s29 + $0xc] sm:$0xf] (%p67_p3), %v185_v3 }
  0x18   : > { %188 = vst [vmem:[%s161_s29 + $0x10] sm:$0xf] (%p67_p3), %v187_v4  ;;  %v189_v5 = vld [vmem:[%s860_s28 + $0x28] sm:$0xf] (%p67_p3)  ;;  %v191_v6 = vld [vmem:[%s860_s28 + $0x30] sm:$0xf] (%p67_p3) }
  0x19   : > { %v193_v7 = vld [vmem:[%s860_s28 + $0x38] sm:$0xf]  ;;  %190 = vst [vmem:[%s161_s29 + $0x14] sm:$0xf] %v189_v5  ;;  %192 = vst [vmem:[%s161_s29 + $0x18] sm:$0xf] %v191_v6 }
  0x1a   : > { %194 = vst [vmem:[%s161_s29 + $0x1c] sm:$0xf] %v193_v7  ;;  %v195_v8 = vld [vmem:[%s860_s28 + $0x40] sm:$0xf]  ;;  %v197_v9 = vld [vmem:[%s860_s28 + $0x48] sm:$0xf] }
  0x1b   : > { %v199_v10 = vld [vmem:[%s860_s28 + $0x50] sm:$0xf]  ;;  %196 = vst [vmem:[%s161_s29 + $0x20] sm:$0xf] %v195_v8  ;;  %198 = vst [vmem:[%s161_s29 + $0x24] sm:$0xf] %v197_v9 }
  0x1c   : > { %200 = vst [vmem:[%s161_s29 + $0x28] sm:$0xf] %v199_v10  ;;  %v201_v11 = vld [vmem:[%s860_s28 + $0x58] sm:$0xf]  ;;  %v203_v12 = vld [vmem:[%s860_s28 + $0x60] sm:$0xf] }
  0x1d   : > { %v205_v13 = vld [vmem:[%s860_s28 + $0x68] sm:$0xf]  ;;  %202 = vst [vmem:[%s161_s29 + $0x2c] sm:$0xf] %v201_v11  ;;  %204 = vst [vmem:[%s161_s29 + $0x30] sm:$0xf] %v203_v12 }
  0x1e   : > { %206 = vst [vmem:[%s161_s29 + $0x34] sm:$0xf] %v205_v13  ;;  %v207_v14 = vld [vmem:[%s860_s28 + $0x70] sm:$0xf]  ;;  %v209_v15 = vld [vmem:[%s860_s28 + $0x78] sm:$0xf] }
  0x1f   : > { %208 = vst [vmem:[%s161_s29 + $0x38] sm:$0xf] %v207_v14  ;;  %210 = vst [vmem:[%s161_s29 + $0x3c] sm:$0xf] %v209_v15 }
  0x20 PF: > { %p635_p8 = scmp.ge.s32.totalorder %s790_s16, 1  ;;  %p270_p9 = scmp.lt.s32.totalorder %s790_s16, 3 }
  0x22   : > { %p271_p10 = pnand %p635_p8, %p270_p9 }
  0x23   : > { %s277_s30 = sand.u32 (!%p271_p10), 1, %s774_s12   ;;  %v750_v16 = vld [vmem:[%s917_s0] sm:$0xff] (!%p271_p10)   ;;  %v751_v25 = vld [vmem:[%s917_s0 + $0x8] sm:$0xff] (!%p271_p10)   ;;  %p313_p11 = scmp.lt.s32.totalorder (!%p271_p10), %s782_s14, 1 }
  0x24   : > { %274 = sbr.rel (%p271_p10) target bundleno = 300 (0x12c), region = 69  ;;  %s636_s6 = sshll.u32 (!%p271_p10), %s277_s30, 6  ;;  %698 = vmatprep.mubr.bf16.mxu0 (!%p271_p10), %v750_v16 }
  0x25   : > { %s279_s7 = scalar_lea.vmem (!%p271_p10), [#allocation2], %s636_s6  ;;  %s637_s20 = sshll.u32 (!%p271_p10), %s277_s30, 4 }
  0x26   : > { %v742_v17 = vld [vmem:[%s279_s7] sm:$0xff] (!%p271_p10)   ;;  %v743_v18 = vld [vmem:[%s279_s7 + $0x8] sm:$0xff] (!%p271_p10)   ;;  %v744_v19 = vld [vmem:[%s279_s7 + $0x10] sm:$0xff] (!%p271_p10)   ;;  %s306_s23 = scalar_lea.vmem (!%p271_p10), [#allocation3], %s637_s20 }
  0x27   : > { %682 = vmatprep.subr.bf16.mxu0 (!%p271_p10), %v742_v17  ;;  %v745_v20 = vld [vmem:[%s279_s7 + $0x18] sm:$0xff] (!%p271_p10)   ;;  %v746_v21 = vld [vmem:[%s279_s7 + $0x20] sm:$0xff] (!%p271_p10)   ;;  %v747_v22 = vld [vmem:[%s279_s7 + $0x28] sm:$0xff] (!%p271_p10)  }
  0x28   : > { %683 = vmatpush3.bf16.msra.mxu0 (!%p271_p10), %v742_v17  ;;  %v748_v23 = vld [vmem:[%s279_s7 + $0x30] sm:$0xff] (!%p271_p10)   ;;  %v749_v24 = vld [vmem:[%s279_s7 + $0x38] sm:$0xff] (!%p271_p10)  }
  0x29   : > { %684 = vmatprep.subr.bf16.mxu0 (!%p271_p10), %v743_v18 }
  0x2b   : > { %s314_s10 = scalar_select %p313_p11, %s782_s14, 1 }
  0x2c   : > { %685 = vmatpush3.bf16.msra.mxu0 %v743_v18  ;;  %s654_s24 = sshll.u32 (%p847_p6), %s782_s14, 2 }
  0x2d   : > { %686 = vmatprep.subr.bf16.mxu0 %v744_v19  ;;  %s315_s19 = scalar_lea.vmem %s919_s2, %s314_s10  ;;  %s485_s26 = scalar_lea.vmem (%p847_p6), %s920_s3, %s654_s24 }
  0x2e   : > { %v638_v27 = vld [vmem:[%s315_s19] ss:$0 sm:$0xff] }
  0x30   : > { %687 = vmatpush3.bf16.msra.mxu0 %v744_v19 }
  0x31   : > { %688 = vmatprep.subr.bf16.mxu0 %v745_v20 }
  0x34   : > { %689 = vmatpush3.bf16.msra.mxu0 %v745_v20 }
  0x35   : > { %690 = vmatprep.subr.bf16.mxu0 %v746_v21 }
  0x38   : > { %691 = vmatpush3.bf16.msra.mxu0 %v746_v21 }
  0x39   : > { %692 = vmatprep.subr.bf16.mxu0 %v747_v22 }
  0x3c   : > { %693 = vmatpush3.bf16.msra.mxu0 %v747_v22 }
  0x3d   : > { %694 = vmatprep.subr.bf16.mxu0 %v748_v23 }
  0x40   : > { %695 = vmatpush3.bf16.msra.mxu0 %v748_v23 }
  0x41   : > { %696 = vmatprep.subr.bf16.mxu0 %v749_v24 }
  0x44   : > { %697 = vmatpush3.bf16.msra.mxu0 %v749_v24 }
  0x47   : > { %699 = vmatmul.mubr.bf16.vlgmr.msra.gmra.mrb[0].mxu0 %v751_v25 }
 0x11a   : > { %v700_v26 = vpop.f32.mrb[0].mxu0 }
 0x11b   : > { %v439_v28 = vpop.f32.mrb[1].mxu0  ;;  %v448_v30 = vadd.f32 %v700_v26, %v638_v27 }
 0x11c   : > { %v701_v29 = vpop.f32.mrb[2].mxu0  ;;  %v440_v33 = vadd.f32 %v638_v27, %v439_v28  ;;  %480 = sbr.rel (!%p847_p6) target bundleno = 300 (0x12c), region = 77 }
 0x11d   : > { %v451_v31 = vadd.f32 %v701_v29, %v638_v27  ;;  %v442_v32 = vpop.f32.mrb[3].mxu0 }
 0x11e   : > { %v443_v34 = vadd.f32 %v638_v27, %v442_v32 }
 0x11f   : > { %v669_v35 = vpack.c.bf16 %v451_v31, %v448_v30 }
 0x120   : > { %v664_v36 = vpack.c.bf16 %v443_v34, %v440_v33 }
 0x121   : > { %671 = vst [vmem:[%s306_s23 + $0x8] sm:$0xff] %v669_v35  }
 0x122   : > { %665 = vst [vmem:[%s306_s23] sm:$0xff] %v664_v36  }
 0x128   : > { %v505_v39 = vld [vmem:[%s306_s23 + $0x8] sm:$0xf]  ;;  %v507_v40 = vld [vmem:[%s306_s23 + $0xc] sm:$0xf] }
 0x129   : > { %v501_v37 = vld [vmem:[%s306_s23] sm:$0xf]  ;;  %v503_v38 = vld [vmem:[%s306_s23 + $0x4] sm:$0xf]  ;;  %506 = vst [vmem:[%s485_s26 + $0x10] sm:$0xf] %v505_v39 }
 0x12a   : > { %502 = vst [vmem:[%s485_s26] sm:$0xf] %v501_v37  ;;  %504 = vst [vmem:[%s485_s26 + $0x8] sm:$0xf] %v503_v38 }
 0x12b   : > { %508 = vst [vmem:[%s485_s26 + $0x18] sm:$0xf] %v507_v40 }
 0x12c PF: > { %s13_s16 = sadd.s32 1, %s790_s16   ;;  %s922_s12 = smov %s778_s13 }
 0x12d   : > { %p10_p12 = scmp.ge.s32.totalorder %s13_s16, 4   ;;  %s923_s13 = smov %s852_s22 }
 0x12e   : > { %s924_s14 = smov %s786_s15  ;;  %s925_s15 = smov %s927_s17 }
 0x12f   :  { %12 = sbr.rel (!%p10_p12) target bundleno = 3 (0x3), region = 155 }

// kernel: language_model_forward.26
= control target key start
LH: loop header
LB: loop body
LE: loop exit
PB: predicated region body
PF: predicated region fallthrough
CT: control target
= control target key end

     0   :  { %s1071_s12 = smov 0   ;;  %s1073_s13 = smov 0   ;;  %s1281_s0 = inlined_call_operand.vmem [shape: bf16[32,128], index: 0, kind: input, shape index: {}]   ;;  %s1282_s1 = inlined_call_operand.vmem [shape: bf16[128,1024], index: 1, kind: input, shape index: {}]   ;;  %s1283_s2 = inlined_call_operand.vmem [shape: f32[1,1024], index: 2, kind: input, shape index: {}]   ;;  %s1284_s3 = inlined_call_operand.vmem [shape: bf16[32,1024], index: 3, kind: output, shape index: {}]  }
   0x1   :  { %s1075_s14 = smov 0   ;;  %s1077_s15 = smov 0  }
   0x2   :  { %s1079_s16 = smov 0  }
   0x3 LB: > { %s22_s17 = sadd.s32 1, %s1044_s15  ;;  %s850_s18 = sadd.s32 4294967295, %s1048_s16   ;;  %s1048_s16 = sphi %s1079_s16, %s13_s16   ;;  %s1044_s15 = sphi %s1077_s15, %s1289_s15   ;;  %s1040_s14 = sphi %s1075_s14, %s1288_s14   ;;  %s1036_s13 = sphi %s1073_s13, %s1287_s13   ;;  %s1032_s12 = sphi %s1071_s12, %s1286_s12  }
   0x4   : > { %p23_p0 = scmp.ge.s32.totalorder %s22_s17, 2  ;;  %p65_p1 = scmp.ne.s32.totalorder %s1036_s13, %s1032_s12 }
   0x5   : > { %p66_p2 = scmp.eq.s32.totalorder %s1048_s16, 0  ;;  %p123_p4 = scmp.eq.s32.totalorder %s850_s18, 1 }
   0x6   : > { %s1291_s17 = smov (%p23_p0, %s22_s17), 0  ;;  %s58_s20 = sadd.s32 1, %s1036_s13 }
   0x7   : > { %p67_p3 = por %p66_p2, %p65_p1  ;;  %s55_s19 = ssub.s32 %s1044_s15, %s1291_s17 }
   0x8   : > { %p56_p5 = scmp.eq.s32.totalorder %s55_s19, 0  ;;  %p1106_p6 = por %p123_p4, %p65_p1 }
   0x9   : > { %p854_p7 = scmp.ge.s32.totalorder %s1048_s16, 2 }
   0xa   : > { %s1111_s22 = scalar_select %p56_p5, %s1036_s13, %s58_s20  }
   0xb   : > { %154 = sbr.rel (%p854_p7) target bundleno = 38 (0x26), region = 20 }
  0x12   : > { %157 = sbr.rel (!%p67_p3) target bundleno = 38 (0x26), region = 24  ;;  %s159_s23 = sand.u32 (%p67_p3), 1, %s1036_s13  }
  0x13   : > { %s909_s24 = sshll.u32 (%p67_p3), %s1044_s15, 4  ;;  %s855_s25 = sshll.u32 (%p67_p3), %s159_s23, 8 }
  0x14   : > { %s1119_s28 = scalar_lea.vmem (%p67_p3), %s1282_s1, %s909_s24  ;;  %s1124_s29 = scalar_lea.vmem (%p67_p3), [#allocation2], %s855_s25 }
  0x15   : > { %v177_v0 = vld [vmem:[%s1119_s28] sm:$0xff] (%p67_p3)  ;;  %v179_v1 = vld [vmem:[%s1119_s28 + $0x8] sm:$0xff] (%p67_p3) }
  0x16   : > { %v181_v2 = vld [vmem:[%s1119_s28 + $0x20] sm:$0xff] (%p67_p3)  ;;  %178 = vst [vmem:[%s1124_s29] sm:$0xff] (%p67_p3), %v177_v0  ;;  %180 = vst [vmem:[%s1124_s29 + $0x8] sm:$0xff] (%p67_p3), %v179_v1  ;;  %v183_v3 = vld [vmem:[%s1119_s28 + $0x28] sm:$0xff] (%p67_p3) }
  0x17   : > { %182 = vst [vmem:[%s1124_s29 + $0x10] sm:$0xff] (%p67_p3), %v181_v2  ;;  %v185_v4 = vld [vmem:[%s1119_s28 + $0x40] sm:$0xff] (%p67_p3)  ;;  %v187_v5 = vld [vmem:[%s1119_s28 + $0x48] sm:$0xff] (%p67_p3)  ;;  %184 = vst [vmem:[%s1124_s29 + $0x18] sm:$0xff] (%p67_p3), %v183_v3 }
  0x18   : > { %186 = vst [vmem:[%s1124_s29 + $0x20] sm:$0xff] (%p67_p3), %v185_v4  ;;  %188 = vst [vmem:[%s1124_s29 + $0x28] sm:$0xff] (%p67_p3), %v187_v5  ;;  %v189_v6 = vld [vmem:[%s1119_s28 + $0x60] sm:$0xff] (%p67_p3)  ;;  %v191_v7 = vld [vmem:[%s1119_s28 + $0x68] sm:$0xff] (%p67_p3) }
  0x19   : > { %v193_v8 = vld [vmem:[%s1119_s28 + $0x80] sm:$0xff]  ;;  %190 = vst [vmem:[%s1124_s29 + $0x30] sm:$0xff] %v189_v6  ;;  %192 = vst [vmem:[%s1124_s29 + $0x38] sm:$0xff] %v191_v7  ;;  %v195_v9 = vld [vmem:[%s1119_s28 + $0x88] sm:$0xff] }
  0x1a   : > { %194 = vst [vmem:[%s1124_s29 + $0x40] sm:$0xff] %v193_v8  ;;  %v197_v10 = vld [vmem:[%s1119_s28 + $0xa0] sm:$0xff]  ;;  %v199_v11 = vld [vmem:[%s1119_s28 + $0xa8] sm:$0xff]  ;;  %196 = vst [vmem:[%s1124_s29 + $0x48] sm:$0xff] %v195_v9 }
  0x1b   : > { %198 = vst [vmem:[%s1124_s29 + $0x50] sm:$0xff] %v197_v10  ;;  %200 = vst [vmem:[%s1124_s29 + $0x58] sm:$0xff] %v199_v11  ;;  %v201_v12 = vld [vmem:[%s1119_s28 + $0xc0] sm:$0xff]  ;;  %v203_v13 = vld [vmem:[%s1119_s28 + $0xc8] sm:$0xff] }
  0x1c   : > { %v205_v14 = vld [vmem:[%s1119_s28 + $0xe0] sm:$0xff]  ;;  %202 = vst [vmem:[%s1124_s29 + $0x60] sm:$0xff] %v201_v12  ;;  %204 = vst [vmem:[%s1124_s29 + $0x68] sm:$0xff] %v203_v13  ;;  %v207_v15 = vld [vmem:[%s1119_s28 + $0xe8] sm:$0xff] }
  0x1d   : > { %206 = vst [vmem:[%s1124_s29 + $0x70] sm:$0xff] %v205_v14  ;;  %v209_v16 = vld [vmem:[%s1119_s28 + $0x100] sm:$0xff]  ;;  %v211_v17 = vld [vmem:[%s1119_s28 + $0x108] sm:$0xff]  ;;  %208 = vst [vmem:[%s1124_s29 + $0x78] sm:$0xff] %v207_v15 }
  0x1e   : > { %210 = vst [vmem:[%s1124_s29 + $0x80] sm:$0xff] %v209_v16  ;;  %212 = vst [vmem:[%s1124_s29 + $0x88] sm:$0xff] %v211_v17  ;;  %v213_v18 = vld [vmem:[%s1119_s28 + $0x120] sm:$0xff]  ;;  %v215_v19 = vld [vmem:[%s1119_s28 + $0x128] sm:$0xff] }
  0x1f   : > { %v217_v20 = vld [vmem:[%s1119_s28 + $0x140] sm:$0xff]  ;;  %214 = vst [vmem:[%s1124_s29 + $0x90] sm:$0xff] %v213_v18  ;;  %216 = vst [vmem:[%s1124_s29 + $0x98] sm:$0xff] %v215_v19  ;;  %v219_v21 = vld [vmem:[%s1119_s28 + $0x148] sm:$0xff] }
  0x20   : > { %218 = vst [vmem:[%s1124_s29 + $0xa0] sm:$0xff] %v217_v20  ;;  %v221_v22 = vld [vmem:[%s1119_s28 + $0x160] sm:$0xff]  ;;  %v223_v23 = vld [vmem:[%s1119_s28 + $0x168] sm:$0xff]  ;;  %220 = vst [vmem:[%s1124_s29 + $0xa8] sm:$0xff] %v219_v21 }
  0x21   : > { %222 = vst [vmem:[%s1124_s29 + $0xb0] sm:$0xff] %v221_v22  ;;  %224 = vst [vmem:[%s1124_s29 + $0xb8] sm:$0xff] %v223_v23  ;;  %v225_v24 = vld [vmem:[%s1119_s28 + $0x180] sm:$0xff]  ;;  %v227_v25 = vld [vmem:[%s1119_s28 + $0x188] sm:$0xff] }
  0x22   : > { %v229_v26 = vld [vmem:[%s1119_s28 + $0x1a0] sm:$0xff]  ;;  %226 = vst [vmem:[%s1124_s29 + $0xc0] sm:$0xff] %v225_v24  ;;  %228 = vst [vmem:[%s1124_s29 + $0xc8] sm:$0xff] %v227_v25  ;;  %v231_v27 = vld [vmem:[%s1119_s28 + $0x1a8] sm:$0xff] }
  0x23   : > { %230 = vst [vmem:[%s1124_s29 + $0xd0] sm:$0xff] %v229_v26  ;;  %v233_v28 = vld [vmem:[%s1119_s28 + $0x1c0] sm:$0xff]  ;;  %v235_v29 = vld [vmem:[%s1119_s28 + $0x1c8] sm:$0xff]  ;;  %232 = vst [vmem:[%s1124_s29 + $0xd8] sm:$0xff] %v231_v27 }
  0x24   : > { %234 = vst [vmem:[%s1124_s29 + $0xe0] sm:$0xff] %v233_v28  ;;  %236 = vst [vmem:[%s1124_s29 + $0xe8] sm:$0xff] %v235_v29  ;;  %v237_v30 = vld [vmem:[%s1119_s28 + $0x1e0] sm:$0xff]  ;;  %v239_v31 = vld [vmem:[%s1119_s28 + $0x1e8] sm:$0xff] }
  0x25   : > { %238 = vst [vmem:[%s1124_s29 + $0xf0] sm:$0xff] %v237_v30  ;;  %240 = vst [vmem:[%s1124_s29 + $0xf8] sm:$0xff] %v239_v31 }
  0x26 PF: > { %p858_p8 = scmp.ge.s32.totalorder %s1048_s16, 1  ;;  %p253_p9 = scmp.lt.s32.totalorder %s1048_s16, 3 }
  0x28   : > { %p254_p10 = pnand %p858_p8, %p253_p9 }
  0x29   : > { %s260_s30 = sand.u32 (!%p254_p10), 1, %s1032_s12   ;;  %v1050_v32 = vmov (!%p254_p10), 0   ;;  %v1008_v1 = vld [vmem:[%s1281_s0] sm:$0xff] (!%p254_p10)   ;;  %v1009_v2 = vld [vmem:[%s1281_s0 + $0x8] sm:$0xff] (!%p254_p10)   ;;  %s861_s10 = sshll.u32 (!%p254_p10), %s1040_s14, 2  ;;  %v344_v3 = vlaneseq (!%p254_p10) }
  0x2a   : > { %257 = sbr.rel (%p254_p10) target bundleno = 315 (0x13b), region = 51  ;;  %s859_s4 = sshll.u32 (!%p254_p10), %s260_s30, 8  ;;  %568 = vmatprep.mubr.bf16.mxu0 (!%p254_p10), %v1050_v32  ;;  %621 = vmatprep.mubr.bf16.mxu1 (!%p254_p10), %v1050_v32 }
  0x2b   : > { %s1194_s5 = scalar_lea.vmem (!%p254_p10), [#allocation2], %s859_s4  ;;  %p299_p11 = scmp.lt.s32.totalorder (!%p254_p10), %s861_s10, 7  ;;  %v345_v4 = vshrl.u32 (!%p254_p10), %v344_v3, 7 }
  0x2c   : > { %v960_v33 = vld [vmem:[%s1194_s5 + $0x4] ss:$16 sps:$4 sm:$0xff] (!%p254_p10)   ;;  %v962_v34 = vld [vmem:[%s1194_s5 + $0xc] ss:$16 sps:$4 sm:$0xff] (!%p254_p10)   ;;  %v964_v35 = vld [vmem:[%s1194_s5] ss:$16 sps:$4 sm:$0xff] (!%p254_p10)  }
  0x2d   : > { %536 = vmatprep.subr.bf16.mxu0 (!%p254_p10), %v960_v33  ;;  %v965_v36 = vld [vmem:[%s1194_s5 + $0x8] ss:$16 sps:$4 sm:$0xff] (!%p254_p10)   ;;  %589 = vmatprep.subr.bf16.mxu1 (!%p254_p10), %v962_v34  ;;  %v966_v37 = vld [vmem:[%s1194_s5 + $0x24] ss:$16 sps:$4 sm:$0xff] (!%p254_p10)   ;;  %v968_v38 = vld [vmem:[%s1194_s5 + $0x2c] ss:$16 sps:$4 sm:$0xff] (!%p254_p10)  }
  0x2e   : > { %537 = vmatpush1.bf16.msra.mxu0 (!%p254_p10), %v964_v35  ;;  %590 = vmatpush1.bf16.msra.mxu1 (!%p254_p10), %v965_v36  ;;  %v970_v39 = vld [vmem:[%s1194_s5 + $0x20] ss:$16 sps:$4 sm:$0xff] (!%p254_p10)   ;;  %v971_v40 = vld [vmem:[%s1194_s5 + $0x28] ss:$16 sps:$4 sm:$0xff] (!%p254_p10)   ;;  %v972_v41 = vld [vmem:[%s1194_s5 + $0x44] ss:$16 sps:$4 sm:$0xff] (!%p254_p10)  }
  0x2f   : > { %538 = vmatprep.subr.bf16.mxu0 (!%p254_p10), %v966_v37  ;;  %591 = vmatprep.subr.bf16.mxu1 (!%p254_p10), %v968_v38  ;;  %v974_v42 = vld [vmem:[%s1194_s5 + $0x4c] ss:$16 sps:$4 sm:$0xff] (!%p254_p10)   ;;  %v976_v43 = vld [vmem:[%s1194_s5 + $0x40] ss:$16 sps:$4 sm:$0xff] (!%p254_p10)   ;;  %v977_v44 = vld [vmem:[%s1194_s5 + $0x48] ss:$16 sps:$4 sm:$0xff] (!%p254_p10)  }
  0x30   : > { %v978_v45 = vld [vmem:[%s1194_s5 + $0x64] ss:$16 sps:$4 sm:$0xff] (!%p254_p10)   ;;  %v980_v46 = vld [vmem:[%s1194_s5 + $0x6c] ss:$16 sps:$4 sm:$0xff] (!%p254_p10)   ;;  %v982_v47 = vld [vmem:[%s1194_s5 + $0x60] ss:$16 sps:$4 sm:$0xff] (!%p254_p10)  }
  0x31   : > { %v983_v48 = vld [vmem:[%s1194_s5 + $0x68] ss:$16 sps:$4 sm:$0xff]   ;;  %v984_v49 = vld [vmem:[%s1194_s5 + $0x84] ss:$16 sps:$4 sm:$0xff]   ;;  %v986_v50 = vld [vmem:[%s1194_s5 + $0x8c] ss:$16 sps:$4 sm:$0xff]  }
  0x32   : > { %539 = vmatpush1.bf16.msra.mxu0 %v970_v39  ;;  %592 = vmatpush1.bf16.msra.mxu1 %v971_v40  ;;  %v988_v51 = vld [vmem:[%s1194_s5 + $0x80] ss:$16 sps:$4 sm:$0xff]   ;;  %v989_v52 = vld [vmem:[%s1194_s5 + $0x88] ss:$16 sps:$4 sm:$0xff]   ;;  %v990_v53 = vld [vmem:[%s1194_s5 + $0xa4] ss:$16 sps:$4 sm:$0xff]  }
  0x33   : > { %540 = vmatprep.subr.bf16.mxu0 %v972_v41  ;;  %593 = vmatprep.subr.bf16.mxu1 %v974_v42  ;;  %v992_v54 = vld [vmem:[%s1194_s5 + $0xac] ss:$16 sps:$4 sm:$0xff]   ;;  %v994_v55 = vld [vmem:[%s1194_s5 + $0xa0] ss:$16 sps:$4 sm:$0xff]   ;;  %v995_v56 = vld [vmem:[%s1194_s5 + $0xa8] ss:$16 sps:$4 sm:$0xff]  }
  0x34   : > { %v996_v57 = vld [vmem:[%s1194_s5 + $0xc4] ss:$16 sps:$4 sm:$0xff]   ;;  %v998_v58 = vld [vmem:[%s1194_s5 + $0xcc] ss:$16 sps:$4 sm:$0xff]   ;;  %v1000_v59 = vld [vmem:[%s1194_s5 + $0xc0] ss:$16 sps:$4 sm:$0xff]  }
  0x35   : > { %v1001_v60 = vld [vmem:[%s1194_s5 + $0xc8] ss:$16 sps:$4 sm:$0xff]   ;;  %v1002_v61 = vld [vmem:[%s1194_s5 + $0xe4] ss:$16 sps:$4 sm:$0xff]   ;;  %v1004_v62 = vld [vmem:[%s1194_s5 + $0xec] ss:$16 sps:$4 sm:$0xff]  }
  0x36   : > { %541 = vmatpush1.bf16.msra.mxu0 %v976_v43  ;;  %594 = vmatpush1.bf16.msra.mxu1 %v977_v44  ;;  %v1006_v63 = vld [vmem:[%s1194_s5 + $0xe0] ss:$16 sps:$4 sm:$0xff]   ;;  %v1007_v0 = vld [vmem:[%s1194_s5 + $0xe8] ss:$16 sps:$4 sm:$0xff]   ;;  %s1293_s10 = smov (!%p299_p11, %s861_s10), 7  ;;  %v346_v5 = vsub.s32 0, %v345_v4 }
  0x37   : > { %542 = vmatprep.subr.bf16.mxu0 %v978_v45  ;;  %595 = vmatprep.subr.bf16.mxu1 %v980_v46  ;;  %s301_s19 = scalar_lea.vmem %s1283_s2, %s1293_s10  ;;  %v354_v6 = vsub.s32 2, %v345_v4  ;;  %v350_v8 = vsub.s32 1, %v345_v4  ;;  %v358_v9 = vsub.s32 3, %v345_v4  ;;  %s860_s20 = sshll.u32 %s260_s30, 6 }
  0x38   : > { %v342_v7 = vld [vmem:[%s301_s19] sm:$0xf]  ;;  %s1242_s12 = scalar_lea.vmem [#allocation3], %s860_s20  ;;  %s918_s23 = sshll.u32 (%p1106_p6), %s1040_s14, 4 }
  0x39   : > { %v347_v10 = vrot.slane %v342_v7, %v346_v5  ;;  %v355_v11 = vrot.slane %v342_v7, %v354_v6  ;;  %v351_v12 = vrot.slane %v342_v7, %v350_v8  ;;  %v359_v13 = vrot.slane %v342_v7, %v358_v9  ;;  %s726_s26 = scalar_lea.vmem (%p1106_p6), %s1284_s3, %s918_s23 }
  0x3a   : > { %543 = vmatpush1.bf16.msra.mxu0 %v982_v47  ;;  %596 = vmatpush1.bf16.msra.mxu1 %v983_v48 }
  0x3b   : > { %544 = vmatprep.subr.bf16.mxu0 %v984_v49  ;;  %597 = vmatprep.subr.bf16.mxu1 %v986_v50 }
  0x3e   : > { %545 = vmatpush1.bf16.msra.mxu0 %v988_v51  ;;  %598 = vmatpush1.bf16.msra.mxu1 %v989_v52 }
  0x3f   : > { %546 = vmatprep.subr.bf16.mxu0 %v990_v53  ;;  %599 = vmatprep.subr.bf16.mxu1 %v992_v54 }
  0x42   : > { %547 = vmatpush1.bf16.msra.mxu0 %v994_v55  ;;  %600 = vmatpush1.bf16.msra.mxu1 %v995_v56 }
  0x43   : > { %548 = vmatprep.subr.bf16.mxu0 %v996_v57  ;;  %601 = vmatprep.subr.bf16.mxu1 %v998_v58 }
  0x46   : > { %549 = vmatpush1.bf16.msra.mxu0 %v1000_v59  ;;  %602 = vmatpush1.bf16.msra.mxu1 %v1001_v60 }
  0x47   : > { %550 = vmatprep.subr.bf16.mxu0 %v1002_v61  ;;  %603 = vmatprep.subr.bf16.mxu1 %v1004_v62 }
  0x4a   : > { %551 = vmatpush1.bf16.msra.mxu0 %v1006_v63  ;;  %604 = vmatpush1.bf16.msra.mxu1 %v1007_v0 }
  0x4d   : > { %569 = vmatmul.mubr.bf16.vlgmr.msra.gmra.mrb[0].mxu0 %v1008_v1  ;;  %622 = vmatmul.mubr.bf16.vlgmr.msra.gmra.mrb[0].mxu1 %v1008_v1 }
  0x4e   : > { %578 = vmatprep.mubr.bf16.mxu0 %v1050_v32  ;;  %631 = vmatprep.mubr.bf16.mxu1 %v1050_v32 }
  0x55   : > { %579 = vmatmul.mubr.bf16.gmra.mrb[4].mxu0 %v1009_v2  ;;  %632 = vmatmul.mubr.bf16.gmra.mrb[4].mxu1 %v1009_v2 }
 0x120   : > { %v570_v14 = vpop.f32.mrb[0].mxu0  ;;  %v623_v15 = vpop.f32.mrb[0].mxu1 }
 0x121   : > { %v571_v16 = vadd.f32 %v570_v14, %v347_v10  ;;  %v624_v17 = vadd.f32 %v623_v15, %v355_v11  ;;  %v572_v18 = vpop.f32.mrb[1].mxu0  ;;  %v625_v19 = vpop.f32.mrb[1].mxu1 }
 0x122   : > { %v573_v20 = vadd.f32 %v572_v18, %v351_v12  ;;  %v626_v21 = vadd.f32 %v625_v19, %v359_v13  ;;  %v574_v22 = vpop.f32.mrb[2].mxu0  ;;  %v627_v23 = vpop.f32.mrb[2].mxu1 }
 0x123   : > { %v642_v24 = vmax.f32 %v571_v16, 0.0  ;;  %v644_v25 = vmax.f32 %v624_v17, 0.0  ;;  %v575_v26 = vadd.f32 %v574_v22, %v347_v10  ;;  %v628_v27 = vadd.f32 %v627_v23, %v355_v11  ;;  %v576_v28 = vpop.f32.mrb[3].mxu0  ;;  %v629_v29 = vpop.f32.mrb[3].mxu1 }
 0x124   : > { %v643_v30 = vmax.f32 %v573_v20, 0.0  ;;  %v645_v31 = vmax.f32 %v626_v21, 0.0  ;;  %v577_v32 = vadd.f32 %v576_v28, %v351_v12  ;;  %v630_v33 = vadd.f32 %v629_v29, %v359_v13 }
 0x125   : > { %v646_v34 = vmax.f32 %v575_v26, 0.0  ;;  %v648_v35 = vmax.f32 %v628_v27, 0.0 }
 0x126   : > { %v910_v36 = vpack.c.bf16 %v643_v30, %v642_v24  ;;  %v911_v37 = vpack.c.bf16 %v645_v31, %v644_v25  ;;  %v647_v38 = vmax.f32 %v577_v32, 0.0  ;;  %v649_v39 = vmax.f32 %v630_v33, 0.0 }
 0x128   : > { %706 = vst [vmem:[%s1242_s12] sm:$0xff] %v910_v36  ;;  %707 = vst [vmem:[%s1242_s12 + $0x8] sm:$0xff] %v911_v37  ;;  %v912_v40 = vpack.c.bf16 %v647_v38, %v646_v34  ;;  %v913_v41 = vpack.c.bf16 %v649_v39, %v648_v35  ;;  %v580_v42 = vpop.f32.mrb[4].mxu0  ;;  %v633_v43 = vpop.f32.mrb[4].mxu1 }
 0x129   : > { %v581_v44 = vadd.f32 %v580_v42, %v347_v10  ;;  %v634_v45 = vadd.f32 %v633_v43, %v355_v11  ;;  %v582_v46 = vpop.f32.mrb[5].mxu0  ;;  %v635_v47 = vpop.f32.mrb[5].mxu1 }
 0x12a   : > { %708 = vst [vmem:[%s1242_s12 + $0x10] sm:$0xff] %v912_v40  ;;  %709 = vst [vmem:[%s1242_s12 + $0x18] sm:$0xff] %v913_v41  ;;  %v583_v48 = vadd.f32 %v582_v46, %v351_v12  ;;  %v636_v49 = vadd.f32 %v635_v47, %v359_v13  ;;  %v584_v50 = vpop.f32.mrb[6].mxu0  ;;  %v637_v51 = vpop.f32.mrb[6].mxu1 }
 0x12b   : > { %v650_v52 = vmax.f32 %v581_v44, 0.0  ;;  %v652_v53 = vmax.f32 %v634_v45, 0.0  ;;  %v585_v54 = vadd.f32 %v584_v50, %v347_v10  ;;  %v638_v55 = vadd.f32 %v637_v51, %v355_v11  ;;  %v586_v56 = vpop.f32.mrb[7].mxu0  ;;  %v639_v57 = vpop.f32.mrb[7].mxu1 }
 0x12c   : > { %v651_v58 = vmax.f32 %v583_v48, 0.0  ;;  %v653_v59 = vmax.f32 %v636_v49, 0.0  ;;  %v587_v60 = vadd.f32 %v586_v56, %v351_v12  ;;  %v640_v61 = vadd.f32 %v639_v57, %v359_v13  ;;  %720 = sbr.rel (!%p1106_p6) target bundleno = 315 (0x13b), region = 59 }
 0x12d   : > { %v654_v62 = vmax.f32 %v585_v54, 0.0  ;;  %v656_v63 = vmax.f32 %v638_v55, 0.0 }
 0x12e   : > { %v914_v0 = vpack.c.bf16 %v651_v58, %v650_v52  ;;  %v915_v1 = vpack.c.bf16 %v653_v59, %v652_v53  ;;  %v655_v2 = vmax.f32 %v587_v60, 0.0  ;;  %v657_v3 = vmax.f32 %v640_v61, 0.0 }
 0x12f   : > { %v739_v6 = vld [vmem:[%s1242_s12] sm:$0xff] (%p1106_p6)  ;;  %v741_v7 = vld [vmem:[%s1242_s12 + $0x8] sm:$0xff] (%p1106_p6) }
 0x130   : > { %710 = vst [vmem:[%s1242_s12 + $0x20] sm:$0xff] %v914_v0  ;;  %711 = vst [vmem:[%s1242_s12 + $0x28] sm:$0xff] %v915_v1  ;;  %v916_v4 = vpack.c.bf16 %v655_v2, %v654_v62  ;;  %v917_v5 = vpack.c.bf16 %v657_v3, %v656_v63 }
 0x131   : > { %v743_v8 = vld [vmem:[%s1242_s12 + $0x10] sm:$0xff] (%p1106_p6)  ;;  %v745_v9 = vld [vmem:[%s1242_s12 + $0x18] sm:$0xff] (%p1106_p6)  ;;  %740 = vst [vmem:[%s726_s26] sm:$0xff] (%p1106_p6), %v739_v6  ;;  %742 = vst [vmem:[%s726_s26 + $0x8] sm:$0xff] (%p1106_p6), %v741_v7 }
 0x132   : > { %712 = vst [vmem:[%s1242_s12 + $0x30] sm:$0xff] %v916_v4  ;;  %713 = vst [vmem:[%s1242_s12 + $0x38] sm:$0xff] %v917_v5 }
 0x133   : > { %744 = vst [vmem:[%s726_s26 + $0x20] sm:$0xff] %v743_v8  ;;  %746 = vst [vmem:[%s726_s26 + $0x28] sm:$0xff] %v745_v9 }
 0x137   : > { %v747_v10 = vld [vmem:[%s1242_s12 + $0x20] sm:$0xff]  ;;  %v749_v11 = vld [vmem:[%s1242_s12 + $0x28] sm:$0xff] }
 0x138   : > { %748 = vst [vmem:[%s726_s26 + $0x40] sm:$0xff] %v747_v10  ;;  %750 = vst [vmem:[%s726_s26 + $0x48] sm:$0xff] %v749_v11 }
 0x139   : > { %v751_v12 = vld [vmem:[%s1242_s12 + $0x30] sm:$0xff]  ;;  %v753_v13 = vld [vmem:[%s1242_s12 + $0x38] sm:$0xff] }
 0x13a   : > { %752 = vst [vmem:[%s726_s26 + $0x60] sm:$0xff] %v751_v12  ;;  %754 = vst [vmem:[%s726_s26 + $0x68] sm:$0xff] %v753_v13 }
 0x13b PF: > { %s13_s16 = sadd.s32 1, %s1048_s16   ;;  %s1286_s12 = smov %s1036_s13 }
 0x13c   : > { %p10_p12 = scmp.ge.s32.totalorder %s13_s16, 4   ;;  %s1287_s13 = smov %s1111_s22 }
 0x13d   : > { %s1288_s14 = smov %s1044_s15  ;;  %s1289_s15 = smov %s1291_s17 }
 0x13e   :  { %12 = sbr.rel (!%p10_p12) target bundleno = 3 (0x3), region = 119 }

// kernel: language_model_forward.24
= control target key start
LH: loop header
LB: loop body
LE: loop exit
PB: predicated region body
PF: predicated region fallthrough
CT: control target
= control target key end

     0   :  { %s1291_s12 = smov 0   ;;  %s1293_s13 = smov 0   ;;  %s1466_s0 = inlined_call_operand.vmem [shape: bf16[32,128], index: 0, kind: input, shape index: {}]   ;;  %s1467_s1 = inlined_call_operand.vmem [shape: bf16[32,256], index: 1, kind: input, shape index: {}, may-alias: {1,2}]   ;;  %s1468_s2 = inlined_call_operand.vmem [shape: bf16[32,256], index: 2, kind: input, shape index: {}, may-alias: {1,2}]   ;;  %s1469_s3 = inlined_call_operand.vmem [shape: bf16[32,128], index: 3, kind: output, shape index: {}]  }
   0x1   :  { %s1295_s14 = smov 0   ;;  %s1297_s15 = smov 0  }
   0x2   :  { %s1299_s16 = smov 0  }
   0x3 LB: > { %s25_s17 = sadd.s32 1, %s1260_s15  ;;  %p69_p1 = scmp.ne.s32.totalorder %s1252_s13, %s1248_s12  ;;  %s1264_s16 = sphi %s1299_s16, %s13_s16   ;;  %s1260_s15 = sphi %s1297_s15, %s1474_s15   ;;  %s1256_s14 = sphi %s1295_s14, %s1473_s14   ;;  %s1252_s13 = sphi %s1293_s13, %s1472_s13   ;;  %s1248_s12 = sphi %s1291_s12, %s1471_s12  }
   0x4   : > { %p27_p0 = scmp.ge.s32.totalorder %s25_s17, 2  ;;  %p70_p2 = scmp.eq.s32.totalorder %s1264_s16, 0 }
   0x5   : > { %s62_s20 = sadd.s32 1, %s1252_s13  ;;  %p1034_p5 = scmp.ge.s32.totalorder %s1264_s16, 2 }
   0x6   : > { %s1476_s17 = smov (%p27_p0, %s25_s17), 0  ;;  %p1322_p3 = por %p70_p2, %p69_p1 }
   0x7   : > { %s57_s19 = ssub.s32 %s1260_s15, %s1476_s17  ;;  %153 = sbr.rel (%p1034_p5) target bundleno = 28 (0x1c), region = 16 }
   0x8   : > { %p60_p4 = scmp.eq.s32.totalorder %s57_s19, 0 }
   0xa   : > { %s1330_s21 = scalar_select %p60_p4, %s1252_s13, %s62_s20  }
   0xe   : > { %168 = sbr.rel (!%p1322_p3) target bundleno = 21 (0x15), region = 24  ;;  %s170_s22 = sand.u32 (%p1322_p3), 1, %s1252_s13  }
   0xf   : > { %s1073_s23 = sshll.u32 (%p1322_p3), %s1260_s15, 4  ;;  %s1035_s24 = sshll.u32 (%p1322_p3), %s170_s22, 3 }
  0x10   : > { %s177_s27 = scalar_lea.vmem (%p1322_p3), %s1467_s1, %s1073_s23  ;;  %s172_s28 = scalar_lea.vmem (%p1322_p3), [#allocation2], %s1035_s24 }
  0x11   : > { %v193_v0 = vld [vmem:[%s177_s27] sm:$0xf] (%p1322_p3)  ;;  %v195_v1 = vld [vmem:[%s177_s27 + $0x8] sm:$0xf] (%p1322_p3) }
  0x12   : > { %194 = vst [vmem:[%s172_s28] sm:$0xf] (%p1322_p3), %v193_v0  ;;  %196 = vst [vmem:[%s172_s28 + $0x4] sm:$0xf] (%p1322_p3), %v195_v1 }
  0x15 PF: > { %223 = sbr.rel (!%p1322_p3) target bundleno = 28 (0x1c), region = 65  ;;  %s225_s29 = sand.u32 (%p1322_p3), 1, %s1252_s13  }
  0x16   : > { %s1074_s30 = sshll.u32 (%p1322_p3), %s1260_s15, 4  ;;  %s1039_s4 = sshll.u32 (%p1322_p3), %s225_s29, 3 }
  0x17   : > { %s954_s7 = scalar_lea.vmem (%p1322_p3), %s1468_s2, %s1074_s30  ;;  %s227_s8 = scalar_lea.vmem (%p1322_p3), [#allocation3], %s1039_s4 }
  0x18   : > { %v1042_v2 = vld [vmem:[%s954_s7 + $0x4] sm:$0xf] (%p1322_p3)  ;;  %v1043_v3 = vld [vmem:[%s954_s7 + $0xc] sm:$0xf] (%p1322_p3) }
  0x19   : > { %250 = vst [vmem:[%s227_s8] sm:$0xf] (%p1322_p3), %v1042_v2  ;;  %252 = vst [vmem:[%s227_s8 + $0x4] sm:$0xf] (%p1322_p3), %v1043_v3 }
  0x1c PF: > { %p1044_p6 = scmp.ge.s32.totalorder %s1264_s16, 1  ;;  %p278_p7 = scmp.lt.s32.totalorder %s1264_s16, 3 }
  0x1e   : > { %p279_p8 = pnand %p1044_p6, %p278_p7 }
  0x1f   : > { %s285_s9 = sand.u32 (!%p279_p8), 1, %s1248_s12   ;;  %s1047_s10 = sshll.u32 (!%p279_p8), %s1256_s14, 1  ;;  %v1266_v4 = vmov (!%p279_p8), 0.0   ;;  %vm1267_vm0 = vmmov (!%p279_p8), 0   ;;  %vm371_vm1 = vcmask (!%p279_p8), 261120   ;;  %vm419_vm2 = vcmask (!%p279_p8), 130048  }
  0x20   : > { %282 = sbr.rel (%p279_p8) target bundleno = 1512 (0x5e8), region = 106  ;;  %1099 = vmatprep.subr.bf16.mxu0 (!%p279_p8), %v1266_v4  ;;  %s1352_s11 = sshll.u32 (!%p279_p8), %s285_s9, 3  ;;  %1101 = vmatprep.mubr.msk.bf16.mxu0 (!%p279_p8), %vm1267_vm0, %v1266_v4  ;;  %vm501_vm3 = vcmask (!%p279_p8), 257024   ;;  %vm637_vm4 = vcmask (!%p279_p8), 519424   ;;  %vm773_vm5 = vcmask (!%p279_p8), 781824   ;;  %vm909_vm6 = vcmask (!%p279_p8), 1044224  }
  0x21   : > { %p331_p9 = scmp.lt.s32.totalorder (!%p279_p8), %s1047_s10, 3  ;;  %1105 = vmatprep.subr.bf16.mxu1 (!%p279_p8), %v1266_v4  ;;  %1107 = vmatprep.mubr.msk.bf16.mxu1 (!%p279_p8), %vm1267_vm0, %v1266_v4  ;;  %s287_s18 = scalar_lea.vmem (!%p279_p8), [#allocation2], %s1352_s11 }
  0x22   : > { %v1192_v5 = vld [vmem:[%s287_s18] sm:$0xff] (!%p279_p8)   ;;  %s1268_s22 = smov (!%p279_p8), 96   ;;  %s1269_s23 = smov (!%p279_p8), 32  }
  0x23   : > { %v376_v6 = vsel (!%p279_p8), %vm371_vm1, %v1192_v5, 0  ;;  %s294_s24 = scalar_lea.vmem (!%p279_p8), [#allocation3], %s1352_s11  ;;  %s1270_s25 = smov (!%p279_p8), 64  }
  0x24   : > { %1100 = vmatpush3.bf16.xpose.msra.mxu0 (!%p279_p8), %v376_v6  ;;  %v1380_v28 = vld [vmem:[%s294_s24] sm:$0xff] (!%p279_p8)  }
  0x25   : > { %1117 = vmatprep.subr.bf16.mxu0 (!%p279_p8), %v1266_v4  ;;  %1106 = vmatpush3.bf16.msra.mxu1 (!%p279_p8), %v1380_v28 }
  0x26   : > { %1111 = vmatprep.subr.bf16.mxu1 (!%p279_p8), %v1266_v4 }
  0x27   : > { %s1478_s10 = smov (!%p331_p9, %s1047_s10), 3 }
  0x28   : > { %s1048_s12 = sshll.u32 %s1478_s10, 2 }
  0x29   : > { %s337_s20 = scalar_lea.vmem %s1466_s0, %s1048_s12  ;;  %s1408_s28 = scalar_lea.vmem %s1469_s3, %s1048_s12 }
  0x2a   : > { %v353_v7 = vld [vmem:[%s337_s20] sm:$0xf]  ;;  %v354_v8 = vld [vmem:[%s337_s20 + $0x4] sm:$0xf] }
  0x2b   : > { %v355_v9 = vmul.bf16 1043676725, %v353_v7  ;;  %v356_v10 = vmul.bf16 1043676725, %v354_v8 }
  0x2d   : > { %v1051_v11 = vcombine.low %v355_v9, %v356_v10 }
  0x2f   : > { %1102 = vmatmul.mubr.msk.bf16.vlgmr.msra.gmra.mrb[0].mxu0 %vm371_vm1, %v1051_v11 }
  0x30   : > { %1119 = vmatprep.mubr.msk.bf16.mxu0 %vm1267_vm0, %v1266_v4 }
 0x102   : > { %v412_v12 = vpop.f32.mrb[0].mxu0 }
 0x103   : > { %v1103_v13 = vpop.f32.mrb[1].mxu0  ;;  %v420_v14 = vsel %vm419_vm2, %v412_v12, -inf }
 0x104   : > { %421 = vmax.xlane.f32.xlu0 %v420_v14  ;;  %v415_v15 = vpop.f32.mrb[2].mxu0 }
 0x105   : > { %v1104_v16 = vpop.f32.mrb[3].mxu0  ;;  %v423_v17 = vsel %vm419_vm2, %v415_v15, -inf }
 0x108   : > { %424 = vmax.xlane.f32.xlu0 %v423_v17 }
 0x11e   : > { %506 = vrot.lane.b32.xlu0 %v1192_v5, %s1268_s22 }
 0x122   : > { %778 = vrot.lane.b32.xlu0 %v1192_v5, %s1269_s23 }
 0x191   : > { %v422_v18 = vpop.xlane.xlu0 %421 }
 0x192   : > { %v426_v19 = vsub.f32 %v412_v12, %v422_v18 }
 0x194   : > { %v428_v20 = vmul.f32 1.442695, %v426_v19 }
 0x195   : > { %v425_v21 = vpop.xlane.xlu0 %424 }
 0x196   : > { %1194 = vpow2.f32 %v428_v20  ;;  %v427_v22 = vsub.f32 %v415_v15, %v425_v21 }
 0x198   : > { %v430_v23 = vmul.f32 1.442695, %v427_v22 }
 0x199   : > { %v507_v33 = vpop.permute.xlu0 %506 }
 0x19a   : > { %1196 = vpow2.f32 %v430_v23  ;;  %v512_v37 = vsel %vm371_vm1, %v507_v33, 0 }
 0x19d   : > { %v779_v41 = vpop.permute.xlu0 %778 }
 0x19e   : > { %v784_v43 = vsel %vm371_vm1, %v779_v41, 0 }
 0x1a0   : > { %v1195_v24 = vpop.eup %1194 }
 0x1a1   : > { %v432_v25 = vsel %vm419_vm2, %v1195_v24, 0.0 }
 0x1a2   : > { %433 = vadd.xlane.f32.xlu1 %v432_v25 }
 0x1a4   : > { %v1197_v26 = vpop.eup %1196 }
 0x1a5   : > { %v435_v27 = vsel %vm419_vm2, %v1197_v26, 0.0 }
 0x1a6   : > { %436 = vadd.xlane.f32.xlu1 %v435_v27 }
 0x1b7   : > { %504 = vrot.lane.b32.xlu1 %v1051_v11, %s1268_s22 }
 0x1bb   : > { %642 = vrot.lane.b32.xlu1 %v1192_v5, %s1270_s25 }
 0x1bf   : > { %640 = vrot.lane.b32.xlu1 %v1051_v11, %s1270_s25 }
 0x1c3   : > { %776 = vrot.lane.b32.xlu1 %v1051_v11, %s1269_s23 }
 0x22f   : > { %v434_v29 = vpop.xlane.xlu1 %433 }
 0x230   : > { %1198 = vrcp.f32 %v434_v29 }
 0x233   : > { %v437_v30 = vpop.xlane.xlu1 %436 }
 0x234   : > { %1200 = vrcp.f32 %v437_v30 }
 0x237   : > { %v505_v36 = vpop.permute.xlu1 %504 }
 0x23a   : > { %v1199_v31 = vpop.eup %1198 }
 0x23b   : > { %v440_v34 = vmul.f32 %v1199_v31, %v1195_v24  ;;  %v643_v39 = vpop.permute.xlu1 %642 }
 0x23c   : > { %v648_v40 = vsel %vm371_vm1, %v643_v39, 0 }
 0x23e   : > { %v1201_v32 = vpop.eup %1200 }
 0x23f   : > { %v441_v35 = vmul.f32 %v1201_v32, %v1197_v26  ;;  %v641_v42 = vpop.permute.xlu1 %640 }
 0x241   : > { %v442_v38 = vpack.c.bf16 %v441_v35, %v440_v34 }
 0x243   : > { %1108 = vmatmul.mubr.msk.bf16.vlgmr.msra.gmra.mrb[0].mxu1 %vm419_vm2, %v442_v38  ;;  %v777_v44 = vpop.permute.xlu1 %776 }
 0x244   : > { %1112 = vmatpush3.bf16.xpose.msra.mxu1 %v512_v37  ;;  %1113 = vmatprep.mubr.msk.bf16.mxu1 %vm1267_vm0, %v1266_v4 }
 0x245   : > { %1123 = vmatprep.subr.bf16.mxu1 %v1266_v4 }
 0x24b   : > { %1114 = vmatmul.mubr.msk.bf16.vlgmr.msra.gmra.mrb[4].mxu1 %vm371_vm1, %v505_v36 }
 0x24c   : > { %1124 = vmatpush3.bf16.xpose.msra.mxu1 %v648_v40  ;;  %1125 = vmatprep.mubr.msk.bf16.mxu1 %vm1267_vm0, %v1266_v4 }
 0x24d   : > { %1135 = vmatprep.subr.bf16.mxu1 %v1266_v4 }
 0x253   : > { %1126 = vmatmul.mubr.msk.bf16.vlgmr.msra.gmra.mrb[8].mxu1 %vm371_vm1, %v641_v42 }
 0x254   : > { %1136 = vmatpush3.bf16.xpose.msra.mxu1 %v784_v43  ;;  %1137 = vmatprep.mubr.msk.bf16.mxu1 %vm1267_vm0, %v1266_v4 }
 0x25b   : > { %1138 = vmatmul.mubr.msk.bf16.vlgmr.msra.gmra.mrb[12].mxu1 %vm371_vm1, %v777_v44 }
 0x316   : > { %v486_v45 = vpop.f32.mrb[0].mxu1 }
 0x317   : > { %v1075_v46 = vpack.c.bf16 %v486_v45, %v486_v45  ;;  %v1109_v47 = vpop.f32.mrb[1].mxu1 }
 0x318   : > { %v489_v48 = vpop.f32.mrb[2].mxu1 }
 0x319   : > { %502 = vst.msk [vmem:[%s1408_s28] sm:$0xf] %vm501_vm3, %v1075_v46  ;;  %v1076_v49 = vpack.c.bf16 %v489_v48, %v489_v48  ;;  %v1110_v50 = vpop.f32.mrb[3].mxu1 }
 0x31b   : > { %503 = vst.msk [vmem:[%s1408_s28 + $0x4] sm:$0xf] %vm501_vm3, %v1076_v49 }
 0x31e   : > { %v548_v51 = vpop.f32.mrb[4].mxu1 }
 0x31f   : > { %v1115_v52 = vpop.f32.mrb[5].mxu1  ;;  %v555_v53 = vsel %vm419_vm2, %v548_v51, -inf }
 0x320   : > { %556 = vmax.xlane.f32.xlu0 %v555_v53  ;;  %v551_v54 = vpop.f32.mrb[6].mxu1 }
 0x321   : > { %v1116_v55 = vpop.f32.mrb[7].mxu1  ;;  %v558_v56 = vsel %vm419_vm2, %v551_v54, -inf }
 0x322   : > { %559 = vmax.xlane.f32.xlu1 %v558_v56 }
 0x326   : > { %v684_v57 = vpop.f32.mrb[8].mxu1 }
 0x327   : > { %v1127_v58 = vpop.f32.mrb[9].mxu1  ;;  %v691_v59 = vsel %vm419_vm2, %v684_v57, -inf }
 0x328   : > { %692 = vmax.xlane.f32.xlu0 %v691_v59  ;;  %v687_v60 = vpop.f32.mrb[10].mxu1 }
 0x329   : > { %v1128_v61 = vpop.f32.mrb[11].mxu1  ;;  %v694_v62 = vsel %vm419_vm2, %v687_v60, -inf }
 0x32c   : > { %695 = vmax.xlane.f32.xlu0 %v694_v62 }
 0x32e   : > { %v820_v63 = vpop.f32.mrb[12].mxu1 }
 0x32f   : > { %v1139_v0 = vpop.f32.mrb[13].mxu1  ;;  %v827_v1 = vsel %vm419_vm2, %v820_v63, -inf }
 0x330   : > { %828 = vmax.xlane.f32.xlu0 %v827_v1  ;;  %v823_v2 = vpop.f32.mrb[14].mxu1 }
 0x331   : > { %v830_v3 = vsel %vm419_vm2, %v823_v2, -inf  ;;  %v1140_v5 = vpop.f32.mrb[15].mxu1 }
 0x332   : > { %831 = vmax.xlane.f32.xlu1 %v830_v3 }
 0x3ad   : > { %v557_v6 = vpop.xlane.xlu0 %556 }
 0x3ae   : > { %v561_v7 = vsub.f32 %v548_v51, %v557_v6 }
 0x3af   : > { %v560_v8 = vpop.xlane.xlu1 %559 }
 0x3b0   : > { %v563_v9 = vmul.f32 1.442695, %v561_v7  ;;  %v562_v10 = vsub.f32 %v551_v54, %v560_v8 }
 0x3b2   : > { %1202 = vpow2.f32 %v563_v9  ;;  %v565_v11 = vmul.f32 1.442695, %v562_v10 }
 0x3b4   : > { %1204 = vpow2.f32 %v565_v11 }
 0x3b5   : > { %v693_v12 = vpop.xlane.xlu0 %692 }
 0x3b6   : > { %v697_v13 = vsub.f32 %v684_v57, %v693_v12 }
 0x3b8   : > { %v699_v14 = vmul.f32 1.442695, %v697_v13 }
 0x3b9   : > { %v696_v15 = vpop.xlane.xlu0 %695 }
 0x3ba   : > { %1206 = vpow2.f32 %v699_v14  ;;  %v698_v16 = vsub.f32 %v687_v60, %v696_v15 }
 0x3bc   : > { %v1203_v17 = vpop.eup %1202  ;;  %v701_v18 = vmul.f32 1.442695, %v698_v16 }
 0x3bd   : > { %v829_v19 = vpop.xlane.xlu0 %828  ;;  %v567_v20 = vsel %vm419_vm2, %v1203_v17, 0.0 }
 0x3be   : > { %v1205_v21 = vpop.eup %1204  ;;  %1208 = vpow2.f32 %v701_v18  ;;  %v833_v22 = vsub.f32 %v820_v63, %v829_v19  ;;  %568 = vadd.xlane.f32.xlu0 %v567_v20 }
 0x3bf   : > { %v570_v23 = vsel %vm419_vm2, %v1205_v21, 0.0  ;;  %v832_v32 = vpop.xlane.xlu1 %831 }
 0x3c0   : > { %v835_v24 = vmul.f32 1.442695, %v833_v22  ;;  %571 = vadd.xlane.f32.xlu1 %v570_v23  ;;  %v834_v33 = vsub.f32 %v823_v2, %v832_v32 }
 0x3c2   : > { %1210 = vpow2.f32 %v835_v24  ;;  %v837_v34 = vmul.f32 1.442695, %v834_v33 }
 0x3c4   : > { %v1207_v25 = vpop.eup %1206  ;;  %1212 = vpow2.f32 %v837_v34 }
 0x3c5   : > { %v703_v26 = vsel %vm419_vm2, %v1207_v25, 0.0 }
 0x3c6   : > { %704 = vadd.xlane.f32.xlu0 %v703_v26 }
 0x3c8   : > { %v1209_v27 = vpop.eup %1208 }
 0x3c9   : > { %v706_v29 = vsel %vm419_vm2, %v1209_v27, 0.0 }
 0x3ca   : > { %707 = vadd.xlane.f32.xlu1 %v706_v29 }
 0x3cc   : > { %v1211_v30 = vpop.eup %1210 }
 0x3cd   : > { %v839_v31 = vsel %vm419_vm2, %v1211_v30, 0.0 }
 0x3ce   : > { %840 = vadd.xlane.f32.xlu0 %v839_v31  ;;  %v1213_v35 = vpop.eup %1212 }
 0x3cf   : > { %v842_v36 = vsel %vm419_vm2, %v1213_v35, 0.0 }
 0x3db   : > { %714 = vrot.lane.b32.xlu1 %v1380_v28, %s1270_s25 }
 0x3e4   : > { %578 = vrot.lane.b32.xlu0 %v1380_v28, %s1268_s22 }
 0x3ff   : > { %843 = vadd.xlane.f32.xlu1 %v842_v36 }
 0x410   : > { %850 = vrot.lane.b32.xlu1 %v1380_v28, %s1269_s23 }
 0x44b   : > { %v569_v38 = vpop.xlane.xlu0 %568 }
 0x44d   : > { %v572_v37 = vpop.xlane.xlu1 %571 }
 0x44e   : > { %1214 = vrcp.f32 %v572_v37 }
 0x44f   : > { %1216 = vrcp.f32 %v569_v38 }
 0x453   : > { %v705_v39 = vpop.xlane.xlu0 %704 }
 0x457   : > { %v708_v40 = vpop.xlane.xlu1 %707 }
 0x458   : > { %1218 = vrcp.f32 %v708_v40  ;;  %v1215_v41 = vpop.eup %1214 }
 0x459   : > { %1220 = vrcp.f32 %v705_v39  ;;  %v1217_v43 = vpop.eup %1216  ;;  %v576_v44 = vmul.f32 %v1215_v41, %v1205_v21 }
 0x45a   : > { %v575_v45 = vmul.f32 %v1217_v43, %v1203_v17 }
 0x45b   : > { %v841_v42 = vpop.xlane.xlu0 %840  ;;  %v715_v28 = vpop.permute.xlu1 %714 }
 0x45c   : > { %v577_v47 = vpack.c.bf16 %v576_v44, %v575_v45  ;;  %1222 = vrcp.f32 %v841_v42 }
 0x45f   : > { %v579_v46 = vpop.permute.xlu0 %578 }
 0x460   : > { %1118 = vmatpush3.bf16.msra.mxu0 %v579_v46 }
 0x461   : > { %1129 = vmatprep.subr.bf16.mxu0 %v1266_v4 }
 0x462   : > { %v1219_v48 = vpop.eup %1218 }
 0x463   : > { %1120 = vmatmul.mubr.msk.bf16.vlgmr.msra.gmra.mrb[4].mxu0 %vm419_vm2, %v577_v47  ;;  %v1221_v49 = vpop.eup %1220  ;;  %v712_v50 = vmul.f32 %v1219_v48, %v1209_v27 }
 0x464   : > { %1130 = vmatpush3.bf16.msra.mxu0 %v715_v28  ;;  %1131 = vmatprep.mubr.msk.bf16.mxu0 %vm1267_vm0, %v1266_v4  ;;  %v711_v51 = vmul.f32 %v1221_v49, %v1207_v25 }
 0x465   : > { %1141 = vmatprep.subr.bf16.mxu0 %v1266_v4 }
 0x466   : > { %v713_v52 = vpack.c.bf16 %v712_v50, %v711_v51  ;;  %v1223_v55 = vpop.eup %1222 }
 0x467   : > { %v847_v57 = vmul.f32 %v1223_v55, %v1211_v30 }
 0x46b   : > { %1132 = vmatmul.mubr.msk.bf16.vlgmr.msra.gmra.mrb[8].mxu0 %vm419_vm2, %v713_v52 }
 0x46c   : > { %1143 = vmatprep.mubr.msk.bf16.mxu0 %vm1267_vm0, %v1266_v4 }
 0x48c   : > { %v844_v53 = vpop.xlane.xlu1 %843 }
 0x48d   : > { %1224 = vrcp.f32 %v844_v53 }
 0x490   : > { %v851_v54 = vpop.permute.xlu1 %850 }
 0x491   : > { %1142 = vmatpush3.bf16.msra.mxu0 %v851_v54 }
 0x497   : > { %v1225_v56 = vpop.eup %1224 }
 0x498   : > { %v848_v58 = vmul.f32 %v1225_v56, %v1213_v35 }
 0x49a   : > { %v849_v59 = vpack.c.bf16 %v848_v58, %v847_v57 }
 0x49c   : > { %1144 = vmatmul.mubr.msk.bf16.vlgmr.msra.gmra.mrb[12].mxu0 %vm419_vm2, %v849_v59 }
 0x536   : > { %v618_v60 = vpop.f32.mrb[4].mxu0 }
 0x537   : > { %v1077_v61 = vpack.c.bf16 %v618_v60, %v618_v60  ;;  %v1121_v62 = vpop.f32.mrb[5].mxu0 }
 0x538   : > { %v621_v63 = vpop.f32.mrb[6].mxu0 }
 0x539   : > { %v1078_v0 = vpack.c.bf16 %v621_v63, %v621_v63  ;;  %631 = vrot.lane.b32.xlu1 %v1077_v61, %s1269_s23  ;;  %v1122_v4 = vpop.f32.mrb[7].mxu0 }
 0x53b   : > { %633 = vrot.lane.b32.xlu0 %v1078_v0, %s1269_s23 }
 0x53e   : > { %v754_v1 = vpop.f32.mrb[8].mxu0 }
 0x53f   : > { %v1079_v2 = vpack.c.bf16 %v754_v1, %v754_v1  ;;  %v1133_v3 = vpop.f32.mrb[9].mxu0 }
 0x540   : > { %v757_v5 = vpop.f32.mrb[10].mxu0 }
 0x541   : > { %v1080_v6 = vpack.c.bf16 %v757_v5, %v757_v5  ;;  %767 = vrot.lane.b32.xlu1 %v1079_v2, %s1270_s25  ;;  %v1134_v7 = vpop.f32.mrb[11].mxu0 }
 0x543   : > { %769 = vrot.lane.b32.xlu0 %v1080_v6, %s1270_s25 }
 0x56f   : > { %v890_v8 = vpop.f32.mrb[12].mxu0 }
 0x570   : > { %v1081_v9 = vpack.c.bf16 %v890_v8, %v890_v8  ;;  %v1145_v10 = vpop.f32.mrb[13].mxu0 }
 0x571   : > { %v893_v11 = vpop.f32.mrb[14].mxu0 }
 0x572   : > { %v1082_v12 = vpack.c.bf16 %v893_v11, %v893_v11  ;;  %903 = vrot.lane.b32.xlu1 %v1081_v9, %s1268_s22  ;;  %v1146_v13 = vpop.f32.mrb[15].mxu0 }
 0x574   : > { %905 = vrot.lane.b32.xlu0 %v1082_v12, %s1268_s22 }
 0x5ab   : > { %v632_v14 = vpop.permute.xlu1 %631 }
 0x5ac   : > { %638 = vst.msk [vmem:[%s1408_s28] sm:$0xf] %vm637_vm4, %v632_v14 }
 0x5ad   : > { %v634_v15 = vpop.permute.xlu0 %633 }
 0x5ae   : > { %639 = vst.msk [vmem:[%s1408_s28 + $0x4] sm:$0xf] %vm637_vm4, %v634_v15 }
 0x5b3   : > { %v768_v16 = vpop.permute.xlu1 %767 }
 0x5b4   : > { %774 = vst.msk [vmem:[%s1408_s28] sm:$0xf] %vm773_vm5, %v768_v16 }
 0x5b5   : > { %v770_v17 = vpop.permute.xlu0 %769 }
 0x5b6   : > { %775 = vst.msk [vmem:[%s1408_s28 + $0x4] sm:$0xf] %vm773_vm5, %v770_v17 }
 0x5e4   : > { %v904_v18 = vpop.permute.xlu1 %903 }
 0x5e5   : > { %910 = vst.msk [vmem:[%s1408_s28] sm:$0xf] %vm909_vm6, %v904_v18 }
 0x5e6   : > { %v906_v19 = vpop.permute.xlu0 %905 }
 0x5e7   : > { %911 = vst.msk [vmem:[%s1408_s28 + $0x4] sm:$0xf] %vm909_vm6, %v906_v19 }
 0x5e8 PF: > { %s13_s16 = sadd.s32 1, %s1264_s16   ;;  %s1471_s12 = smov %s1252_s13 }
 0x5e9   : > { %p10_p10 = scmp.ge.s32.totalorder %s13_s16, 4   ;;  %s1472_s13 = smov %s1330_s21 }
 0x5ea   : > { %s1473_s14 = smov %s1260_s15  ;;  %s1474_s15 = smov %s1476_s17 }
 0x5eb   :  { %12 = sbr.rel (!%p10_p10) target bundleno = 3 (0x3), region = 160 }

// kernel: language_model_forward.27
= control target key start
LH: loop header
LB: loop body
LE: loop exit
PB: predicated region body
PF: predicated region fallthrough
CT: control target
= control target key end

     0   :  { %s1447_s21 = smov 0   ;;  %s1688_s0 = inlined_call_operand.vmem [shape: bf16[32,1024], index: 0, kind: input, shape index: {}]   ;;  %s1689_s1 = inlined_call_operand.vmem [shape: bf16[1024,128], index: 1, kind: input, shape index: {}]   ;;  %s1690_s2 = inlined_call_operand.vmem [shape: f32[1,128], index: 2, kind: input, shape index: {}]   ;;  %s1691_s3 = inlined_call_operand.vmem [shape: bf16[32,128], index: 3, kind: input, shape index: {}]   ;;  %s1692_s4 = inlined_call_operand.vmem [shape: f32[1,128], index: 4, kind: input, shape index: {}]   ;;  %s1693_s5 = inlined_call_operand.vmem [shape: f32[1,128], index: 5, kind: input, shape index: {}]   ;;  %s1694_s6 = inlined_call_operand.vmem [shape: bf16[32,128], index: 6, kind: output, shape index: {}]  }
   0x1 LB: > { %s1137_s22 = sadd.s32 4294967295, %s1410_s21   ;;  %p1141_p0 = scmp.ge.s32.totalorder %s1410_s21, 1  ;;  %s1410_s21 = sphi %s1447_s21, %s16_s21  }
   0x2   : > { %p225_p1 = scmp.lt.s32.totalorder %s1410_s21, 3 }
   0x4   : > { %p226_p2 = pnand %p1141_p0, %p225_p1 }
   0x5   : > { %v1336_v0 = vld [vmem:[%s1689_s1 + $0x40] sm:$0xff] (!%p226_p2)   ;;  %v1340_v4 = vld [vmem:[%s1689_s1 + $0x48] sm:$0xff] (!%p226_p2)   ;;  %v1344_v8 = vld [vmem:[%s1689_s1 + $0x50] sm:$0xff] (!%p226_p2)   ;;  %s1142_s9 = sshll.u32 (!%p226_p2), %s1137_s22, 1 }
   0x6   : > { %229 = sbr.rel (%p226_p2) target bundleno = 610 (0x262), region = 44  ;;  %v1337_v1 = vld [vmem:[%s1689_s1 + $0xc0] sm:$0xff] (!%p226_p2)   ;;  %1240 = vmatprep.subr.bf16.mxu0 (!%p226_p2), %v1336_v0  ;;  %v1341_v5 = vld [vmem:[%s1689_s1 + $0xc8] sm:$0xff] (!%p226_p2)   ;;  %v1345_v9 = vld [vmem:[%s1689_s1 + $0xd0] sm:$0xff] (!%p226_p2)   ;;  %p262_p3 = scmp.lt.s32.totalorder (!%p226_p2), %s1142_s9, 3 }
   0x7   : > { %v1338_v2 = vld [vmem:[%s1689_s1] sm:$0xff] (!%p226_p2)   ;;  %1262 = vmatprep.subr.bf16.mxu1 (!%p226_p2), %v1337_v1  ;;  %v1342_v6 = vld [vmem:[%s1689_s1 + $0x8] sm:$0xff] (!%p226_p2)   ;;  %v1346_v10 = vld [vmem:[%s1689_s1 + $0x10] sm:$0xff] (!%p226_p2)  }
   0x8   : > { %v1339_v3 = vld [vmem:[%s1689_s1 + $0x80] sm:$0xff] (!%p226_p2)   ;;  %1241 = vmatpush3.bf16.msra.mxu0 (!%p226_p2), %v1338_v2  ;;  %v1343_v7 = vld [vmem:[%s1689_s1 + $0x88] sm:$0xff] (!%p226_p2)   ;;  %v1347_v11 = vld [vmem:[%s1689_s1 + $0x90] sm:$0xff] (!%p226_p2)  }
   0x9   : > { %1263 = vmatpush3.bf16.msra.mxu1 (!%p226_p2), %v1339_v3  ;;  %1242 = vmatprep.subr.bf16.mxu0 (!%p226_p2), %v1340_v4  ;;  %v1348_v12 = vld [vmem:[%s1689_s1 + $0x58] sm:$0xff] (!%p226_p2)   ;;  %v1352_v16 = vld [vmem:[%s1689_s1 + $0x60] sm:$0xff] (!%p226_p2)   ;;  %v1356_v20 = vld [vmem:[%s1689_s1 + $0x68] sm:$0xff] (!%p226_p2)  }
   0xa   : > { %1264 = vmatprep.subr.bf16.mxu1 (!%p226_p2), %v1341_v5  ;;  %v1349_v13 = vld [vmem:[%s1689_s1 + $0xd8] sm:$0xff] (!%p226_p2)   ;;  %v1353_v17 = vld [vmem:[%s1689_s1 + $0xe0] sm:$0xff] (!%p226_p2)   ;;  %v1357_v21 = vld [vmem:[%s1689_s1 + $0xe8] sm:$0xff] (!%p226_p2)  }
   0xb   : > { %v1350_v14 = vld [vmem:[%s1689_s1 + $0x18] sm:$0xff] (!%p226_p2)   ;;  %v1354_v18 = vld [vmem:[%s1689_s1 + $0x20] sm:$0xff] (!%p226_p2)   ;;  %v1358_v22 = vld [vmem:[%s1689_s1 + $0x28] sm:$0xff] (!%p226_p2)  }
   0xc   : > { %1243 = vmatpush3.bf16.msra.mxu0 (!%p226_p2), %v1342_v6  ;;  %v1351_v15 = vld [vmem:[%s1689_s1 + $0x98] sm:$0xff] (!%p226_p2)   ;;  %v1355_v19 = vld [vmem:[%s1689_s1 + $0xa0] sm:$0xff] (!%p226_p2)   ;;  %v1359_v23 = vld [vmem:[%s1689_s1 + $0xa8] sm:$0xff] (!%p226_p2)  }
   0xd   : > { %1265 = vmatpush3.bf16.msra.mxu1 %v1343_v7  ;;  %1244 = vmatprep.subr.bf16.mxu0 %v1344_v8  ;;  %s1696_s9 = smov (!%p262_p3, %s1142_s9), 3  ;;  %v1360_v24 = vld [vmem:[%s1689_s1 + $0x70] sm:$0xff]   ;;  %v1364_v28 = vld [vmem:[%s1689_s1 + $0x78] sm:$0xff]   ;;  %v1368_v40 = vld [vmem:[%s1689_s1 + $0x140] sm:$0xff]  }
   0xe   : > { %1266 = vmatprep.subr.bf16.mxu1 %v1345_v9  ;;  %v1361_v25 = vld [vmem:[%s1689_s1 + $0xf0] sm:$0xff]   ;;  %s1228_s10 = sshll.u32 %s1696_s9, 5  ;;  %v1365_v29 = vld [vmem:[%s1689_s1 + $0xf8] sm:$0xff]   ;;  %v1369_v41 = vld [vmem:[%s1689_s1 + $0x1c0] sm:$0xff]  }
   0xf   : > { %v1362_v26 = vld [vmem:[%s1689_s1 + $0x30] sm:$0xff]   ;;  %s1553_s18 = scalar_lea.vmem %s1688_s0, %s1228_s10  ;;  %v1366_v30 = vld [vmem:[%s1689_s1 + $0x38] sm:$0xff]   ;;  %v1370_v42 = vld [vmem:[%s1689_s1 + $0x100] sm:$0xff]  }
  0x10   : > { %1245 = vmatpush3.bf16.msra.mxu0 %v1346_v10  ;;  %v1363_v27 = vld [vmem:[%s1689_s1 + $0xb0] sm:$0xff]   ;;  %v1367_v31 = vld [vmem:[%s1689_s1 + $0xb8] sm:$0xff]   ;;  %v281_v32 = vld [vmem:[%s1553_s18] sm:$0xff] }
  0x11   : > { %1267 = vmatpush3.bf16.msra.mxu1 %v1347_v11  ;;  %1246 = vmatprep.subr.bf16.mxu0 %v1348_v12  ;;  %v285_v33 = vld [vmem:[%s1553_s18 + $0x20] sm:$0xff]  ;;  %v282_v34 = vld [vmem:[%s1553_s18 + $0x8] sm:$0xff]  ;;  %v1376_v48 = vld [vmem:[%s1689_s1 + $0x150] sm:$0xff]  }
  0x12   : > { %1268 = vmatprep.subr.bf16.mxu1 %v1349_v13  ;;  %v1150_v35 = vcombine.low %v281_v32, %v285_v33  ;;  %v1151_v36 = vcombine.high %v281_v32, %v285_v33  ;;  %v286_v37 = vld [vmem:[%s1553_s18 + $0x28] sm:$0xff]  ;;  %v1371_v43 = vld [vmem:[%s1689_s1 + $0x180] sm:$0xff]   ;;  %v1377_v49 = vld [vmem:[%s1689_s1 + $0x1d0] sm:$0xff]  }
  0x13   : > { %v1152_v38 = vcombine.low %v282_v34, %v286_v37  ;;  %v1153_v39 = vcombine.high %v282_v34, %v286_v37  ;;  %v1372_v44 = vld [vmem:[%s1689_s1 + $0x148] sm:$0xff]   ;;  %v1378_v50 = vld [vmem:[%s1689_s1 + $0x110] sm:$0xff]   ;;  %v1380_v52 = vld [vmem:[%s1689_s1 + $0x158] sm:$0xff]  }
  0x14   : > { %1247 = vmatpush3.bf16.msra.mxu0 %v1350_v14  ;;  %880 = vmatprep.mubr.bf16.mxu0 %v1151_v36  ;;  %v1373_v45 = vld [vmem:[%s1689_s1 + $0x1c8] sm:$0xff]   ;;  %v1379_v51 = vld [vmem:[%s1689_s1 + $0x190] sm:$0xff]   ;;  %v1381_v53 = vld [vmem:[%s1689_s1 + $0x1d8] sm:$0xff]  }
  0x15   : > { %1269 = vmatpush3.bf16.msra.mxu1 %v1351_v15  ;;  %1248 = vmatprep.subr.bf16.mxu0 %v1352_v16  ;;  %v1374_v46 = vld [vmem:[%s1689_s1 + $0x108] sm:$0xff]   ;;  %v1382_v54 = vld [vmem:[%s1689_s1 + $0x118] sm:$0xff]   ;;  %v1384_v56 = vld [vmem:[%s1689_s1 + $0x160] sm:$0xff]  }
  0x16   : > { %1270 = vmatprep.subr.bf16.mxu1 %v1353_v17  ;;  %921 = vmatprep.mubr.bf16.mxu1 %v1153_v39  ;;  %v1375_v47 = vld [vmem:[%s1689_s1 + $0x188] sm:$0xff]   ;;  %v1383_v55 = vld [vmem:[%s1689_s1 + $0x198] sm:$0xff]   ;;  %v1385_v57 = vld [vmem:[%s1689_s1 + $0x1e0] sm:$0xff]  }
  0x17   : > { %v1386_v58 = vld [vmem:[%s1689_s1 + $0x120] sm:$0xff]   ;;  %v1388_v60 = vld [vmem:[%s1689_s1 + $0x168] sm:$0xff]   ;;  %v1392_v0 = vld [vmem:[%s1689_s1 + $0x170] sm:$0xff]  }
  0x18   : > { %1249 = vmatpush3.bf16.msra.mxu0 %v1354_v18  ;;  %v1387_v59 = vld [vmem:[%s1689_s1 + $0x1a0] sm:$0xff]   ;;  %v1389_v61 = vld [vmem:[%s1689_s1 + $0x1e8] sm:$0xff]   ;;  %v1393_v1 = vld [vmem:[%s1689_s1 + $0x1f0] sm:$0xff]  }
  0x19   : > { %1271 = vmatpush3.bf16.msra.mxu1 %v1355_v19  ;;  %1250 = vmatprep.subr.bf16.mxu0 %v1356_v20  ;;  %v1390_v62 = vld [vmem:[%s1689_s1 + $0x128] sm:$0xff]   ;;  %v1394_v2 = vld [vmem:[%s1689_s1 + $0x130] sm:$0xff]   ;;  %v1396_v4 = vld [vmem:[%s1689_s1 + $0x178] sm:$0xff]  }
  0x1a   : > { %1272 = vmatprep.subr.bf16.mxu1 %v1357_v21  ;;  %v1391_v63 = vld [vmem:[%s1689_s1 + $0x1a8] sm:$0xff]   ;;  %v1395_v3 = vld [vmem:[%s1689_s1 + $0x1b0] sm:$0xff]   ;;  %v1397_v5 = vld [vmem:[%s1689_s1 + $0x1f8] sm:$0xff]  }
  0x1b   : > { %v1398_v6 = vld [vmem:[%s1689_s1 + $0x138] sm:$0xff]   ;;  %v283_v8 = vld [vmem:[%s1553_s18 + $0x10] sm:$0xff]  ;;  %v1149_v18 = vld [vmem:[%s1690_s2] ss:$0 sm:$0xff] }
  0x1c   : > { %1251 = vmatpush3.bf16.msra.mxu0 %v1358_v22  ;;  %v1399_v7 = vld [vmem:[%s1689_s1 + $0x1b8] sm:$0xff]   ;;  %v287_v9 = vld [vmem:[%s1553_s18 + $0x30] sm:$0xff] }
  0x1d   : > { %1273 = vmatpush3.bf16.msra.mxu1 %v1359_v23  ;;  %1252 = vmatprep.subr.bf16.mxu0 %v1360_v24  ;;  %v1154_v10 = vcombine.low %v283_v8, %v287_v9  ;;  %v1155_v11 = vcombine.high %v283_v8, %v287_v9  ;;  %v284_v12 = vld [vmem:[%s1553_s18 + $0x18] sm:$0xff] }
  0x1e   : > { %1274 = vmatprep.subr.bf16.mxu1 %v1361_v25  ;;  %v288_v13 = vld [vmem:[%s1553_s18 + $0x38] sm:$0xff]  ;;  %s1146_s18 = sshll.u32 %s1696_s9, 2 }
  0x1f   : > { %v1156_v14 = vcombine.low %v284_v12, %v288_v13  ;;  %v1157_v15 = vcombine.high %v284_v12, %v288_v13  ;;  %s272_s30 = scalar_lea.vmem %s1691_s3, %s1146_s18  ;;  %s278_s14 = scalar_lea.vmem %s1694_s6, %s1146_s18 }
  0x20   : > { %1253 = vmatpush3.bf16.msra.mxu0 %v1362_v26  ;;  %v1232_v36 = vld [vmem:[%s272_s30] sm:$0xff]  }
  0x21   : > { %1275 = vmatpush3.bf16.msra.mxu1 %v1363_v27  ;;  %1254 = vmatprep.subr.bf16.mxu0 %v1364_v28 }
  0x22   : > { %1276 = vmatprep.subr.bf16.mxu1 %v1365_v29 }
  0x24   : > { %1255 = vmatpush3.bf16.msra.mxu0 %v1366_v30 }
  0x25   : > { %1277 = vmatpush3.bf16.msra.mxu1 %v1367_v31  ;;  %1284 = vmatprep.subr.bf16.mxu0 %v1368_v40 }
  0x26   : > { %1306 = vmatprep.subr.bf16.mxu1 %v1369_v41 }
  0x27   : > { %881 = vmatmul.mubr.bf16.vlgmr.msra.gmra.mrb[0].mxu0 %v1150_v35 }
  0x28   : > { %922 = vmatmul.mubr.bf16.vlgmr.msra.gmra.mrb[0].mxu1 %v1152_v38  ;;  %1285 = vmatpush3.bf16.msra.mxu0 %v1370_v42 }
  0x29   : > { %1307 = vmatpush3.bf16.msra.mxu1 %v1371_v43  ;;  %1286 = vmatprep.subr.bf16.mxu0 %v1372_v44 }
  0x2a   : > { %1308 = vmatprep.subr.bf16.mxu1 %v1373_v45  ;;  %962 = vmatprep.mubr.bf16.mxu0 %v1155_v11 }
  0x2b   : > { %1003 = vmatprep.mubr.bf16.mxu1 %v1157_v15 }
  0x2c   : > { %1287 = vmatpush3.bf16.msra.mxu0 %v1374_v46  ;;  %v1233_v46 = vunpack.c.l.bf16 %v1232_v36 }
  0x2d   : > { %1309 = vmatpush3.bf16.msra.mxu1 %v1375_v47  ;;  %1288 = vmatprep.subr.bf16.mxu0 %v1376_v48 }
  0x2e   : > { %1310 = vmatprep.subr.bf16.mxu1 %v1377_v49 }
  0x30   : > { %1289 = vmatpush3.bf16.msra.mxu0 %v1378_v50 }
  0x31   : > { %1311 = vmatpush3.bf16.msra.mxu1 %v1379_v51  ;;  %1290 = vmatprep.subr.bf16.mxu0 %v1380_v52  ;;  %v1234_v52 = vunpack.c.h.bf16 %v1232_v36 }
  0x32   : > { %1312 = vmatprep.subr.bf16.mxu1 %v1381_v53 }
  0x34   : > { %1291 = vmatpush3.bf16.msra.mxu0 %v1382_v54 }
  0x35   : > { %1313 = vmatpush3.bf16.msra.mxu1 %v1383_v55  ;;  %1292 = vmatprep.subr.bf16.mxu0 %v1384_v56 }
  0x36   : > { %1314 = vmatprep.subr.bf16.mxu1 %v1385_v57 }
  0x38   : > { %1293 = vmatpush3.bf16.msra.mxu0 %v1386_v58 }
  0x39   : > { %1315 = vmatpush3.bf16.msra.mxu1 %v1387_v59  ;;  %1294 = vmatprep.subr.bf16.mxu0 %v1388_v60 }
  0x3a   : > { %1316 = vmatprep.subr.bf16.mxu1 %v1389_v61 }
  0x3c   : > { %1295 = vmatpush3.bf16.msra.mxu0 %v1390_v62 }
  0x3d   : > { %1317 = vmatpush3.bf16.msra.mxu1 %v1391_v63  ;;  %1296 = vmatprep.subr.bf16.mxu0 %v1392_v0 }
  0x3e   : > { %1318 = vmatprep.subr.bf16.mxu1 %v1393_v1 }
  0x40   : > { %1297 = vmatpush3.bf16.msra.mxu0 %v1394_v2 }
  0x41   : > { %1319 = vmatpush3.bf16.msra.mxu1 %v1395_v3  ;;  %1298 = vmatprep.subr.bf16.mxu0 %v1396_v4 }
  0x42   : > { %1320 = vmatprep.subr.bf16.mxu1 %v1397_v5 }
  0x44   : > { %1299 = vmatpush3.bf16.msra.mxu0 %v1398_v6  ;;  %v1222_v6 = vld [vmem:[%s1692_s4] ss:$0 sm:$0xff] }
  0x45   : > { %1321 = vmatpush3.bf16.msra.mxu1 %v1399_v7 }
  0x47   : > { %963 = vmatmul.mubr.bf16.vlgmr.msra.gmra.mrb[4].mxu0 %v1154_v10  ;;  %v1223_v10 = vld [vmem:[%s1693_s5] ss:$0 sm:$0xff] }
  0x48   : > { %1004 = vmatmul.mubr.bf16.vlgmr.msra.gmra.mrb[4].mxu1 %v1156_v14 }
  0xfa   : > { %v1256_v16 = vpop.f32.mrb[0].mxu0 }
  0xfb   : > { %v1278_v17 = vpop.f32.mrb[0].mxu1  ;;  %v1257_v19 = vpop.f32.mrb[1].mxu0 }
  0xfc   : > { %v1258_v20 = vadd.f32 %v1257_v19, %v1256_v16  ;;  %v1279_v21 = vpop.f32.mrb[1].mxu1  ;;  %v1259_v22 = vpop.f32.mrb[2].mxu0 }
  0xfd   : > { %v1280_v23 = vadd.f32 %v1279_v21, %v1278_v17  ;;  %v1281_v24 = vpop.f32.mrb[2].mxu1  ;;  %v1260_v25 = vpop.f32.mrb[3].mxu0 }
  0xfe   : > { %v883_v26 = vadd.f32 %v1258_v20, %v1149_v18  ;;  %v1261_v27 = vadd.f32 %v1260_v25, %v1259_v22  ;;  %v1282_v28 = vpop.f32.mrb[3].mxu1 }
  0xff   : > { %v1283_v29 = vadd.f32 %v1282_v28, %v1281_v24 }
 0x100   : > { %v924_v30 = vadd.f32 %v1280_v23, %v883_v26  ;;  %v886_v31 = vadd.f32 %v1261_v27, %v1149_v18 }
 0x102   : > { %v927_v32 = vadd.f32 %v1283_v29, %v886_v31 }
 0x11a   : > { %v1300_v33 = vpop.f32.mrb[4].mxu0 }
 0x11b   : > { %v1322_v34 = vpop.f32.mrb[4].mxu1  ;;  %v1301_v35 = vpop.f32.mrb[5].mxu0 }
 0x11c   : > { %v1302_v37 = vadd.f32 %v1301_v35, %v1300_v33  ;;  %v1323_v38 = vpop.f32.mrb[5].mxu1  ;;  %v1303_v39 = vpop.f32.mrb[6].mxu0 }
 0x11d   : > { %v1324_v40 = vadd.f32 %v1323_v38, %v1322_v34  ;;  %v1325_v41 = vpop.f32.mrb[6].mxu1  ;;  %v1304_v42 = vpop.f32.mrb[7].mxu0 }
 0x11e   : > { %v965_v43 = vadd.f32 %v1302_v37, %v924_v30  ;;  %v1305_v44 = vadd.f32 %v1304_v42, %v1303_v39  ;;  %v1326_v45 = vpop.f32.mrb[7].mxu1 }
 0x11f   : > { %v1327_v47 = vadd.f32 %v1326_v45, %v1325_v41 }
 0x120   : > { %v1006_v48 = vadd.f32 %v1324_v40, %v965_v43  ;;  %v968_v49 = vadd.f32 %v1305_v44, %v927_v32 }
 0x122   : > { %v1009_v50 = vadd.f32 %v1327_v47, %v968_v49  ;;  %v1016_v51 = vadd.f32 %v1233_v46, %v1006_v48 }
 0x124   : > { %1020 = vadd.xlane.f32.xlu0 %v1016_v51  ;;  %v1017_v53 = vadd.f32 %v1234_v52, %v1009_v50 }
 0x128   : > { %1022 = vadd.xlane.f32.xlu0 %v1017_v53 }
 0x1b1   : > { %v1021_v54 = vpop.xlane.xlu0 %1020 }
 0x1b2   : > { %v1025_v55 = vmul.f32 0.0078125, %v1021_v54 }
 0x1b4   : > { %v1027_v56 = vsub.f32 %v1016_v51, %v1025_v55 }
 0x1b5   : > { %v1023_v57 = vpop.xlane.xlu0 %1022 }
 0x1b6   : > { %v1026_v58 = vmul.f32 0.0078125, %v1023_v57  ;;  %v1029_v59 = vmul.f32 %v1027_v56, %v1027_v56 }
 0x1b8   : > { %v1028_v60 = vsub.f32 %v1017_v53, %v1026_v58  ;;  %1031 = vadd.xlane.f32.xlu1 %v1029_v59 }
 0x1ba   : > { %v1030_v61 = vmul.f32 %v1028_v60, %v1028_v60 }
 0x1bc   : > { %1033 = vadd.xlane.f32.xlu1 %v1030_v61 }
 0x245   : > { %v1032_v62 = vpop.xlane.xlu1 %1031 }
 0x246   : > { %v1035_v63 = vmul.f32 0.0078125, %v1032_v62 }
 0x248   : > { %v1037_v0 = vadd.f32 1e-05, %v1035_v63 }
 0x249   : > { %v1034_v1 = vpop.xlane.xlu1 %1033 }
 0x24a   : > { %1400 = vrsqrt.f32 %v1037_v0  ;;  %v1036_v2 = vmul.f32 0.0078125, %v1034_v1 }
 0x24c   : > { %v1038_v3 = vadd.f32 1e-05, %v1036_v2 }
 0x24e   : > { %1402 = vrsqrt.f32 %v1038_v3 }
 0x254   : > { %v1401_v4 = vpop.eup %1400 }
 0x255   : > { %v1041_v5 = vmul.f32 %v1401_v4, %v1027_v56 }
 0x257   : > { %v1049_v8 = vmul.f32 %v1222_v6, %v1041_v5 }
 0x258   : > { %v1403_v7 = vpop.eup %1402 }
 0x259   : > { %v1042_v9 = vmul.f32 %v1403_v7, %v1028_v60  ;;  %v1057_v12 = vadd.f32 %v1223_v10, %v1049_v8 }
 0x25b   : > { %v1050_v11 = vmul.f32 %v1222_v6, %v1042_v9 }
 0x25d   : > { %v1058_v13 = vadd.f32 %v1223_v10, %v1050_v11 }
 0x25f   : > { %v1238_v14 = vpack.c.bf16 %v1058_v13, %v1057_v12 }
 0x261   : > { %1239 = vst [vmem:[%s278_s14] sm:$0xff] %v1238_v14  }
 0x262 PF: > { %s16_s21 = sadd.s32 1, %s1410_s21  }
 0x263   : > { %p13_p4 = scmp.ge.s32.totalorder %s16_s21, 4  }
 0x265   :  { %15 = sbr.rel (!%p13_p4) target bundleno = 1 (0x1), region = 77 }

// kernel: language_model_forward.37
= control target key start
LH: loop header
LB: loop body
LE: loop exit
PB: predicated region body
PF: predicated region fallthrough
CT: control target
= control target key end

     0   :  { %s275_s1 = inlined_call_operand.vmem [shape: bf16[128,128], index: 1, kind: input, shape index: {}]   ;;  %s276_s0 = inlined_call_operand.vmem [shape: bf16[32,128], index: 0, kind: input, shape index: {}]   ;;  %s277_s2 = inlined_call_operand.vmem [shape: f32[1,128], index: 2, kind: input, shape index: {}]   ;;  %s278_s3 = inlined_call_operand.vmem [shape: f32[32,128], index: 3, kind: output, shape index: {}]  }
   0x1   :  { %v200_v0 = vld [vmem:[%s275_s1] sm:$0xff]   ;;  %v201_v1 = vld [vmem:[%s275_s1 + $0x8] sm:$0xff]   ;;  %v202_v2 = vld [vmem:[%s275_s1 + $0x10] sm:$0xff]  }
   0x2   :  { %180 = vmatprep.subr.bf16.mxu0 %v200_v0  ;;  %v203_v3 = vld [vmem:[%s275_s1 + $0x18] sm:$0xff]   ;;  %v208_v4 = vld [vmem:[%s276_s0] sm:$0xff]   ;;  %v205_v6 = vld [vmem:[%s275_s1 + $0x28] sm:$0xff]  }
   0x3   :  { %181 = vmatpush3.bf16.msra.mxu0 %v200_v0  ;;  %196 = vmatprep.mubr.bf16.mxu0 %v208_v4  ;;  %v204_v5 = vld [vmem:[%s275_s1 + $0x20] sm:$0xff]   ;;  %v206_v7 = vld [vmem:[%s275_s1 + $0x30] sm:$0xff]   ;;  %v207_v8 = vld [vmem:[%s275_s1 + $0x38] sm:$0xff]  }
   0x4   :  { %182 = vmatprep.subr.bf16.mxu0 %v201_v1  ;;  %v209_v9 = vld [vmem:[%s276_s0 + $0x8] sm:$0xff]   ;;  %v159_v10 = vld [vmem:[%s277_s2] ss:$0 sm:$0xff] }
   0x7   :  { %183 = vmatpush3.bf16.msra.mxu0 %v201_v1 }
   0x8   :  { %184 = vmatprep.subr.bf16.mxu0 %v202_v2 }
   0xb   :  { %185 = vmatpush3.bf16.msra.mxu0 %v202_v2 }
   0xc   :  { %186 = vmatprep.subr.bf16.mxu0 %v203_v3 }
   0xf   :  { %187 = vmatpush3.bf16.msra.mxu0 %v203_v3 }
  0x10   :  { %188 = vmatprep.subr.bf16.mxu0 %v204_v5 }
  0x13   :  { %189 = vmatpush3.bf16.msra.mxu0 %v204_v5 }
  0x14   :  { %190 = vmatprep.subr.bf16.mxu0 %v205_v6 }
  0x17   :  { %191 = vmatpush3.bf16.msra.mxu0 %v205_v6 }
  0x18   :  { %192 = vmatprep.subr.bf16.mxu0 %v206_v7 }
  0x1b   :  { %193 = vmatpush3.bf16.msra.mxu0 %v206_v7 }
  0x1c   :  { %194 = vmatprep.subr.bf16.mxu0 %v207_v8 }
  0x1f   :  { %195 = vmatpush3.bf16.msra.mxu0 %v207_v8 }
  0x22   :  { %197 = vmatmul.mubr.bf16.vlgmr.msra.gmra.mrb[0].mxu0 %v209_v9 }
  0xf5   :  { %v198_v11 = vpop.f32.mrb[0].mxu0 }
  0xf6   :  { %v145_v12 = vadd.f32 %v198_v11, %v159_v10  ;;  %v136_v13 = vpop.f32.mrb[1].mxu0 }
  0xf7   :  { %v137_v14 = vadd.f32 %v159_v10, %v136_v13  ;;  %v199_v15 = vpop.f32.mrb[2].mxu0 }
  0xf8   :  { %153 = vst [vmem:[%s278_s3 + $0x10] sm:$0xff] %v145_v12  ;;  %v148_v16 = vadd.f32 %v199_v15, %v159_v10  ;;  %v139_v17 = vpop.f32.mrb[3].mxu0 }
  0xf9   :  { %151 = vst [vmem:[%s278_s3] sm:$0xff] %v137_v14  ;;  %v140_v18 = vadd.f32 %v159_v10, %v139_v17 }
  0xfa   :  { %154 = vst [vmem:[%s278_s3 + $0x18] sm:$0xff] %v148_v16 }
  0xfb   :  { %152 = vst [vmem:[%s278_s3 + $0x8] sm:$0xff] %v140_v18 }

</bundles_post_ra>
